<compile_context>
chip_gen: v6e
topology: v6e:2x2x1
jax: 0.10.0
libtpu: 0.0.40
codegen_flags: <defaults>
</compile_context>

<pallas_src>
import jax
import jax.numpy as jnp
from jax.experimental import pallas as pl
from jax.experimental.pallas import tpu as pltpu

# ---------------- small-BERT config (synthetic, deterministic) ----------------
HIDDEN = 32
NUM_LAYERS = 2
NUM_HEADS = 2
HEAD_DIM = HIDDEN // NUM_HEADS
INTERMEDIATE = 64
VOCAB = 128            # == 128 lanes -> one-hot gather is a single dense MXU pass
MAX_POS = 16
TYPE_VOCAB = 2
LN_EPS = 1e-12
BN_EPS = 1e-5
INV_SQRT2 = 0.7071067811865476

# bf16 MXU operands with f32 accumulation (preferred_element_type).  All of
# v5e/v6e/v7x MXUs are bf16-native; only the matmul OPERANDS are cast, all VPU
# math (LayerNorm, softmax, GELU, residuals) stays f32.
MXU_DTYPE = jnp.bfloat16

# How many token rows (TB * S) we are willing to pack into one grid step.
MAX_ROWS_PER_STEP = 256


# ------------------------------ fused Pallas kernel ---------------------------
def _make_kernel(tb: int, seq: int):
    """Kernel factory; one grid step processes `tb` whole batch elements."""
    rows = tb * seq

    def kernel(tok_ref, wemb_ref, pt_ref, eln_g_ref, eln_b_ref,
               q_w_ref, q_b_ref, k_w_ref, k_b_ref, v_w_ref, v_b_ref,
               o_w_ref, o_b_ref, ln1_g_ref, ln1_b_ref,
               i_w_ref, i_b_ref, f_w_ref, f_b_ref, ln2_g_ref, ln2_b_ref,
               mlm_w_ref, mlm_b_ref, out_ref):

        def mm(a, w):
            return jnp.dot(a.astype(MXU_DTYPE), w.astype(MXU_DTYPE),
                           preferred_element_type=jnp.float32)

        def layernorm(x, g, b):
            mu = jnp.mean(x, axis=-1, keepdims=True)
            var = jnp.mean(jnp.square(x - mu), axis=-1, keepdims=True)
            return (x - mu) * jax.lax.rsqrt(var + LN_EPS) * g + b

        # --- embedding gather inside the kernel: one-hot (rows, VOCAB) @ word_emb.
        #     Kept in f32 so the gathered rows are bit-exact (0/1 selectors). ---
        ids = tok_ref[...]                                             # (rows, 1) i32
        onehot = (ids == jax.lax.broadcasted_iota(jnp.int32, (rows, VOCAB), 1))
        emb = jnp.dot(onehot.astype(jnp.float32), wemb_ref[...],
                      preferred_element_type=jnp.float32) + pt_ref[...]
        x = layernorm(emb, eln_g_ref[...], eln_b_ref[...])             # (rows, H)

        for l in range(NUM_LAYERS):                  # unrolled at trace time
            # --- multi-head self-attention; per-head weights start at lane 0 ---
            attn = o_b_ref[l]                                          # (1, H)
            for h in range(NUM_HEADS):
                # projections over ALL packed rows at once
                q = mm(x, q_w_ref[l, h]) + q_b_ref[l, h]               # (rows, Dh)
                k = mm(x, k_w_ref[l, h]) + k_b_ref[l, h]               # 1/sqrt(Dh)
                v = mm(x, v_w_ref[l, h]) + v_b_ref[l, h]               # folded in q
                # per-batch (S, S) attention: Python-unrolled, sublane-aligned
                # row slices (multiples of 8), so no cross-batch attention.
                ctx_parts = []
                for b in range(tb):
                    r0 = b * seq
                    qb = q[r0:r0 + seq].astype(MXU_DTYPE)
                    kb = k[r0:r0 + seq].astype(MXU_DTYPE)
                    vb = v[r0:r0 + seq].astype(MXU_DTYPE)
                    # contract last dims -> no explicit k transpose materialized
                    s = jax.lax.dot_general(
                        qb, kb, (((1,), (1,)), ((), ())),
                        preferred_element_type=jnp.float32)            # (S, S)
                    m = jnp.max(s, axis=-1, keepdims=True)
                    e = jnp.exp(s - m)
                    p = e * pl.reciprocal(jnp.sum(e, axis=-1, keepdims=True),
                                          approx=True)
                    ctx_parts.append(jnp.dot(p.astype(MXU_DTYPE), vb,
                                             preferred_element_type=jnp.float32))
                ctx = jnp.concatenate(ctx_parts, axis=0)               # (rows, Dh)
                # per-head output projection accumulated (replaces lane concat)
                attn = attn + mm(ctx, o_w_ref[l, h])                   # (rows, H)
            x = layernorm(attn + x, ln1_g_ref[l], ln1_b_ref[l])

            # --- FFN (exact-erf GELU for parity with nn.GELU) + residual + LN ---
            inter = mm(x, i_w_ref[l]) + i_b_ref[l]
            inter = 0.5 * inter * (1.0 + jax.lax.erf(inter * INV_SQRT2))
            ffn = mm(inter, f_w_ref[l]) + f_b_ref[l]
            x = layernorm(ffn + x, ln2_g_ref[l], ln2_b_ref[l])

        # --- MLM head (eval-mode BatchNorm folded into these weights).
        #     Computed for ALL rows so the store stays a dense (rows, 128) tile;
        #     the [CLS] drop is one trivial slice on the tiny final output. ---
        out_ref[...] = mm(x, mlm_w_ref[...]) + mlm_b_ref[...]

    return kernel


# ------------------------------ parameter setup -------------------------------
def init_params(key):
    std = 0.02

    def nrm(k, shape):
        return std * jax.random.normal(k, shape, dtype=jnp.float32)

    keys = jax.random.split(key, 4 + NUM_LAYERS)
    p = {
        "word_emb": nrm(keys[0], (VOCAB, HIDDEN)),
        "pos_emb": nrm(keys[1], (MAX_POS, HIDDEN)),
        "type_emb": nrm(keys[2], (TYPE_VOCAB, HIDDEN)),
        "emb_ln_g": jnp.ones((HIDDEN,), jnp.float32),
        "emb_ln_b": jnp.zeros((HIDDEN,), jnp.float32),
        "layers": [],
        # BatchNorm1d(bert_dim): PyTorch defaults (gamma=1, beta=0, stats 0/1)
        "bn_g": jnp.ones((HIDDEN,), jnp.float32),
        "bn_b": jnp.zeros((HIDDEN,), jnp.float32),
        "bn_mean": jnp.zeros((HIDDEN,), jnp.float32),
        "bn_var": jnp.ones((HIDDEN,), jnp.float32),
    }
    for l in range(NUM_LAYERS):
        lk = jax.random.split(keys[3 + l], 6)
        p["layers"].append({
            "q_w": nrm(lk[0], (HIDDEN, HIDDEN)), "q_b": jnp.zeros((HIDDEN,), jnp.float32),
            "k_w": nrm(lk[1], (HIDDEN, HIDDEN)), "k_b": jnp.zeros((HIDDEN,), jnp.float32),
            "v_w": nrm(lk[2], (HIDDEN, HIDDEN)), "v_b": jnp.zeros((HIDDEN,), jnp.float32),
            "o_w": nrm(lk[3], (HIDDEN, HIDDEN)), "o_b": jnp.zeros((HIDDEN,), jnp.float32),
            "attn_ln_g": jnp.ones((HIDDEN,), jnp.float32),
            "attn_ln_b": jnp.zeros((HIDDEN,), jnp.float32),
            "i_w": nrm(lk[4], (HIDDEN, INTERMEDIATE)),
            "i_b": jnp.zeros((INTERMEDIATE,), jnp.float32),
            "f_w": nrm(lk[5], (INTERMEDIATE, HIDDEN)),
            "f_b": jnp.zeros((HIDDEN,), jnp.float32),
            "out_ln_g": jnp.ones((HIDDEN,), jnp.float32),
            "out_ln_b": jnp.zeros((HIDDEN,), jnp.float32),
        })
    mk = jax.random.split(keys[3 + NUM_LAYERS - 1], 2)[1]
    p["mlm_w"] = nrm(mk, (HIDDEN, VOCAB))
    p["mlm_b"] = jnp.zeros((VOCAB,), jnp.float32)
    # note: ns_fc exists in the module but is unused by forward(); omitted.
    return p


def prepare_fused_params(p):
    """Per-head weight layouts (lane-0 aligned), Q-scale fold, BN fold."""
    L, H, NH, Dh = NUM_LAYERS, HIDDEN, NUM_HEADS, HEAD_DIM
    scale = 1.0 / (Dh ** 0.5)

    def head_w(name, s=1.0):                         # (L,H,H) -> (L,NH,H,Dh)
        w = jnp.stack([lyr[name] for lyr in p["layers"]], axis=0) * s
        return w.reshape(L, H, NH, Dh).transpose(0, 2, 1, 3)

    def head_b(name, s=1.0):                         # (L,H) -> (L,NH,1,Dh)
        b = jnp.stack([lyr[name] for lyr in p["layers"]], axis=0) * s
        return b.reshape(L, NH, 1, Dh)

    def stack(name):
        return jnp.stack([lyr[name] for lyr in p["layers"]], axis=0)

    def stack_vec(name):
        return stack(name)[:, None, :]

    # o_w rows (input dim = concatenated head dims) split per head.
    o_w = stack("o_w").reshape(L, NH, Dh, H)

    # eval-mode BatchNorm1d is a per-channel affine: fold into the MLM head.
    bn_scale = p["bn_g"] / jnp.sqrt(p["bn_var"] + BN_EPS)     # (H,)
    bn_shift = p["bn_b"] - p["bn_mean"] * bn_scale            # (H,)
    mlm_w_bn = p["mlm_w"] * bn_scale[:, None]                 # (H, V)
    mlm_b_bn = p["mlm_b"] + bn_shift @ p["mlm_w"]             # (V,)

    return {
        "eln_g": p["emb_ln_g"][None, :], "eln_b": p["emb_ln_b"][None, :],
        "q_w": head_w("q_w", scale), "q_b": head_b("q_b", scale),
        "k_w": head_w("k_w"), "k_b": head_b("k_b"),
        "v_w": head_w("v_w"), "v_b": head_b("v_b"),
        "o_w": o_w, "o_b": stack_vec("o_b"),
        "ln1_g": stack_vec("attn_ln_g"), "ln1_b": stack_vec("attn_ln_b"),
        "i_w": stack("i_w"), "i_b": stack_vec("i_b"),
        "f_w": stack("f_w"), "f_b": stack_vec("f_b"),
        "ln2_g": stack_vec("out_ln_g"), "ln2_b": stack_vec("out_ln_b"),
        "mlm_w": mlm_w_bn, "mlm_b": mlm_b_bn[None, :],
    }


# --------------------------------- forward ------------------------------------
def mlm_bert_forward(params, token_ids):
    B, S = token_ids.shape
    H, L, I, V = HIDDEN, NUM_LAYERS, INTERMEDIATE, VOCAB
    NH, Dh = NUM_HEADS, HEAD_DIM

    # Pack as many batch elements as fit the row budget into one grid step
    # (for B=2, S=8 -> tb=2, grid=(1,)).  For large B the leading grid axis
    # reappears and shards across TensorCores on v7x ("parallel"; use
    # pltpu.CORE_PARALLEL there if explicit megacore sharding is required).
    tb = B
    while tb > 1 and (tb * S > MAX_ROWS_PER_STEP or B % tb != 0):
        tb -= 1
    nblk = B // tb
    rows = tb * S

    fp = prepare_fused_params(params)
    # position + token-type(=0) embedding rows, pre-tiled for one packed block
    # (weight-side constant; segment ids assumed 0, attention mask all-ones).
    pos_type = (jnp.tile(params["pos_emb"][:S], (tb, 1))
                + params["type_emb"][0][None, :])                # (rows, H)
    tok = token_ids.reshape(B * S, 1).astype(jnp.int32)

    def rep(nd):
        return lambda i: (0,) * nd

    in_specs = [
        pl.BlockSpec((rows, 1), lambda i: (i, 0)),   # token ids (per packed block)
        pl.BlockSpec((V, H), rep(2)),                # word_emb (resident)
        pl.BlockSpec((rows, H), rep(2)),             # pos+type rows
        pl.BlockSpec((1, H), rep(2)),                # emb_ln_g
        pl.BlockSpec((1, H), rep(2)),                # emb_ln_b
        pl.BlockSpec((L, NH, H, Dh), rep(4)),        # q_w (scale folded)
        pl.BlockSpec((L, NH, 1, Dh), rep(4)),        # q_b (scale folded)
        pl.BlockSpec((L, NH, H, Dh), rep(4)),        # k_w
        pl.BlockSpec((L, NH, 1, Dh), rep(4)),        # k_b
        pl.BlockSpec((L, NH, H, Dh), rep(4)),        # v_w
        pl.BlockSpec((L, NH, 1, Dh), rep(4)),        # v_b
        pl.BlockSpec((L, NH, Dh, H), rep(4)),        # o_w (per-head rows)
        pl.BlockSpec((L, 1, H), rep(3)),             # o_b
        pl.BlockSpec((L, 1, H), rep(3)),             # ln1_g
        pl.BlockSpec((L, 1, H), rep(3)),             # ln1_b
        pl.BlockSpec((L, H, I), rep(3)),             # i_w
        pl.BlockSpec((L, 1, I), rep(3)),             # i_b
        pl.BlockSpec((L, I, H), rep(3)),             # f_w
        pl.BlockSpec((L, 1, H), rep(3)),             # f_b
        pl.BlockSpec((L, 1, H), rep(3)),             # ln2_g
        pl.BlockSpec((L, 1, H), rep(3)),             # ln2_b
        pl.BlockSpec((H, V), rep(2)),                # mlm_w (BN folded)
        pl.BlockSpec((1, V), rep(2)),                # mlm_b (BN folded)
    ]

    logits = pl.pallas_call(
        _make_kernel(tb, S),
        grid=(nblk,),
        in_specs=in_specs,
        out_specs=pl.BlockSpec((rows, V), lambda i: (i, 0)),
        out_shape=jax.ShapeDtypeStruct((B * S, V), jnp.float32),
        compiler_params=pltpu.CompilerParams(
            dimension_semantics=("parallel",)),
    )(tok, params["word_emb"], pos_type, fp["eln_g"], fp["eln_b"],
      fp["q_w"], fp["q_b"], fp["k_w"], fp["k_b"], fp["v_w"], fp["v_b"],
      fp["o_w"], fp["o_b"], fp["ln1_g"], fp["ln1_b"],
      fp["i_w"], fp["i_b"], fp["f_w"], fp["f_b"], fp["ln2_g"], fp["ln2_b"],
      fp["mlm_w"], fp["mlm_b"])

    # dropout: identity in inference.
    # TODO(synk): training-mode dropout (p=0.4) and batch-statistic BatchNorm
    # are not implemented; eval-mode semantics used here.

    # drop [CLS] position on the final tiny output (one cheap XLA slice).
    return logits.reshape(B, S, V)[:, 1:, :]


if __name__ == "__main__":
    key = jax.random.PRNGKey(0)
    pkey, dkey = jax.random.split(key)
    params = init_params(pkey)

    B, S = 2, 8
    token_ids = jax.random.randint(dkey, (B, S), 0, VOCAB, dtype=jnp.int32)

    out = mlm_bert_forward(params, token_ids)
    out = jax.block_until_ready(out)
    assert out.shape == (B, S - 1, VOCAB), out.shape
    assert out.dtype == jnp.float32
    assert bool(jnp.all(jnp.isfinite(out)))
    print("KERNEL_OK")
</pallas_src>

<mosaic_0001>
module attributes {stable_mosaic.version = 11 : i64} {
  func.func @kernel(%arg0: i32, %arg1: memref<16x1xi32, #tpu.memory_space<vmem>>, %arg2: memref<128x32xf32, #tpu.memory_space<vmem>>, %arg3: memref<16x32xf32, #tpu.memory_space<vmem>>, %arg4: memref<1x32xf32, #tpu.memory_space<vmem>>, %arg5: memref<1x32xf32, #tpu.memory_space<vmem>>, %arg6: memref<2x2x32x16xf32, #tpu.memory_space<vmem>>, %arg7: memref<2x2x1x16xf32, #tpu.memory_space<vmem>>, %arg8: memref<2x2x32x16xf32, #tpu.memory_space<vmem>>, %arg9: memref<2x2x1x16xf32, #tpu.memory_space<vmem>>, %arg10: memref<2x2x32x16xf32, #tpu.memory_space<vmem>>, %arg11: memref<2x2x1x16xf32, #tpu.memory_space<vmem>>, %arg12: memref<2x2x16x32xf32, #tpu.memory_space<vmem>>, %arg13: memref<2x1x32xf32, #tpu.memory_space<vmem>>, %arg14: memref<2x1x32xf32, #tpu.memory_space<vmem>>, %arg15: memref<2x1x32xf32, #tpu.memory_space<vmem>>, %arg16: memref<2x32x64xf32, #tpu.memory_space<vmem>>, %arg17: memref<2x1x64xf32, #tpu.memory_space<vmem>>, %arg18: memref<2x64x32xf32, #tpu.memory_space<vmem>>, %arg19: memref<2x1x32xf32, #tpu.memory_space<vmem>>, %arg20: memref<2x1x32xf32, #tpu.memory_space<vmem>>, %arg21: memref<2x1x32xf32, #tpu.memory_space<vmem>>, %arg22: memref<32x128xf32, #tpu.memory_space<vmem>>, %arg23: memref<1x128xf32, #tpu.memory_space<vmem>>, %arg24: memref<16x128xf32, #tpu.memory_space<vmem>>) attributes {dimension_semantics = [#tpu.dimension_semantics<parallel>], iteration_bounds = array<i64: 1>, scalar_prefetch = 0 : i64, scratch_operands = 0 : i64, tpu.core_type = #tpu.core_type<tc>, window_params = [{transform_indices = @transform_0, window_bounds = array<i64: 16, 1>}, {pipeline_mode = #tpu.pipeline_mode<synchronous>, transform_indices = @transform_1, window_bounds = array<i64: 128, 32>}, {pipeline_mode = #tpu.pipeline_mode<synchronous>, transform_indices = @transform_2, window_bounds = array<i64: 16, 32>}, {pipeline_mode = #tpu.pipeline_mode<synchronous>, transform_indices = @transform_3, window_bounds = array<i64: 1, 32>}, {pipeline_mode = #tpu.pipeline_mode<synchronous>, transform_indices = @transform_4, window_bounds = array<i64: 1, 32>}, {pipeline_mode = #tpu.pipeline_mode<synchronous>, transform_indices = @transform_5, window_bounds = array<i64: 2, 2, 32, 16>}, {pipeline_mode = #tpu.pipeline_mode<synchronous>, transform_indices = @transform_6, window_bounds = array<i64: 2, 2, 1, 16>}, {pipeline_mode = #tpu.pipeline_mode<synchronous>, transform_indices = @transform_7, window_bounds = array<i64: 2, 2, 32, 16>}, {pipeline_mode = #tpu.pipeline_mode<synchronous>, transform_indices = @transform_8, window_bounds = array<i64: 2, 2, 1, 16>}, {pipeline_mode = #tpu.pipeline_mode<synchronous>, transform_indices = @transform_9, window_bounds = array<i64: 2, 2, 32, 16>}, {pipeline_mode = #tpu.pipeline_mode<synchronous>, transform_indices = @transform_10, window_bounds = array<i64: 2, 2, 1, 16>}, {pipeline_mode = #tpu.pipeline_mode<synchronous>, transform_indices = @transform_11, window_bounds = array<i64: 2, 2, 16, 32>}, {pipeline_mode = #tpu.pipeline_mode<synchronous>, transform_indices = @transform_12, window_bounds = array<i64: 2, 1, 32>}, {pipeline_mode = #tpu.pipeline_mode<synchronous>, transform_indices = @transform_13, window_bounds = array<i64: 2, 1, 32>}, {pipeline_mode = #tpu.pipeline_mode<synchronous>, transform_indices = @transform_14, window_bounds = array<i64: 2, 1, 32>}, {pipeline_mode = #tpu.pipeline_mode<synchronous>, transform_indices = @transform_15, window_bounds = array<i64: 2, 32, 64>}, {pipeline_mode = #tpu.pipeline_mode<synchronous>, transform_indices = @transform_16, window_bounds = array<i64: 2, 1, 64>}, {pipeline_mode = #tpu.pipeline_mode<synchronous>, transform_indices = @transform_17, window_bounds = array<i64: 2, 64, 32>}, {pipeline_mode = #tpu.pipeline_mode<synchronous>, transform_indices = @transform_18, window_bounds = array<i64: 2, 1, 32>}, {pipeline_mode = #tpu.pipeline_mode<synchronous>, transform_indices = @transform_19, window_bounds = array<i64: 2, 1, 32>}, {pipeline_mode = #tpu.pipeline_mode<synchronous>, transform_indices = @transform_20, window_bounds = array<i64: 2, 1, 32>}, {pipeline_mode = #tpu.pipeline_mode<synchronous>, transform_indices = @transform_21, window_bounds = array<i64: 32, 128>}, {pipeline_mode = #tpu.pipeline_mode<synchronous>, transform_indices = @transform_22, window_bounds = array<i64: 1, 128>}, {transform_indices = @transform_23, window_bounds = array<i64: 16, 128>}]} {
    %c0 = arith.constant 0 : index
    %c0_0 = arith.constant 0 : index
    %0 = vector.load %arg1[%c0, %c0_0] : memref<16x1xi32, #tpu.memory_space<vmem>>, vector<16x1xi32>
    %1 = tpu.iota {dimensions = array<i32: 1>} : vector<16x128xi32>
    %2 = vector.broadcast %0 : vector<16x1xi32> to vector<16x128xi32>
    %3 = arith.cmpi eq, %2, %1 : vector<16x128xi32>
    %4 = arith.extui %3 : vector<16x128xi1> to vector<16x128xi32>
    %5 = arith.sitofp %4 : vector<16x128xi32> to vector<16x128xf32>
    %c0_1 = arith.constant 0 : index
    %c0_2 = arith.constant 0 : index
    %6 = vector.load %arg2[%c0_1, %c0_2] : memref<128x32xf32, #tpu.memory_space<vmem>>, vector<128x32xf32>
    %cst = arith.constant dense<0.000000e+00> : vector<16x32xf32>
    %7 = tpu.matmul %5, %6, %cst {dimension_numbers = #tpu.dot_dimension_numbers<[1], [0], [0], [1], [0, 0, 1, 1], [], []>} : vector<16x128xf32>, vector<128x32xf32>, vector<16x32xf32> -> vector<16x32xf32>
    %c0_3 = arith.constant 0 : index
    %c0_4 = arith.constant 0 : index
    %8 = vector.load %arg3[%c0_3, %c0_4] : memref<16x32xf32, #tpu.memory_space<vmem>>, vector<16x32xf32>
    %9 = arith.addf %7, %8 : vector<16x32xf32>
    %c0_5 = arith.constant 0 : index
    %c0_6 = arith.constant 0 : index
    %10 = vector.load %arg4[%c0_5, %c0_6] : memref<1x32xf32, #tpu.memory_space<vmem>>, vector<1x32xf32>
    %c0_7 = arith.constant 0 : index
    %c0_8 = arith.constant 0 : index
    %11 = vector.load %arg5[%c0_7, %c0_8] : memref<1x32xf32, #tpu.memory_space<vmem>>, vector<1x32xf32>
    %cst_9 = arith.constant dense<0.000000e+00> : vector<16xf32>
    %12 = vector.multi_reduction <add>, %9, %cst_9 [1] : vector<16x32xf32> to vector<16xf32>
    %13 = vector.shape_cast %12 : vector<16xf32> to vector<16x1xf32>
    %cst_10 = arith.constant 3.200000e+01 : f32
    %14 = vector.broadcast %cst_10 : f32 to vector<16x1xf32>
    %15 = arith.divf %13, %14 : vector<16x1xf32>
    %16 = vector.broadcast %15 : vector<16x1xf32> to vector<16x32xf32>
    %17 = arith.subf %9, %16 : vector<16x32xf32>
    %18 = arith.mulf %17, %17 : vector<16x32xf32>
    %cst_11 = arith.constant dense<0.000000e+00> : vector<16xf32>
    %19 = vector.multi_reduction <add>, %18, %cst_11 [1] : vector<16x32xf32> to vector<16xf32>
    %20 = vector.shape_cast %19 : vector<16xf32> to vector<16x1xf32>
    %cst_12 = arith.constant 3.200000e+01 : f32
    %21 = vector.broadcast %cst_12 : f32 to vector<16x1xf32>
    %22 = arith.divf %20, %21 : vector<16x1xf32>
    %23 = vector.broadcast %15 : vector<16x1xf32> to vector<16x32xf32>
    %24 = arith.subf %9, %23 : vector<16x32xf32>
    %cst_13 = arith.constant 9.99999996E-13 : f32
    %25 = vector.broadcast %cst_13 : f32 to vector<16x1xf32>
    %26 = arith.addf %22, %25 : vector<16x1xf32>
    %27 = math.rsqrt %26 : vector<16x1xf32>
    %28 = vector.broadcast %27 : vector<16x1xf32> to vector<16x32xf32>
    %29 = arith.mulf %24, %28 : vector<16x32xf32>
    %30 = vector.broadcast %10 : vector<1x32xf32> to vector<16x32xf32>
    %31 = arith.mulf %29, %30 : vector<16x32xf32>
    %32 = vector.broadcast %11 : vector<1x32xf32> to vector<16x32xf32>
    %33 = arith.addf %31, %32 : vector<16x32xf32>
    %c0_14 = arith.constant 0 : index
    %c0_15 = arith.constant 0 : index
    %c0_16 = arith.constant 0 : index
    %34 = vector.load %arg13[%c0_14, %c0_15, %c0_16] : memref<2x1x32xf32, #tpu.memory_space<vmem>>, vector<1x1x32xf32>
    %35 = vector.shape_cast %34 : vector<1x1x32xf32> to vector<1x32xf32>
    %c0_17 = arith.constant 0 : index
    %c0_18 = arith.constant 0 : index
    %c0_19 = arith.constant 0 : index
    %c0_20 = arith.constant 0 : index
    %36 = vector.load %arg6[%c0_17, %c0_18, %c0_19, %c0_20] : memref<2x2x32x16xf32, #tpu.memory_space<vmem>>, vector<1x1x32x16xf32>
    %37 = vector.shape_cast %36 : vector<1x1x32x16xf32> to vector<32x16xf32>
    %38 = arith.truncf %33 : vector<16x32xf32> to vector<16x32xbf16>
    %39 = arith.truncf %37 : vector<32x16xf32> to vector<32x16xbf16>
    %cst_21 = arith.constant dense<0.000000e+00> : vector<16x16xf32>
    %40 = tpu.matmul %38, %39, %cst_21 {dimension_numbers = #tpu.dot_dimension_numbers<[1], [0], [0], [1], [0, 0, 1, 1], [], []>} : vector<16x32xbf16>, vector<32x16xbf16>, vector<16x16xf32> -> vector<16x16xf32>
    %c0_22 = arith.constant 0 : index
    %c0_23 = arith.constant 0 : index
    %c0_24 = arith.constant 0 : index
    %c0_25 = arith.constant 0 : index
    %41 = vector.load %arg7[%c0_22, %c0_23, %c0_24, %c0_25] : memref<2x2x1x16xf32, #tpu.memory_space<vmem>>, vector<1x1x1x16xf32>
    %42 = vector.shape_cast %41 : vector<1x1x1x16xf32> to vector<1x16xf32>
    %43 = vector.broadcast %42 : vector<1x16xf32> to vector<16x16xf32>
    %44 = arith.addf %40, %43 : vector<16x16xf32>
    %c0_26 = arith.constant 0 : index
    %c0_27 = arith.constant 0 : index
    %c0_28 = arith.constant 0 : index
    %c0_29 = arith.constant 0 : index
    %45 = vector.load %arg8[%c0_26, %c0_27, %c0_28, %c0_29] : memref<2x2x32x16xf32, #tpu.memory_space<vmem>>, vector<1x1x32x16xf32>
    %46 = vector.shape_cast %45 : vector<1x1x32x16xf32> to vector<32x16xf32>
    %47 = arith.truncf %33 : vector<16x32xf32> to vector<16x32xbf16>
    %48 = arith.truncf %46 : vector<32x16xf32> to vector<32x16xbf16>
    %cst_30 = arith.constant dense<0.000000e+00> : vector<16x16xf32>
    %49 = tpu.matmul %47, %48, %cst_30 {dimension_numbers = #tpu.dot_dimension_numbers<[1], [0], [0], [1], [0, 0, 1, 1], [], []>} : vector<16x32xbf16>, vector<32x16xbf16>, vector<16x16xf32> -> vector<16x16xf32>
    %c0_31 = arith.constant 0 : index
    %c0_32 = arith.constant 0 : index
    %c0_33 = arith.constant 0 : index
    %c0_34 = arith.constant 0 : index
    %50 = vector.load %arg9[%c0_31, %c0_32, %c0_33, %c0_34] : memref<2x2x1x16xf32, #tpu.memory_space<vmem>>, vector<1x1x1x16xf32>
    %51 = vector.shape_cast %50 : vector<1x1x1x16xf32> to vector<1x16xf32>
    %52 = vector.broadcast %51 : vector<1x16xf32> to vector<16x16xf32>
    %53 = arith.addf %49, %52 : vector<16x16xf32>
    %c0_35 = arith.constant 0 : index
    %c0_36 = arith.constant 0 : index
    %c0_37 = arith.constant 0 : index
    %c0_38 = arith.constant 0 : index
    %54 = vector.load %arg10[%c0_35, %c0_36, %c0_37, %c0_38] : memref<2x2x32x16xf32, #tpu.memory_space<vmem>>, vector<1x1x32x16xf32>
    %55 = vector.shape_cast %54 : vector<1x1x32x16xf32> to vector<32x16xf32>
    %56 = arith.truncf %33 : vector<16x32xf32> to vector<16x32xbf16>
    %57 = arith.truncf %55 : vector<32x16xf32> to vector<32x16xbf16>
    %cst_39 = arith.constant dense<0.000000e+00> : vector<16x16xf32>
    %58 = tpu.matmul %56, %57, %cst_39 {dimension_numbers = #tpu.dot_dimension_numbers<[1], [0], [0], [1], [0, 0, 1, 1], [], []>} : vector<16x32xbf16>, vector<32x16xbf16>, vector<16x16xf32> -> vector<16x16xf32>
    %c0_40 = arith.constant 0 : index
    %c0_41 = arith.constant 0 : index
    %c0_42 = arith.constant 0 : index
    %c0_43 = arith.constant 0 : index
    %59 = vector.load %arg11[%c0_40, %c0_41, %c0_42, %c0_43] : memref<2x2x1x16xf32, #tpu.memory_space<vmem>>, vector<1x1x1x16xf32>
    %60 = vector.shape_cast %59 : vector<1x1x1x16xf32> to vector<1x16xf32>
    %61 = vector.broadcast %60 : vector<1x16xf32> to vector<16x16xf32>
    %62 = arith.addf %58, %61 : vector<16x16xf32>
    %63 = vector.extract_strided_slice %44 {offsets = [0, 0], sizes = [8, 16], strides = [1, 1]} : vector<16x16xf32> to vector<8x16xf32>
    %64 = arith.truncf %63 : vector<8x16xf32> to vector<8x16xbf16>
    %65 = vector.extract_strided_slice %53 {offsets = [0, 0], sizes = [8, 16], strides = [1, 1]} : vector<16x16xf32> to vector<8x16xf32>
    %66 = arith.truncf %65 : vector<8x16xf32> to vector<8x16xbf16>
    %67 = vector.extract_strided_slice %62 {offsets = [0, 0], sizes = [8, 16], strides = [1, 1]} : vector<16x16xf32> to vector<8x16xf32>
    %68 = arith.truncf %67 : vector<8x16xf32> to vector<8x16xbf16>
    %cst_44 = arith.constant dense<0.000000e+00> : vector<8x8xf32>
    %69 = tpu.matmul %64, %66, %cst_44 {dimension_numbers = #tpu.dot_dimension_numbers<[1], [1], [0], [0], [0, 0, 1, 0], [], []>} : vector<8x16xbf16>, vector<8x16xbf16>, vector<8x8xf32> -> vector<8x8xf32>
    %cst_45 = arith.constant dense<0xFF800000> : vector<8xf32>
    %70 = vector.multi_reduction <maximumf>, %69, %cst_45 [1] : vector<8x8xf32> to vector<8xf32>
    %71 = vector.shape_cast %70 : vector<8xf32> to vector<8x1xf32>
    %72 = vector.broadcast %71 : vector<8x1xf32> to vector<8x8xf32>
    %73 = arith.subf %69, %72 : vector<8x8xf32>
    %74 = math.exp %73 : vector<8x8xf32>
    %cst_46 = arith.constant dense<0.000000e+00> : vector<8xf32>
    %75 = vector.multi_reduction <add>, %74, %cst_46 [1] : vector<8x8xf32> to vector<8xf32>
    %76 = vector.shape_cast %75 : vector<8xf32> to vector<8x1xf32>
    %77 = tpu.reciprocal %76 {approx = true} : vector<8x1xf32> -> vector<8x1xf32>
    %78 = vector.broadcast %77 : vector<8x1xf32> to vector<8x8xf32>
    %79 = arith.mulf %74, %78 : vector<8x8xf32>
    %80 = arith.truncf %79 : vector<8x8xf32> to vector<8x8xbf16>
    %cst_47 = arith.constant dense<0.000000e+00> : vector<8x16xf32>
    %81 = tpu.matmul %80, %68, %cst_47 {dimension_numbers = #tpu.dot_dimension_numbers<[1], [0], [0], [1], [0, 0, 1, 1], [], []>} : vector<8x8xbf16>, vector<8x16xbf16>, vector<8x16xf32> -> vector<8x16xf32>
    %82 = vector.extract_strided_slice %44 {offsets = [8, 0], sizes = [8, 16], strides = [1, 1]} : vector<16x16xf32> to vector<8x16xf32>
    %83 = arith.truncf %82 : vector<8x16xf32> to vector<8x16xbf16>
    %84 = vector.extract_strided_slice %53 {offsets = [8, 0], sizes = [8, 16], strides = [1, 1]} : vector<16x16xf32> to vector<8x16xf32>
    %85 = arith.truncf %84 : vector<8x16xf32> to vector<8x16xbf16>
    %86 = vector.extract_strided_slice %62 {offsets = [8, 0], sizes = [8, 16], strides = [1, 1]} : vector<16x16xf32> to vector<8x16xf32>
    %87 = arith.truncf %86 : vector<8x16xf32> to vector<8x16xbf16>
    %cst_48 = arith.constant dense<0.000000e+00> : vector<8x8xf32>
    %88 = tpu.matmul %83, %85, %cst_48 {dimension_numbers = #tpu.dot_dimension_numbers<[1], [1], [0], [0], [0, 0, 1, 0], [], []>} : vector<8x16xbf16>, vector<8x16xbf16>, vector<8x8xf32> -> vector<8x8xf32>
    %cst_49 = arith.constant dense<0xFF800000> : vector<8xf32>
    %89 = vector.multi_reduction <maximumf>, %88, %cst_49 [1] : vector<8x8xf32> to vector<8xf32>
    %90 = vector.shape_cast %89 : vector<8xf32> to vector<8x1xf32>
    %91 = vector.broadcast %90 : vector<8x1xf32> to vector<8x8xf32>
    %92 = arith.subf %88, %91 : vector<8x8xf32>
    %93 = math.exp %92 : vector<8x8xf32>
    %cst_50 = arith.constant dense<0.000000e+00> : vector<8xf32>
    %94 = vector.multi_reduction <add>, %93, %cst_50 [1] : vector<8x8xf32> to vector<8xf32>
    %95 = vector.shape_cast %94 : vector<8xf32> to vector<8x1xf32>
    %96 = tpu.reciprocal %95 {approx = true} : vector<8x1xf32> -> vector<8x1xf32>
    %97 = vector.broadcast %96 : vector<8x1xf32> to vector<8x8xf32>
    %98 = arith.mulf %93, %97 : vector<8x8xf32>
    %99 = arith.truncf %98 : vector<8x8xf32> to vector<8x8xbf16>
    %cst_51 = arith.constant dense<0.000000e+00> : vector<8x16xf32>
    %100 = tpu.matmul %99, %87, %cst_51 {dimension_numbers = #tpu.dot_dimension_numbers<[1], [0], [0], [1], [0, 0, 1, 1], [], []>} : vector<8x8xbf16>, vector<8x16xbf16>, vector<8x16xf32> -> vector<8x16xf32>
    %101 = tpu.concatenate %81, %100 in 0 : vector<8x16xf32>, vector<8x16xf32> -> vector<16x16xf32>
    %c0_52 = arith.constant 0 : index
    %c0_53 = arith.constant 0 : index
    %c0_54 = arith.constant 0 : index
    %c0_55 = arith.constant 0 : index
    %102 = vector.load %arg12[%c0_52, %c0_53, %c0_54, %c0_55] : memref<2x2x16x32xf32, #tpu.memory_space<vmem>>, vector<1x1x16x32xf32>
    %103 = vector.shape_cast %102 : vector<1x1x16x32xf32> to vector<16x32xf32>
    %104 = arith.truncf %101 : vector<16x16xf32> to vector<16x16xbf16>
    %105 = arith.truncf %103 : vector<16x32xf32> to vector<16x32xbf16>
    %cst_56 = arith.constant dense<0.000000e+00> : vector<16x32xf32>
    %106 = tpu.matmul %104, %105, %cst_56 {dimension_numbers = #tpu.dot_dimension_numbers<[1], [0], [0], [1], [0, 0, 1, 1], [], []>} : vector<16x16xbf16>, vector<16x32xbf16>, vector<16x32xf32> -> vector<16x32xf32>
    %107 = vector.broadcast %35 : vector<1x32xf32> to vector<16x32xf32>
    %108 = arith.addf %107, %106 : vector<16x32xf32>
    %c0_57 = arith.constant 0 : index
    %c1 = arith.constant 1 : index
    %c0_58 = arith.constant 0 : index
    %c0_59 = arith.constant 0 : index
    %109 = vector.load %arg6[%c0_57, %c1, %c0_58, %c0_59] : memref<2x2x32x16xf32, #tpu.memory_space<vmem>>, vector<1x1x32x16xf32>
    %110 = vector.shape_cast %109 : vector<1x1x32x16xf32> to vector<32x16xf32>
    %111 = arith.truncf %33 : vector<16x32xf32> to vector<16x32xbf16>
    %112 = arith.truncf %110 : vector<32x16xf32> to vector<32x16xbf16>
    %cst_60 = arith.constant dense<0.000000e+00> : vector<16x16xf32>
    %113 = tpu.matmul %111, %112, %cst_60 {dimension_numbers = #tpu.dot_dimension_numbers<[1], [0], [0], [1], [0, 0, 1, 1], [], []>} : vector<16x32xbf16>, vector<32x16xbf16>, vector<16x16xf32> -> vector<16x16xf32>
    %c0_61 = arith.constant 0 : index
    %c1_62 = arith.constant 1 : index
    %c0_63 = arith.constant 0 : index
    %c0_64 = arith.constant 0 : index
    %114 = vector.load %arg7[%c0_61, %c1_62, %c0_63, %c0_64] : memref<2x2x1x16xf32, #tpu.memory_space<vmem>>, vector<1x1x1x16xf32>
    %115 = vector.shape_cast %114 : vector<1x1x1x16xf32> to vector<1x16xf32>
    %116 = vector.broadcast %115 : vector<1x16xf32> to vector<16x16xf32>
    %117 = arith.addf %113, %116 : vector<16x16xf32>
    %c0_65 = arith.constant 0 : index
    %c1_66 = arith.constant 1 : index
    %c0_67 = arith.constant 0 : index
    %c0_68 = arith.constant 0 : index
    %118 = vector.load %arg8[%c0_65, %c1_66, %c0_67, %c0_68] : memref<2x2x32x16xf32, #tpu.memory_space<vmem>>, vector<1x1x32x16xf32>
    %119 = vector.shape_cast %118 : vector<1x1x32x16xf32> to vector<32x16xf32>
    %120 = arith.truncf %33 : vector<16x32xf32> to vector<16x32xbf16>
    %121 = arith.truncf %119 : vector<32x16xf32> to vector<32x16xbf16>
    %cst_69 = arith.constant dense<0.000000e+00> : vector<16x16xf32>
    %122 = tpu.matmul %120, %121, %cst_69 {dimension_numbers = #tpu.dot_dimension_numbers<[1], [0], [0], [1], [0, 0, 1, 1], [], []>} : vector<16x32xbf16>, vector<32x16xbf16>, vector<16x16xf32> -> vector<16x16xf32>
    %c0_70 = arith.constant 0 : index
    %c1_71 = arith.constant 1 : index
    %c0_72 = arith.constant 0 : index
    %c0_73 = arith.constant 0 : index
    %123 = vector.load %arg9[%c0_70, %c1_71, %c0_72, %c0_73] : memref<2x2x1x16xf32, #tpu.memory_space<vmem>>, vector<1x1x1x16xf32>
    %124 = vector.shape_cast %123 : vector<1x1x1x16xf32> to vector<1x16xf32>
    %125 = vector.broadcast %124 : vector<1x16xf32> to vector<16x16xf32>
    %126 = arith.addf %122, %125 : vector<16x16xf32>
    %c0_74 = arith.constant 0 : index
    %c1_75 = arith.constant 1 : index
    %c0_76 = arith.constant 0 : index
    %c0_77 = arith.constant 0 : index
    %127 = vector.load %arg10[%c0_74, %c1_75, %c0_76, %c0_77] : memref<2x2x32x16xf32, #tpu.memory_space<vmem>>, vector<1x1x32x16xf32>
    %128 = vector.shape_cast %127 : vector<1x1x32x16xf32> to vector<32x16xf32>
    %129 = arith.truncf %33 : vector<16x32xf32> to vector<16x32xbf16>
    %130 = arith.truncf %128 : vector<32x16xf32> to vector<32x16xbf16>
    %cst_78 = arith.constant dense<0.000000e+00> : vector<16x16xf32>
    %131 = tpu.matmul %129, %130, %cst_78 {dimension_numbers = #tpu.dot_dimension_numbers<[1], [0], [0], [1], [0, 0, 1, 1], [], []>} : vector<16x32xbf16>, vector<32x16xbf16>, vector<16x16xf32> -> vector<16x16xf32>
    %c0_79 = arith.constant 0 : index
    %c1_80 = arith.constant 1 : index
    %c0_81 = arith.constant 0 : index
    %c0_82 = arith.constant 0 : index
    %132 = vector.load %arg11[%c0_79, %c1_80, %c0_81, %c0_82] : memref<2x2x1x16xf32, #tpu.memory_space<vmem>>, vector<1x1x1x16xf32>
    %133 = vector.shape_cast %132 : vector<1x1x1x16xf32> to vector<1x16xf32>
    %134 = vector.broadcast %133 : vector<1x16xf32> to vector<16x16xf32>
    %135 = arith.addf %131, %134 : vector<16x16xf32>
    %136 = vector.extract_strided_slice %117 {offsets = [0, 0], sizes = [8, 16], strides = [1, 1]} : vector<16x16xf32> to vector<8x16xf32>
    %137 = arith.truncf %136 : vector<8x16xf32> to vector<8x16xbf16>
    %138 = vector.extract_strided_slice %126 {offsets = [0, 0], sizes = [8, 16], strides = [1, 1]} : vector<16x16xf32> to vector<8x16xf32>
    %139 = arith.truncf %138 : vector<8x16xf32> to vector<8x16xbf16>
    %140 = vector.extract_strided_slice %135 {offsets = [0, 0], sizes = [8, 16], strides = [1, 1]} : vector<16x16xf32> to vector<8x16xf32>
    %141 = arith.truncf %140 : vector<8x16xf32> to vector<8x16xbf16>
    %cst_83 = arith.constant dense<0.000000e+00> : vector<8x8xf32>
    %142 = tpu.matmul %137, %139, %cst_83 {dimension_numbers = #tpu.dot_dimension_numbers<[1], [1], [0], [0], [0, 0, 1, 0], [], []>} : vector<8x16xbf16>, vector<8x16xbf16>, vector<8x8xf32> -> vector<8x8xf32>
    %cst_84 = arith.constant dense<0xFF800000> : vector<8xf32>
    %143 = vector.multi_reduction <maximumf>, %142, %cst_84 [1] : vector<8x8xf32> to vector<8xf32>
    %144 = vector.shape_cast %143 : vector<8xf32> to vector<8x1xf32>
    %145 = vector.broadcast %144 : vector<8x1xf32> to vector<8x8xf32>
    %146 = arith.subf %142, %145 : vector<8x8xf32>
    %147 = math.exp %146 : vector<8x8xf32>
    %cst_85 = arith.constant dense<0.000000e+00> : vector<8xf32>
    %148 = vector.multi_reduction <add>, %147, %cst_85 [1] : vector<8x8xf32> to vector<8xf32>
    %149 = vector.shape_cast %148 : vector<8xf32> to vector<8x1xf32>
    %150 = tpu.reciprocal %149 {approx = true} : vector<8x1xf32> -> vector<8x1xf32>
    %151 = vector.broadcast %150 : vector<8x1xf32> to vector<8x8xf32>
    %152 = arith.mulf %147, %151 : vector<8x8xf32>
    %153 = arith.truncf %152 : vector<8x8xf32> to vector<8x8xbf16>
    %cst_86 = arith.constant dense<0.000000e+00> : vector<8x16xf32>
    %154 = tpu.matmul %153, %141, %cst_86 {dimension_numbers = #tpu.dot_dimension_numbers<[1], [0], [0], [1], [0, 0, 1, 1], [], []>} : vector<8x8xbf16>, vector<8x16xbf16>, vector<8x16xf32> -> vector<8x16xf32>
    %155 = vector.extract_strided_slice %117 {offsets = [8, 0], sizes = [8, 16], strides = [1, 1]} : vector<16x16xf32> to vector<8x16xf32>
    %156 = arith.truncf %155 : vector<8x16xf32> to vector<8x16xbf16>
    %157 = vector.extract_strided_slice %126 {offsets = [8, 0], sizes = [8, 16], strides = [1, 1]} : vector<16x16xf32> to vector<8x16xf32>
    %158 = arith.truncf %157 : vector<8x16xf32> to vector<8x16xbf16>
    %159 = vector.extract_strided_slice %135 {offsets = [8, 0], sizes = [8, 16], strides = [1, 1]} : vector<16x16xf32> to vector<8x16xf32>
    %160 = arith.truncf %159 : vector<8x16xf32> to vector<8x16xbf16>
    %cst_87 = arith.constant dense<0.000000e+00> : vector<8x8xf32>
    %161 = tpu.matmul %156, %158, %cst_87 {dimension_numbers = #tpu.dot_dimension_numbers<[1], [1], [0], [0], [0, 0, 1, 0], [], []>} : vector<8x16xbf16>, vector<8x16xbf16>, vector<8x8xf32> -> vector<8x8xf32>
    %cst_88 = arith.constant dense<0xFF800000> : vector<8xf32>
    %162 = vector.multi_reduction <maximumf>, %161, %cst_88 [1] : vector<8x8xf32> to vector<8xf32>
    %163 = vector.shape_cast %162 : vector<8xf32> to vector<8x1xf32>
    %164 = vector.broadcast %163 : vector<8x1xf32> to vector<8x8xf32>
    %165 = arith.subf %161, %164 : vector<8x8xf32>
    %166 = math.exp %165 : vector<8x8xf32>
    %cst_89 = arith.constant dense<0.000000e+00> : vector<8xf32>
    %167 = vector.multi_reduction <add>, %166, %cst_89 [1] : vector<8x8xf32> to vector<8xf32>
    %168 = vector.shape_cast %167 : vector<8xf32> to vector<8x1xf32>
    %169 = tpu.reciprocal %168 {approx = true} : vector<8x1xf32> -> vector<8x1xf32>
    %170 = vector.broadcast %169 : vector<8x1xf32> to vector<8x8xf32>
    %171 = arith.mulf %166, %170 : vector<8x8xf32>
    %172 = arith.truncf %171 : vector<8x8xf32> to vector<8x8xbf16>
    %cst_90 = arith.constant dense<0.000000e+00> : vector<8x16xf32>
    %173 = tpu.matmul %172, %160, %cst_90 {dimension_numbers = #tpu.dot_dimension_numbers<[1], [0], [0], [1], [0, 0, 1, 1], [], []>} : vector<8x8xbf16>, vector<8x16xbf16>, vector<8x16xf32> -> vector<8x16xf32>
    %174 = tpu.concatenate %154, %173 in 0 : vector<8x16xf32>, vector<8x16xf32> -> vector<16x16xf32>
    %c0_91 = arith.constant 0 : index
    %c1_92 = arith.constant 1 : index
    %c0_93 = arith.constant 0 : index
    %c0_94 = arith.constant 0 : index
    %175 = vector.load %arg12[%c0_91, %c1_92, %c0_93, %c0_94] : memref<2x2x16x32xf32, #tpu.memory_space<vmem>>, vector<1x1x16x32xf32>
    %176 = vector.shape_cast %175 : vector<1x1x16x32xf32> to vector<16x32xf32>
    %177 = arith.truncf %174 : vector<16x16xf32> to vector<16x16xbf16>
    %178 = arith.truncf %176 : vector<16x32xf32> to vector<16x32xbf16>
    %cst_95 = arith.constant dense<0.000000e+00> : vector<16x32xf32>
    %179 = tpu.matmul %177, %178, %cst_95 {dimension_numbers = #tpu.dot_dimension_numbers<[1], [0], [0], [1], [0, 0, 1, 1], [], []>} : vector<16x16xbf16>, vector<16x32xbf16>, vector<16x32xf32> -> vector<16x32xf32>
    %180 = arith.addf %108, %179 : vector<16x32xf32>
    %181 = arith.addf %180, %33 : vector<16x32xf32>
    %c0_96 = arith.constant 0 : index
    %c0_97 = arith.constant 0 : index
    %c0_98 = arith.constant 0 : index
    %182 = vector.load %arg14[%c0_96, %c0_97, %c0_98] : memref<2x1x32xf32, #tpu.memory_space<vmem>>, vector<1x1x32xf32>
    %183 = vector.shape_cast %182 : vector<1x1x32xf32> to vector<1x32xf32>
    %c0_99 = arith.constant 0 : index
    %c0_100 = arith.constant 0 : index
    %c0_101 = arith.constant 0 : index
    %184 = vector.load %arg15[%c0_99, %c0_100, %c0_101] : memref<2x1x32xf32, #tpu.memory_space<vmem>>, vector<1x1x32xf32>
    %185 = vector.shape_cast %184 : vector<1x1x32xf32> to vector<1x32xf32>
    %cst_102 = arith.constant dense<0.000000e+00> : vector<16xf32>
    %186 = vector.multi_reduction <add>, %181, %cst_102 [1] : vector<16x32xf32> to vector<16xf32>
    %187 = vector.shape_cast %186 : vector<16xf32> to vector<16x1xf32>
    %cst_103 = arith.constant 3.200000e+01 : f32
    %188 = vector.broadcast %cst_103 : f32 to vector<16x1xf32>
    %189 = arith.divf %187, %188 : vector<16x1xf32>
    %190 = vector.broadcast %189 : vector<16x1xf32> to vector<16x32xf32>
    %191 = arith.subf %181, %190 : vector<16x32xf32>
    %192 = arith.mulf %191, %191 : vector<16x32xf32>
    %cst_104 = arith.constant dense<0.000000e+00> : vector<16xf32>
    %193 = vector.multi_reduction <add>, %192, %cst_104 [1] : vector<16x32xf32> to vector<16xf32>
    %194 = vector.shape_cast %193 : vector<16xf32> to vector<16x1xf32>
    %cst_105 = arith.constant 3.200000e+01 : f32
    %195 = vector.broadcast %cst_105 : f32 to vector<16x1xf32>
    %196 = arith.divf %194, %195 : vector<16x1xf32>
    %197 = vector.broadcast %189 : vector<16x1xf32> to vector<16x32xf32>
    %198 = arith.subf %181, %197 : vector<16x32xf32>
    %cst_106 = arith.constant 9.99999996E-13 : f32
    %199 = vector.broadcast %cst_106 : f32 to vector<16x1xf32>
    %200 = arith.addf %196, %199 : vector<16x1xf32>
    %201 = math.rsqrt %200 : vector<16x1xf32>
    %202 = vector.broadcast %201 : vector<16x1xf32> to vector<16x32xf32>
    %203 = arith.mulf %198, %202 : vector<16x32xf32>
    %204 = vector.broadcast %183 : vector<1x32xf32> to vector<16x32xf32>
    %205 = arith.mulf %203, %204 : vector<16x32xf32>
    %206 = vector.broadcast %185 : vector<1x32xf32> to vector<16x32xf32>
    %207 = arith.addf %205, %206 : vector<16x32xf32>
    %c0_107 = arith.constant 0 : index
    %c0_108 = arith.constant 0 : index
    %c0_109 = arith.constant 0 : index
    %208 = vector.load %arg16[%c0_107, %c0_108, %c0_109] : memref<2x32x64xf32, #tpu.memory_space<vmem>>, vector<1x32x64xf32>
    %209 = vector.shape_cast %208 : vector<1x32x64xf32> to vector<32x64xf32>
    %210 = arith.truncf %207 : vector<16x32xf32> to vector<16x32xbf16>
    %211 = arith.truncf %209 : vector<32x64xf32> to vector<32x64xbf16>
    %cst_110 = arith.constant dense<0.000000e+00> : vector<16x64xf32>
    %212 = tpu.matmul %210, %211, %cst_110 {dimension_numbers = #tpu.dot_dimension_numbers<[1], [0], [0], [1], [0, 0, 1, 1], [], []>} : vector<16x32xbf16>, vector<32x64xbf16>, vector<16x64xf32> -> vector<16x64xf32>
    %c0_111 = arith.constant 0 : index
    %c0_112 = arith.constant 0 : index
    %c0_113 = arith.constant 0 : index
    %213 = vector.load %arg17[%c0_111, %c0_112, %c0_113] : memref<2x1x64xf32, #tpu.memory_space<vmem>>, vector<1x1x64xf32>
    %214 = vector.shape_cast %213 : vector<1x1x64xf32> to vector<1x64xf32>
    %215 = vector.broadcast %214 : vector<1x64xf32> to vector<16x64xf32>
    %216 = arith.addf %212, %215 : vector<16x64xf32>
    %cst_114 = arith.constant 5.000000e-01 : f32
    %217 = vector.broadcast %cst_114 : f32 to vector<16x64xf32>
    %218 = arith.mulf %217, %216 : vector<16x64xf32>
    %cst_115 = arith.constant 0.707106769 : f32
    %219 = vector.broadcast %cst_115 : f32 to vector<16x64xf32>
    %220 = arith.mulf %216, %219 : vector<16x64xf32>
    %221 = math.erf %220 : vector<16x64xf32>
    %cst_116 = arith.constant 1.000000e+00 : f32
    %222 = vector.broadcast %cst_116 : f32 to vector<16x64xf32>
    %223 = arith.addf %222, %221 : vector<16x64xf32>
    %224 = arith.mulf %218, %223 : vector<16x64xf32>
    %c0_117 = arith.constant 0 : index
    %c0_118 = arith.constant 0 : index
    %c0_119 = arith.constant 0 : index
    %225 = vector.load %arg18[%c0_117, %c0_118, %c0_119] : memref<2x64x32xf32, #tpu.memory_space<vmem>>, vector<1x64x32xf32>
    %226 = vector.shape_cast %225 : vector<1x64x32xf32> to vector<64x32xf32>
    %227 = arith.truncf %224 : vector<16x64xf32> to vector<16x64xbf16>
    %228 = arith.truncf %226 : vector<64x32xf32> to vector<64x32xbf16>
    %cst_120 = arith.constant dense<0.000000e+00> : vector<16x32xf32>
    %229 = tpu.matmul %227, %228, %cst_120 {dimension_numbers = #tpu.dot_dimension_numbers<[1], [0], [0], [1], [0, 0, 1, 1], [], []>} : vector<16x64xbf16>, vector<64x32xbf16>, vector<16x32xf32> -> vector<16x32xf32>
    %c0_121 = arith.constant 0 : index
    %c0_122 = arith.constant 0 : index
    %c0_123 = arith.constant 0 : index
    %230 = vector.load %arg19[%c0_121, %c0_122, %c0_123] : memref<2x1x32xf32, #tpu.memory_space<vmem>>, vector<1x1x32xf32>
    %231 = vector.shape_cast %230 : vector<1x1x32xf32> to vector<1x32xf32>
    %232 = vector.broadcast %231 : vector<1x32xf32> to vector<16x32xf32>
    %233 = arith.addf %229, %232 : vector<16x32xf32>
    %234 = arith.addf %233, %207 : vector<16x32xf32>
    %c0_124 = arith.constant 0 : index
    %c0_125 = arith.constant 0 : index
    %c0_126 = arith.constant 0 : index
    %235 = vector.load %arg20[%c0_124, %c0_125, %c0_126] : memref<2x1x32xf32, #tpu.memory_space<vmem>>, vector<1x1x32xf32>
    %236 = vector.shape_cast %235 : vector<1x1x32xf32> to vector<1x32xf32>
    %c0_127 = arith.constant 0 : index
    %c0_128 = arith.constant 0 : index
    %c0_129 = arith.constant 0 : index
    %237 = vector.load %arg21[%c0_127, %c0_128, %c0_129] : memref<2x1x32xf32, #tpu.memory_space<vmem>>, vector<1x1x32xf32>
    %238 = vector.shape_cast %237 : vector<1x1x32xf32> to vector<1x32xf32>
    %cst_130 = arith.constant dense<0.000000e+00> : vector<16xf32>
    %239 = vector.multi_reduction <add>, %234, %cst_130 [1] : vector<16x32xf32> to vector<16xf32>
    %240 = vector.shape_cast %239 : vector<16xf32> to vector<16x1xf32>
    %cst_131 = arith.constant 3.200000e+01 : f32
    %241 = vector.broadcast %cst_131 : f32 to vector<16x1xf32>
    %242 = arith.divf %240, %241 : vector<16x1xf32>
    %243 = vector.broadcast %242 : vector<16x1xf32> to vector<16x32xf32>
    %244 = arith.subf %234, %243 : vector<16x32xf32>
    %245 = arith.mulf %244, %244 : vector<16x32xf32>
    %cst_132 = arith.constant dense<0.000000e+00> : vector<16xf32>
    %246 = vector.multi_reduction <add>, %245, %cst_132 [1] : vector<16x32xf32> to vector<16xf32>
    %247 = vector.shape_cast %246 : vector<16xf32> to vector<16x1xf32>
    %cst_133 = arith.constant 3.200000e+01 : f32
    %248 = vector.broadcast %cst_133 : f32 to vector<16x1xf32>
    %249 = arith.divf %247, %248 : vector<16x1xf32>
    %250 = vector.broadcast %242 : vector<16x1xf32> to vector<16x32xf32>
    %251 = arith.subf %234, %250 : vector<16x32xf32>
    %cst_134 = arith.constant 9.99999996E-13 : f32
    %252 = vector.broadcast %cst_134 : f32 to vector<16x1xf32>
    %253 = arith.addf %249, %252 : vector<16x1xf32>
    %254 = math.rsqrt %253 : vector<16x1xf32>
    %255 = vector.broadcast %254 : vector<16x1xf32> to vector<16x32xf32>
    %256 = arith.mulf %251, %255 : vector<16x32xf32>
    %257 = vector.broadcast %236 : vector<1x32xf32> to vector<16x32xf32>
    %258 = arith.mulf %256, %257 : vector<16x32xf32>
    %259 = vector.broadcast %238 : vector<1x32xf32> to vector<16x32xf32>
    %260 = arith.addf %258, %259 : vector<16x32xf32>
    %c1_135 = arith.constant 1 : index
    %c0_136 = arith.constant 0 : index
    %c0_137 = arith.constant 0 : index
    %261 = vector.load %arg13[%c1_135, %c0_136, %c0_137] : memref<2x1x32xf32, #tpu.memory_space<vmem>>, vector<1x1x32xf32>
    %262 = vector.shape_cast %261 : vector<1x1x32xf32> to vector<1x32xf32>
    %c1_138 = arith.constant 1 : index
    %c0_139 = arith.constant 0 : index
    %c0_140 = arith.constant 0 : index
    %c0_141 = arith.constant 0 : index
    %263 = vector.load %arg6[%c1_138, %c0_139, %c0_140, %c0_141] : memref<2x2x32x16xf32, #tpu.memory_space<vmem>>, vector<1x1x32x16xf32>
    %264 = vector.shape_cast %263 : vector<1x1x32x16xf32> to vector<32x16xf32>
    %265 = arith.truncf %260 : vector<16x32xf32> to vector<16x32xbf16>
    %266 = arith.truncf %264 : vector<32x16xf32> to vector<32x16xbf16>
    %cst_142 = arith.constant dense<0.000000e+00> : vector<16x16xf32>
    %267 = tpu.matmul %265, %266, %cst_142 {dimension_numbers = #tpu.dot_dimension_numbers<[1], [0], [0], [1], [0, 0, 1, 1], [], []>} : vector<16x32xbf16>, vector<32x16xbf16>, vector<16x16xf32> -> vector<16x16xf32>
    %c1_143 = arith.constant 1 : index
    %c0_144 = arith.constant 0 : index
    %c0_145 = arith.constant 0 : index
    %c0_146 = arith.constant 0 : index
    %268 = vector.load %arg7[%c1_143, %c0_144, %c0_145, %c0_146] : memref<2x2x1x16xf32, #tpu.memory_space<vmem>>, vector<1x1x1x16xf32>
    %269 = vector.shape_cast %268 : vector<1x1x1x16xf32> to vector<1x16xf32>
    %270 = vector.broadcast %269 : vector<1x16xf32> to vector<16x16xf32>
    %271 = arith.addf %267, %270 : vector<16x16xf32>
    %c1_147 = arith.constant 1 : index
    %c0_148 = arith.constant 0 : index
    %c0_149 = arith.constant 0 : index
    %c0_150 = arith.constant 0 : index
    %272 = vector.load %arg8[%c1_147, %c0_148, %c0_149, %c0_150] : memref<2x2x32x16xf32, #tpu.memory_space<vmem>>, vector<1x1x32x16xf32>
    %273 = vector.shape_cast %272 : vector<1x1x32x16xf32> to vector<32x16xf32>
    %274 = arith.truncf %260 : vector<16x32xf32> to vector<16x32xbf16>
    %275 = arith.truncf %273 : vector<32x16xf32> to vector<32x16xbf16>
    %cst_151 = arith.constant dense<0.000000e+00> : vector<16x16xf32>
    %276 = tpu.matmul %274, %275, %cst_151 {dimension_numbers = #tpu.dot_dimension_numbers<[1], [0], [0], [1], [0, 0, 1, 1], [], []>} : vector<16x32xbf16>, vector<32x16xbf16>, vector<16x16xf32> -> vector<16x16xf32>
    %c1_152 = arith.constant 1 : index
    %c0_153 = arith.constant 0 : index
    %c0_154 = arith.constant 0 : index
    %c0_155 = arith.constant 0 : index
    %277 = vector.load %arg9[%c1_152, %c0_153, %c0_154, %c0_155] : memref<2x2x1x16xf32, #tpu.memory_space<vmem>>, vector<1x1x1x16xf32>
    %278 = vector.shape_cast %277 : vector<1x1x1x16xf32> to vector<1x16xf32>
    %279 = vector.broadcast %278 : vector<1x16xf32> to vector<16x16xf32>
    %280 = arith.addf %276, %279 : vector<16x16xf32>
    %c1_156 = arith.constant 1 : index
    %c0_157 = arith.constant 0 : index
    %c0_158 = arith.constant 0 : index
    %c0_159 = arith.constant 0 : index
    %281 = vector.load %arg10[%c1_156, %c0_157, %c0_158, %c0_159] : memref<2x2x32x16xf32, #tpu.memory_space<vmem>>, vector<1x1x32x16xf32>
    %282 = vector.shape_cast %281 : vector<1x1x32x16xf32> to vector<32x16xf32>
    %283 = arith.truncf %260 : vector<16x32xf32> to vector<16x32xbf16>
    %284 = arith.truncf %282 : vector<32x16xf32> to vector<32x16xbf16>
    %cst_160 = arith.constant dense<0.000000e+00> : vector<16x16xf32>
    %285 = tpu.matmul %283, %284, %cst_160 {dimension_numbers = #tpu.dot_dimension_numbers<[1], [0], [0], [1], [0, 0, 1, 1], [], []>} : vector<16x32xbf16>, vector<32x16xbf16>, vector<16x16xf32> -> vector<16x16xf32>
    %c1_161 = arith.constant 1 : index
    %c0_162 = arith.constant 0 : index
    %c0_163 = arith.constant 0 : index
    %c0_164 = arith.constant 0 : index
    %286 = vector.load %arg11[%c1_161, %c0_162, %c0_163, %c0_164] : memref<2x2x1x16xf32, #tpu.memory_space<vmem>>, vector<1x1x1x16xf32>
    %287 = vector.shape_cast %286 : vector<1x1x1x16xf32> to vector<1x16xf32>
    %288 = vector.broadcast %287 : vector<1x16xf32> to vector<16x16xf32>
    %289 = arith.addf %285, %288 : vector<16x16xf32>
    %290 = vector.extract_strided_slice %271 {offsets = [0, 0], sizes = [8, 16], strides = [1, 1]} : vector<16x16xf32> to vector<8x16xf32>
    %291 = arith.truncf %290 : vector<8x16xf32> to vector<8x16xbf16>
    %292 = vector.extract_strided_slice %280 {offsets = [0, 0], sizes = [8, 16], strides = [1, 1]} : vector<16x16xf32> to vector<8x16xf32>
    %293 = arith.truncf %292 : vector<8x16xf32> to vector<8x16xbf16>
    %294 = vector.extract_strided_slice %289 {offsets = [0, 0], sizes = [8, 16], strides = [1, 1]} : vector<16x16xf32> to vector<8x16xf32>
    %295 = arith.truncf %294 : vector<8x16xf32> to vector<8x16xbf16>
    %cst_165 = arith.constant dense<0.000000e+00> : vector<8x8xf32>
    %296 = tpu.matmul %291, %293, %cst_165 {dimension_numbers = #tpu.dot_dimension_numbers<[1], [1], [0], [0], [0, 0, 1, 0], [], []>} : vector<8x16xbf16>, vector<8x16xbf16>, vector<8x8xf32> -> vector<8x8xf32>
    %cst_166 = arith.constant dense<0xFF800000> : vector<8xf32>
    %297 = vector.multi_reduction <maximumf>, %296, %cst_166 [1] : vector<8x8xf32> to vector<8xf32>
    %298 = vector.shape_cast %297 : vector<8xf32> to vector<8x1xf32>
    %299 = vector.broadcast %298 : vector<8x1xf32> to vector<8x8xf32>
    %300 = arith.subf %296, %299 : vector<8x8xf32>
    %301 = math.exp %300 : vector<8x8xf32>
    %cst_167 = arith.constant dense<0.000000e+00> : vector<8xf32>
    %302 = vector.multi_reduction <add>, %301, %cst_167 [1] : vector<8x8xf32> to vector<8xf32>
    %303 = vector.shape_cast %302 : vector<8xf32> to vector<8x1xf32>
    %304 = tpu.reciprocal %303 {approx = true} : vector<8x1xf32> -> vector<8x1xf32>
    %305 = vector.broadcast %304 : vector<8x1xf32> to vector<8x8xf32>
    %306 = arith.mulf %301, %305 : vector<8x8xf32>
    %307 = arith.truncf %306 : vector<8x8xf32> to vector<8x8xbf16>
    %cst_168 = arith.constant dense<0.000000e+00> : vector<8x16xf32>
    %308 = tpu.matmul %307, %295, %cst_168 {dimension_numbers = #tpu.dot_dimension_numbers<[1], [0], [0], [1], [0, 0, 1, 1], [], []>} : vector<8x8xbf16>, vector<8x16xbf16>, vector<8x16xf32> -> vector<8x16xf32>
    %309 = vector.extract_strided_slice %271 {offsets = [8, 0], sizes = [8, 16], strides = [1, 1]} : vector<16x16xf32> to vector<8x16xf32>
    %310 = arith.truncf %309 : vector<8x16xf32> to vector<8x16xbf16>
    %311 = vector.extract_strided_slice %280 {offsets = [8, 0], sizes = [8, 16], strides = [1, 1]} : vector<16x16xf32> to vector<8x16xf32>
    %312 = arith.truncf %311 : vector<8x16xf32> to vector<8x16xbf16>
    %313 = vector.extract_strided_slice %289 {offsets = [8, 0], sizes = [8, 16], strides = [1, 1]} : vector<16x16xf32> to vector<8x16xf32>
    %314 = arith.truncf %313 : vector<8x16xf32> to vector<8x16xbf16>
    %cst_169 = arith.constant dense<0.000000e+00> : vector<8x8xf32>
    %315 = tpu.matmul %310, %312, %cst_169 {dimension_numbers = #tpu.dot_dimension_numbers<[1], [1], [0], [0], [0, 0, 1, 0], [], []>} : vector<8x16xbf16>, vector<8x16xbf16>, vector<8x8xf32> -> vector<8x8xf32>
    %cst_170 = arith.constant dense<0xFF800000> : vector<8xf32>
    %316 = vector.multi_reduction <maximumf>, %315, %cst_170 [1] : vector<8x8xf32> to vector<8xf32>
    %317 = vector.shape_cast %316 : vector<8xf32> to vector<8x1xf32>
    %318 = vector.broadcast %317 : vector<8x1xf32> to vector<8x8xf32>
    %319 = arith.subf %315, %318 : vector<8x8xf32>
    %320 = math.exp %319 : vector<8x8xf32>
    %cst_171 = arith.constant dense<0.000000e+00> : vector<8xf32>
    %321 = vector.multi_reduction <add>, %320, %cst_171 [1] : vector<8x8xf32> to vector<8xf32>
    %322 = vector.shape_cast %321 : vector<8xf32> to vector<8x1xf32>
    %323 = tpu.reciprocal %322 {approx = true} : vector<8x1xf32> -> vector<8x1xf32>
    %324 = vector.broadcast %323 : vector<8x1xf32> to vector<8x8xf32>
    %325 = arith.mulf %320, %324 : vector<8x8xf32>
    %326 = arith.truncf %325 : vector<8x8xf32> to vector<8x8xbf16>
    %cst_172 = arith.constant dense<0.000000e+00> : vector<8x16xf32>
    %327 = tpu.matmul %326, %314, %cst_172 {dimension_numbers = #tpu.dot_dimension_numbers<[1], [0], [0], [1], [0, 0, 1, 1], [], []>} : vector<8x8xbf16>, vector<8x16xbf16>, vector<8x16xf32> -> vector<8x16xf32>
    %328 = tpu.concatenate %308, %327 in 0 : vector<8x16xf32>, vector<8x16xf32> -> vector<16x16xf32>
    %c1_173 = arith.constant 1 : index
    %c0_174 = arith.constant 0 : index
    %c0_175 = arith.constant 0 : index
    %c0_176 = arith.constant 0 : index
    %329 = vector.load %arg12[%c1_173, %c0_174, %c0_175, %c0_176] : memref<2x2x16x32xf32, #tpu.memory_space<vmem>>, vector<1x1x16x32xf32>
    %330 = vector.shape_cast %329 : vector<1x1x16x32xf32> to vector<16x32xf32>
    %331 = arith.truncf %328 : vector<16x16xf32> to vector<16x16xbf16>
    %332 = arith.truncf %330 : vector<16x32xf32> to vector<16x32xbf16>
    %cst_177 = arith.constant dense<0.000000e+00> : vector<16x32xf32>
    %333 = tpu.matmul %331, %332, %cst_177 {dimension_numbers = #tpu.dot_dimension_numbers<[1], [0], [0], [1], [0, 0, 1, 1], [], []>} : vector<16x16xbf16>, vector<16x32xbf16>, vector<16x32xf32> -> vector<16x32xf32>
    %334 = vector.broadcast %262 : vector<1x32xf32> to vector<16x32xf32>
    %335 = arith.addf %334, %333 : vector<16x32xf32>
    %c1_178 = arith.constant 1 : index
    %c1_179 = arith.constant 1 : index
    %c0_180 = arith.constant 0 : index
    %c0_181 = arith.constant 0 : index
    %336 = vector.load %arg6[%c1_178, %c1_179, %c0_180, %c0_181] : memref<2x2x32x16xf32, #tpu.memory_space<vmem>>, vector<1x1x32x16xf32>
    %337 = vector.shape_cast %336 : vector<1x1x32x16xf32> to vector<32x16xf32>
    %338 = arith.truncf %260 : vector<16x32xf32> to vector<16x32xbf16>
    %339 = arith.truncf %337 : vector<32x16xf32> to vector<32x16xbf16>
    %cst_182 = arith.constant dense<0.000000e+00> : vector<16x16xf32>
    %340 = tpu.matmul %338, %339, %cst_182 {dimension_numbers = #tpu.dot_dimension_numbers<[1], [0], [0], [1], [0, 0, 1, 1], [], []>} : vector<16x32xbf16>, vector<32x16xbf16>, vector<16x16xf32> -> vector<16x16xf32>
    %c1_183 = arith.constant 1 : index
    %c1_184 = arith.constant 1 : index
    %c0_185 = arith.constant 0 : index
    %c0_186 = arith.constant 0 : index
    %341 = vector.load %arg7[%c1_183, %c1_184, %c0_185, %c0_186] : memref<2x2x1x16xf32, #tpu.memory_space<vmem>>, vector<1x1x1x16xf32>
    %342 = vector.shape_cast %341 : vector<1x1x1x16xf32> to vector<1x16xf32>
    %343 = vector.broadcast %342 : vector<1x16xf32> to vector<16x16xf32>
    %344 = arith.addf %340, %343 : vector<16x16xf32>
    %c1_187 = arith.constant 1 : index
    %c1_188 = arith.constant 1 : index
    %c0_189 = arith.constant 0 : index
    %c0_190 = arith.constant 0 : index
    %345 = vector.load %arg8[%c1_187, %c1_188, %c0_189, %c0_190] : memref<2x2x32x16xf32, #tpu.memory_space<vmem>>, vector<1x1x32x16xf32>
    %346 = vector.shape_cast %345 : vector<1x1x32x16xf32> to vector<32x16xf32>
    %347 = arith.truncf %260 : vector<16x32xf32> to vector<16x32xbf16>
    %348 = arith.truncf %346 : vector<32x16xf32> to vector<32x16xbf16>
    %cst_191 = arith.constant dense<0.000000e+00> : vector<16x16xf32>
    %349 = tpu.matmul %347, %348, %cst_191 {dimension_numbers = #tpu.dot_dimension_numbers<[1], [0], [0], [1], [0, 0, 1, 1], [], []>} : vector<16x32xbf16>, vector<32x16xbf16>, vector<16x16xf32> -> vector<16x16xf32>
    %c1_192 = arith.constant 1 : index
    %c1_193 = arith.constant 1 : index
    %c0_194 = arith.constant 0 : index
    %c0_195 = arith.constant 0 : index
    %350 = vector.load %arg9[%c1_192, %c1_193, %c0_194, %c0_195] : memref<2x2x1x16xf32, #tpu.memory_space<vmem>>, vector<1x1x1x16xf32>
    %351 = vector.shape_cast %350 : vector<1x1x1x16xf32> to vector<1x16xf32>
    %352 = vector.broadcast %351 : vector<1x16xf32> to vector<16x16xf32>
    %353 = arith.addf %349, %352 : vector<16x16xf32>
    %c1_196 = arith.constant 1 : index
    %c1_197 = arith.constant 1 : index
    %c0_198 = arith.constant 0 : index
    %c0_199 = arith.constant 0 : index
    %354 = vector.load %arg10[%c1_196, %c1_197, %c0_198, %c0_199] : memref<2x2x32x16xf32, #tpu.memory_space<vmem>>, vector<1x1x32x16xf32>
    %355 = vector.shape_cast %354 : vector<1x1x32x16xf32> to vector<32x16xf32>
    %356 = arith.truncf %260 : vector<16x32xf32> to vector<16x32xbf16>
    %357 = arith.truncf %355 : vector<32x16xf32> to vector<32x16xbf16>
    %cst_200 = arith.constant dense<0.000000e+00> : vector<16x16xf32>
    %358 = tpu.matmul %356, %357, %cst_200 {dimension_numbers = #tpu.dot_dimension_numbers<[1], [0], [0], [1], [0, 0, 1, 1], [], []>} : vector<16x32xbf16>, vector<32x16xbf16>, vector<16x16xf32> -> vector<16x16xf32>
    %c1_201 = arith.constant 1 : index
    %c1_202 = arith.constant 1 : index
    %c0_203 = arith.constant 0 : index
    %c0_204 = arith.constant 0 : index
    %359 = vector.load %arg11[%c1_201, %c1_202, %c0_203, %c0_204] : memref<2x2x1x16xf32, #tpu.memory_space<vmem>>, vector<1x1x1x16xf32>
    %360 = vector.shape_cast %359 : vector<1x1x1x16xf32> to vector<1x16xf32>
    %361 = vector.broadcast %360 : vector<1x16xf32> to vector<16x16xf32>
    %362 = arith.addf %358, %361 : vector<16x16xf32>
    %363 = vector.extract_strided_slice %344 {offsets = [0, 0], sizes = [8, 16], strides = [1, 1]} : vector<16x16xf32> to vector<8x16xf32>
    %364 = arith.truncf %363 : vector<8x16xf32> to vector<8x16xbf16>
    %365 = vector.extract_strided_slice %353 {offsets = [0, 0], sizes = [8, 16], strides = [1, 1]} : vector<16x16xf32> to vector<8x16xf32>
    %366 = arith.truncf %365 : vector<8x16xf32> to vector<8x16xbf16>
    %367 = vector.extract_strided_slice %362 {offsets = [0, 0], sizes = [8, 16], strides = [1, 1]} : vector<16x16xf32> to vector<8x16xf32>
    %368 = arith.truncf %367 : vector<8x16xf32> to vector<8x16xbf16>
    %cst_205 = arith.constant dense<0.000000e+00> : vector<8x8xf32>
    %369 = tpu.matmul %364, %366, %cst_205 {dimension_numbers = #tpu.dot_dimension_numbers<[1], [1], [0], [0], [0, 0, 1, 0], [], []>} : vector<8x16xbf16>, vector<8x16xbf16>, vector<8x8xf32> -> vector<8x8xf32>
    %cst_206 = arith.constant dense<0xFF800000> : vector<8xf32>
    %370 = vector.multi_reduction <maximumf>, %369, %cst_206 [1] : vector<8x8xf32> to vector<8xf32>
    %371 = vector.shape_cast %370 : vector<8xf32> to vector<8x1xf32>
    %372 = vector.broadcast %371 : vector<8x1xf32> to vector<8x8xf32>
    %373 = arith.subf %369, %372 : vector<8x8xf32>
    %374 = math.exp %373 : vector<8x8xf32>
    %cst_207 = arith.constant dense<0.000000e+00> : vector<8xf32>
    %375 = vector.multi_reduction <add>, %374, %cst_207 [1] : vector<8x8xf32> to vector<8xf32>
    %376 = vector.shape_cast %375 : vector<8xf32> to vector<8x1xf32>
    %377 = tpu.reciprocal %376 {approx = true} : vector<8x1xf32> -> vector<8x1xf32>
    %378 = vector.broadcast %377 : vector<8x1xf32> to vector<8x8xf32>
    %379 = arith.mulf %374, %378 : vector<8x8xf32>
    %380 = arith.truncf %379 : vector<8x8xf32> to vector<8x8xbf16>
    %cst_208 = arith.constant dense<0.000000e+00> : vector<8x16xf32>
    %381 = tpu.matmul %380, %368, %cst_208 {dimension_numbers = #tpu.dot_dimension_numbers<[1], [0], [0], [1], [0, 0, 1, 1], [], []>} : vector<8x8xbf16>, vector<8x16xbf16>, vector<8x16xf32> -> vector<8x16xf32>
    %382 = vector.extract_strided_slice %344 {offsets = [8, 0], sizes = [8, 16], strides = [1, 1]} : vector<16x16xf32> to vector<8x16xf32>
    %383 = arith.truncf %382 : vector<8x16xf32> to vector<8x16xbf16>
    %384 = vector.extract_strided_slice %353 {offsets = [8, 0], sizes = [8, 16], strides = [1, 1]} : vector<16x16xf32> to vector<8x16xf32>
    %385 = arith.truncf %384 : vector<8x16xf32> to vector<8x16xbf16>
    %386 = vector.extract_strided_slice %362 {offsets = [8, 0], sizes = [8, 16], strides = [1, 1]} : vector<16x16xf32> to vector<8x16xf32>
    %387 = arith.truncf %386 : vector<8x16xf32> to vector<8x16xbf16>
    %cst_209 = arith.constant dense<0.000000e+00> : vector<8x8xf32>
    %388 = tpu.matmul %383, %385, %cst_209 {dimension_numbers = #tpu.dot_dimension_numbers<[1], [1], [0], [0], [0, 0, 1, 0], [], []>} : vector<8x16xbf16>, vector<8x16xbf16>, vector<8x8xf32> -> vector<8x8xf32>
    %cst_210 = arith.constant dense<0xFF800000> : vector<8xf32>
    %389 = vector.multi_reduction <maximumf>, %388, %cst_210 [1] : vector<8x8xf32> to vector<8xf32>
    %390 = vector.shape_cast %389 : vector<8xf32> to vector<8x1xf32>
    %391 = vector.broadcast %390 : vector<8x1xf32> to vector<8x8xf32>
    %392 = arith.subf %388, %391 : vector<8x8xf32>
    %393 = math.exp %392 : vector<8x8xf32>
    %cst_211 = arith.constant dense<0.000000e+00> : vector<8xf32>
    %394 = vector.multi_reduction <add>, %393, %cst_211 [1] : vector<8x8xf32> to vector<8xf32>
    %395 = vector.shape_cast %394 : vector<8xf32> to vector<8x1xf32>
    %396 = tpu.reciprocal %395 {approx = true} : vector<8x1xf32> -> vector<8x1xf32>
    %397 = vector.broadcast %396 : vector<8x1xf32> to vector<8x8xf32>
    %398 = arith.mulf %393, %397 : vector<8x8xf32>
    %399 = arith.truncf %398 : vector<8x8xf32> to vector<8x8xbf16>
    %cst_212 = arith.constant dense<0.000000e+00> : vector<8x16xf32>
    %400 = tpu.matmul %399, %387, %cst_212 {dimension_numbers = #tpu.dot_dimension_numbers<[1], [0], [0], [1], [0, 0, 1, 1], [], []>} : vector<8x8xbf16>, vector<8x16xbf16>, vector<8x16xf32> -> vector<8x16xf32>
    %401 = tpu.concatenate %381, %400 in 0 : vector<8x16xf32>, vector<8x16xf32> -> vector<16x16xf32>
    %c1_213 = arith.constant 1 : index
    %c1_214 = arith.constant 1 : index
    %c0_215 = arith.constant 0 : index
    %c0_216 = arith.constant 0 : index
    %402 = vector.load %arg12[%c1_213, %c1_214, %c0_215, %c0_216] : memref<2x2x16x32xf32, #tpu.memory_space<vmem>>, vector<1x1x16x32xf32>
    %403 = vector.shape_cast %402 : vector<1x1x16x32xf32> to vector<16x32xf32>
    %404 = arith.truncf %401 : vector<16x16xf32> to vector<16x16xbf16>
    %405 = arith.truncf %403 : vector<16x32xf32> to vector<16x32xbf16>
    %cst_217 = arith.constant dense<0.000000e+00> : vector<16x32xf32>
    %406 = tpu.matmul %404, %405, %cst_217 {dimension_numbers = #tpu.dot_dimension_numbers<[1], [0], [0], [1], [0, 0, 1, 1], [], []>} : vector<16x16xbf16>, vector<16x32xbf16>, vector<16x32xf32> -> vector<16x32xf32>
    %407 = arith.addf %335, %406 : vector<16x32xf32>
    %408 = arith.addf %407, %260 : vector<16x32xf32>
    %c1_218 = arith.constant 1 : index
    %c0_219 = arith.constant 0 : index
    %c0_220 = arith.constant 0 : index
    %409 = vector.load %arg14[%c1_218, %c0_219, %c0_220] : memref<2x1x32xf32, #tpu.memory_space<vmem>>, vector<1x1x32xf32>
    %410 = vector.shape_cast %409 : vector<1x1x32xf32> to vector<1x32xf32>
    %c1_221 = arith.constant 1 : index
    %c0_222 = arith.constant 0 : index
    %c0_223 = arith.constant 0 : index
    %411 = vector.load %arg15[%c1_221, %c0_222, %c0_223] : memref<2x1x32xf32, #tpu.memory_space<vmem>>, vector<1x1x32xf32>
    %412 = vector.shape_cast %411 : vector<1x1x32xf32> to vector<1x32xf32>
    %cst_224 = arith.constant dense<0.000000e+00> : vector<16xf32>
    %413 = vector.multi_reduction <add>, %408, %cst_224 [1] : vector<16x32xf32> to vector<16xf32>
    %414 = vector.shape_cast %413 : vector<16xf32> to vector<16x1xf32>
    %cst_225 = arith.constant 3.200000e+01 : f32
    %415 = vector.broadcast %cst_225 : f32 to vector<16x1xf32>
    %416 = arith.divf %414, %415 : vector<16x1xf32>
    %417 = vector.broadcast %416 : vector<16x1xf32> to vector<16x32xf32>
    %418 = arith.subf %408, %417 : vector<16x32xf32>
    %419 = arith.mulf %418, %418 : vector<16x32xf32>
    %cst_226 = arith.constant dense<0.000000e+00> : vector<16xf32>
    %420 = vector.multi_reduction <add>, %419, %cst_226 [1] : vector<16x32xf32> to vector<16xf32>
    %421 = vector.shape_cast %420 : vector<16xf32> to vector<16x1xf32>
    %cst_227 = arith.constant 3.200000e+01 : f32
    %422 = vector.broadcast %cst_227 : f32 to vector<16x1xf32>
    %423 = arith.divf %421, %422 : vector<16x1xf32>
    %424 = vector.broadcast %416 : vector<16x1xf32> to vector<16x32xf32>
    %425 = arith.subf %408, %424 : vector<16x32xf32>
    %cst_228 = arith.constant 9.99999996E-13 : f32
    %426 = vector.broadcast %cst_228 : f32 to vector<16x1xf32>
    %427 = arith.addf %423, %426 : vector<16x1xf32>
    %428 = math.rsqrt %427 : vector<16x1xf32>
    %429 = vector.broadcast %428 : vector<16x1xf32> to vector<16x32xf32>
    %430 = arith.mulf %425, %429 : vector<16x32xf32>
    %431 = vector.broadcast %410 : vector<1x32xf32> to vector<16x32xf32>
    %432 = arith.mulf %430, %431 : vector<16x32xf32>
    %433 = vector.broadcast %412 : vector<1x32xf32> to vector<16x32xf32>
    %434 = arith.addf %432, %433 : vector<16x32xf32>
    %c1_229 = arith.constant 1 : index
    %c0_230 = arith.constant 0 : index
    %c0_231 = arith.constant 0 : index
    %435 = vector.load %arg16[%c1_229, %c0_230, %c0_231] : memref<2x32x64xf32, #tpu.memory_space<vmem>>, vector<1x32x64xf32>
    %436 = vector.shape_cast %435 : vector<1x32x64xf32> to vector<32x64xf32>
    %437 = arith.truncf %434 : vector<16x32xf32> to vector<16x32xbf16>
    %438 = arith.truncf %436 : vector<32x64xf32> to vector<32x64xbf16>
    %cst_232 = arith.constant dense<0.000000e+00> : vector<16x64xf32>
    %439 = tpu.matmul %437, %438, %cst_232 {dimension_numbers = #tpu.dot_dimension_numbers<[1], [0], [0], [1], [0, 0, 1, 1], [], []>} : vector<16x32xbf16>, vector<32x64xbf16>, vector<16x64xf32> -> vector<16x64xf32>
    %c1_233 = arith.constant 1 : index
    %c0_234 = arith.constant 0 : index
    %c0_235 = arith.constant 0 : index
    %440 = vector.load %arg17[%c1_233, %c0_234, %c0_235] : memref<2x1x64xf32, #tpu.memory_space<vmem>>, vector<1x1x64xf32>
    %441 = vector.shape_cast %440 : vector<1x1x64xf32> to vector<1x64xf32>
    %442 = vector.broadcast %441 : vector<1x64xf32> to vector<16x64xf32>
    %443 = arith.addf %439, %442 : vector<16x64xf32>
    %cst_236 = arith.constant 5.000000e-01 : f32
    %444 = vector.broadcast %cst_236 : f32 to vector<16x64xf32>
    %445 = arith.mulf %444, %443 : vector<16x64xf32>
    %cst_237 = arith.constant 0.707106769 : f32
    %446 = vector.broadcast %cst_237 : f32 to vector<16x64xf32>
    %447 = arith.mulf %443, %446 : vector<16x64xf32>
    %448 = math.erf %447 : vector<16x64xf32>
    %cst_238 = arith.constant 1.000000e+00 : f32
    %449 = vector.broadcast %cst_238 : f32 to vector<16x64xf32>
    %450 = arith.addf %449, %448 : vector<16x64xf32>
    %451 = arith.mulf %445, %450 : vector<16x64xf32>
    %c1_239 = arith.constant 1 : index
    %c0_240 = arith.constant 0 : index
    %c0_241 = arith.constant 0 : index
    %452 = vector.load %arg18[%c1_239, %c0_240, %c0_241] : memref<2x64x32xf32, #tpu.memory_space<vmem>>, vector<1x64x32xf32>
    %453 = vector.shape_cast %452 : vector<1x64x32xf32> to vector<64x32xf32>
    %454 = arith.truncf %451 : vector<16x64xf32> to vector<16x64xbf16>
    %455 = arith.truncf %453 : vector<64x32xf32> to vector<64x32xbf16>
    %cst_242 = arith.constant dense<0.000000e+00> : vector<16x32xf32>
    %456 = tpu.matmul %454, %455, %cst_242 {dimension_numbers = #tpu.dot_dimension_numbers<[1], [0], [0], [1], [0, 0, 1, 1], [], []>} : vector<16x64xbf16>, vector<64x32xbf16>, vector<16x32xf32> -> vector<16x32xf32>
    %c1_243 = arith.constant 1 : index
    %c0_244 = arith.constant 0 : index
    %c0_245 = arith.constant 0 : index
    %457 = vector.load %arg19[%c1_243, %c0_244, %c0_245] : memref<2x1x32xf32, #tpu.memory_space<vmem>>, vector<1x1x32xf32>
    %458 = vector.shape_cast %457 : vector<1x1x32xf32> to vector<1x32xf32>
    %459 = vector.broadcast %458 : vector<1x32xf32> to vector<16x32xf32>
    %460 = arith.addf %456, %459 : vector<16x32xf32>
    %461 = arith.addf %460, %434 : vector<16x32xf32>
    %c1_246 = arith.constant 1 : index
    %c0_247 = arith.constant 0 : index
    %c0_248 = arith.constant 0 : index
    %462 = vector.load %arg20[%c1_246, %c0_247, %c0_248] : memref<2x1x32xf32, #tpu.memory_space<vmem>>, vector<1x1x32xf32>
    %463 = vector.shape_cast %462 : vector<1x1x32xf32> to vector<1x32xf32>
    %c1_249 = arith.constant 1 : index
    %c0_250 = arith.constant 0 : index
    %c0_251 = arith.constant 0 : index
    %464 = vector.load %arg21[%c1_249, %c0_250, %c0_251] : memref<2x1x32xf32, #tpu.memory_space<vmem>>, vector<1x1x32xf32>
    %465 = vector.shape_cast %464 : vector<1x1x32xf32> to vector<1x32xf32>
    %cst_252 = arith.constant dense<0.000000e+00> : vector<16xf32>
    %466 = vector.multi_reduction <add>, %461, %cst_252 [1] : vector<16x32xf32> to vector<16xf32>
    %467 = vector.shape_cast %466 : vector<16xf32> to vector<16x1xf32>
    %cst_253 = arith.constant 3.200000e+01 : f32
    %468 = vector.broadcast %cst_253 : f32 to vector<16x1xf32>
    %469 = arith.divf %467, %468 : vector<16x1xf32>
    %470 = vector.broadcast %469 : vector<16x1xf32> to vector<16x32xf32>
    %471 = arith.subf %461, %470 : vector<16x32xf32>
    %472 = arith.mulf %471, %471 : vector<16x32xf32>
    %cst_254 = arith.constant dense<0.000000e+00> : vector<16xf32>
    %473 = vector.multi_reduction <add>, %472, %cst_254 [1] : vector<16x32xf32> to vector<16xf32>
    %474 = vector.shape_cast %473 : vector<16xf32> to vector<16x1xf32>
    %cst_255 = arith.constant 3.200000e+01 : f32
    %475 = vector.broadcast %cst_255 : f32 to vector<16x1xf32>
    %476 = arith.divf %474, %475 : vector<16x1xf32>
    %477 = vector.broadcast %469 : vector<16x1xf32> to vector<16x32xf32>
    %478 = arith.subf %461, %477 : vector<16x32xf32>
    %cst_256 = arith.constant 9.99999996E-13 : f32
    %479 = vector.broadcast %cst_256 : f32 to vector<16x1xf32>
    %480 = arith.addf %476, %479 : vector<16x1xf32>
    %481 = math.rsqrt %480 : vector<16x1xf32>
    %482 = vector.broadcast %481 : vector<16x1xf32> to vector<16x32xf32>
    %483 = arith.mulf %478, %482 : vector<16x32xf32>
    %484 = vector.broadcast %463 : vector<1x32xf32> to vector<16x32xf32>
    %485 = arith.mulf %483, %484 : vector<16x32xf32>
    %486 = vector.broadcast %465 : vector<1x32xf32> to vector<16x32xf32>
    %487 = arith.addf %485, %486 : vector<16x32xf32>
    %c0_257 = arith.constant 0 : index
    %c0_258 = arith.constant 0 : index
    %488 = vector.load %arg22[%c0_257, %c0_258] : memref<32x128xf32, #tpu.memory_space<vmem>>, vector<32x128xf32>
    %489 = arith.truncf %487 : vector<16x32xf32> to vector<16x32xbf16>
    %490 = arith.truncf %488 : vector<32x128xf32> to vector<32x128xbf16>
    %cst_259 = arith.constant dense<0.000000e+00> : vector<16x128xf32>
    %491 = tpu.matmul %489, %490, %cst_259 {dimension_numbers = #tpu.dot_dimension_numbers<[1], [0], [0], [1], [0, 0, 1, 1], [], []>} : vector<16x32xbf16>, vector<32x128xbf16>, vector<16x128xf32> -> vector<16x128xf32>
    %c0_260 = arith.constant 0 : index
    %c0_261 = arith.constant 0 : index
    %492 = vector.load %arg23[%c0_260, %c0_261] : memref<1x128xf32, #tpu.memory_space<vmem>>, vector<1x128xf32>
    %493 = vector.broadcast %492 : vector<1x128xf32> to vector<16x128xf32>
    %494 = arith.addf %491, %493 : vector<16x128xf32>
    %c0_262 = arith.constant 0 : index
    %c0_263 = arith.constant 0 : index
    %495 = vector.load %arg24[%c0_262, %c0_263] : memref<16x128xf32, #tpu.memory_space<vmem>>, vector<16x128xf32>
    tpu.vector_store %arg24[%c0_262, %c0_263], %494 {strides = array<i32>} : memref<16x128xf32, #tpu.memory_space<vmem>>, vector<16x128xf32>,
    return
  }
  func.func @transform_0(%arg0: i32) -> (i32, i32) {
    %c0_i32 = arith.constant 0 : i32
    %c0_i32_0 = arith.constant 0 : i32
    return %arg0, %c0_i32 : i32, i32
  }
  func.func @transform_1(%arg0: i32) -> (i32, i32) {
    %c0_i32 = arith.constant 0 : i32
    %c0_i32_0 = arith.constant 0 : i32
    %c0_i32_1 = arith.constant 0 : i32
    return %c0_i32, %c0_i32_0 : i32, i32
  }
  func.func @transform_2(%arg0: i32) -> (i32, i32) {
    %c0_i32 = arith.constant 0 : i32
    %c0_i32_0 = arith.constant 0 : i32
    %c0_i32_1 = arith.constant 0 : i32
    return %c0_i32, %c0_i32_0 : i32, i32
  }
  func.func @transform_3(%arg0: i32) -> (i32, i32) {
    %c0_i32 = arith.constant 0 : i32
    %c0_i32_0 = arith.constant 0 : i32
    %c0_i32_1 = arith.constant 0 : i32
    return %c0_i32, %c0_i32_0 : i32, i32
  }
  func.func @transform_4(%arg0: i32) -> (i32, i32) {
    %c0_i32 = arith.constant 0 : i32
    %c0_i32_0 = arith.constant 0 : i32
    %c0_i32_1 = arith.constant 0 : i32
    return %c0_i32, %c0_i32_0 : i32, i32
  }
  func.func @transform_5(%arg0: i32) -> (i32, i32, i32, i32) {
    %c0_i32 = arith.constant 0 : i32
    %c0_i32_0 = arith.constant 0 : i32
    %c0_i32_1 = arith.constant 0 : i32
    %c0_i32_2 = arith.constant 0 : i32
    %c0_i32_3 = arith.constant 0 : i32
    return %c0_i32, %c0_i32_0, %c0_i32_1, %c0_i32_2 : i32, i32, i32, i32
  }
  func.func @transform_6(%arg0: i32) -> (i32, i32, i32, i32) {
    %c0_i32 = arith.constant 0 : i32
    %c0_i32_0 = arith.constant 0 : i32
    %c0_i32_1 = arith.constant 0 : i32
    %c0_i32_2 = arith.constant 0 : i32
    %c0_i32_3 = arith.constant 0 : i32
    return %c0_i32, %c0_i32_0, %c0_i32_1, %c0_i32_2 : i32, i32, i32, i32
  }
  func.func @transform_7(%arg0: i32) -> (i32, i32, i32, i32) {
    %c0_i32 = arith.constant 0 : i32
    %c0_i32_0 = arith.constant 0 : i32
    %c0_i32_1 = arith.constant 0 : i32
    %c0_i32_2 = arith.constant 0 : i32
    %c0_i32_3 = arith.constant 0 : i32
    return %c0_i32, %c0_i32_0, %c0_i32_1, %c0_i32_2 : i32, i32, i32, i32
  }
  func.func @transform_8(%arg0: i32) -> (i32, i32, i32, i32) {
    %c0_i32 = arith.constant 0 : i32
    %c0_i32_0 = arith.constant 0 : i32
    %c0_i32_1 = arith.constant 0 : i32
    %c0_i32_2 = arith.constant 0 : i32
    %c0_i32_3 = arith.constant 0 : i32
    return %c0_i32, %c0_i32_0, %c0_i32_1, %c0_i32_2 : i32, i32, i32, i32
  }
  func.func @transform_9(%arg0: i32) -> (i32, i32, i32, i32) {
    %c0_i32 = arith.constant 0 : i32
    %c0_i32_0 = arith.constant 0 : i32
    %c0_i32_1 = arith.constant 0 : i32
    %c0_i32_2 = arith.constant 0 : i32
    %c0_i32_3 = arith.constant 0 : i32
    return %c0_i32, %c0_i32_0, %c0_i32_1, %c0_i32_2 : i32, i32, i32, i32
  }
  func.func @transform_10(%arg0: i32) -> (i32, i32, i32, i32) {
    %c0_i32 = arith.constant 0 : i32
    %c0_i32_0 = arith.constant 0 : i32
    %c0_i32_1 = arith.constant 0 : i32
    %c0_i32_2 = arith.constant 0 : i32
    %c0_i32_3 = arith.constant 0 : i32
    return %c0_i32, %c0_i32_0, %c0_i32_1, %c0_i32_2 : i32, i32, i32, i32
  }
  func.func @transform_11(%arg0: i32) -> (i32, i32, i32, i32) {
    %c0_i32 = arith.constant 0 : i32
    %c0_i32_0 = arith.constant 0 : i32
    %c0_i32_1 = arith.constant 0 : i32
    %c0_i32_2 = arith.constant 0 : i32
    %c0_i32_3 = arith.constant 0 : i32
    return %c0_i32, %c0_i32_0, %c0_i32_1, %c0_i32_2 : i32, i32, i32, i32
  }
  func.func @transform_12(%arg0: i32) -> (i32, i32, i32) {
    %c0_i32 = arith.constant 0 : i32
    %c0_i32_0 = arith.constant 0 : i32
    %c0_i32_1 = arith.constant 0 : i32
    %c0_i32_2 = arith.constant 0 : i32
    return %c0_i32, %c0_i32_0, %c0_i32_1 : i32, i32, i32
  }
  func.func @transform_13(%arg0: i32) -> (i32, i32, i32) {
    %c0_i32 = arith.constant 0 : i32
    %c0_i32_0 = arith.constant 0 : i32
    %c0_i32_1 = arith.constant 0 : i32
    %c0_i32_2 = arith.constant 0 : i32
    return %c0_i32, %c0_i32_0, %c0_i32_1 : i32, i32, i32
  }
  func.func @transform_14(%arg0: i32) -> (i32, i32, i32) {
    %c0_i32 = arith.constant 0 : i32
    %c0_i32_0 = arith.constant 0 : i32
    %c0_i32_1 = arith.constant 0 : i32
    %c0_i32_2 = arith.constant 0 : i32
    return %c0_i32, %c0_i32_0, %c0_i32_1 : i32, i32, i32
  }
  func.func @transform_15(%arg0: i32) -> (i32, i32, i32) {
    %c0_i32 = arith.constant 0 : i32
    %c0_i32_0 = arith.constant 0 : i32
    %c0_i32_1 = arith.constant 0 : i32
    %c0_i32_2 = arith.constant 0 : i32
    return %c0_i32, %c0_i32_0, %c0_i32_1 : i32, i32, i32
  }
  func.func @transform_16(%arg0: i32) -> (i32, i32, i32) {
    %c0_i32 = arith.constant 0 : i32
    %c0_i32_0 = arith.constant 0 : i32
    %c0_i32_1 = arith.constant 0 : i32
    %c0_i32_2 = arith.constant 0 : i32
    return %c0_i32, %c0_i32_0, %c0_i32_1 : i32, i32, i32
  }
  func.func @transform_17(%arg0: i32) -> (i32, i32, i32) {
    %c0_i32 = arith.constant 0 : i32
    %c0_i32_0 = arith.constant 0 : i32
    %c0_i32_1 = arith.constant 0 : i32
    %c0_i32_2 = arith.constant 0 : i32
    return %c0_i32, %c0_i32_0, %c0_i32_1 : i32, i32, i32
  }
  func.func @transform_18(%arg0: i32) -> (i32, i32, i32) {
    %c0_i32 = arith.constant 0 : i32
    %c0_i32_0 = arith.constant 0 : i32
    %c0_i32_1 = arith.constant 0 : i32
    %c0_i32_2 = arith.constant 0 : i32
    return %c0_i32, %c0_i32_0, %c0_i32_1 : i32, i32, i32
  }
  func.func @transform_19(%arg0: i32) -> (i32, i32, i32) {
    %c0_i32 = arith.constant 0 : i32
    %c0_i32_0 = arith.constant 0 : i32
    %c0_i32_1 = arith.constant 0 : i32
    %c0_i32_2 = arith.constant 0 : i32
    return %c0_i32, %c0_i32_0, %c0_i32_1 : i32, i32, i32
  }
  func.func @transform_20(%arg0: i32) -> (i32, i32, i32) {
    %c0_i32 = arith.constant 0 : i32
    %c0_i32_0 = arith.constant 0 : i32
    %c0_i32_1 = arith.constant 0 : i32
    %c0_i32_2 = arith.constant 0 : i32
    return %c0_i32, %c0_i32_0, %c0_i32_1 : i32, i32, i32
  }
  func.func @transform_21(%arg0: i32) -> (i32, i32) {
    %c0_i32 = arith.constant 0 : i32
    %c0_i32_0 = arith.constant 0 : i32
    %c0_i32_1 = arith.constant 0 : i32
    return %c0_i32, %c0_i32_0 : i32, i32
  }
  func.func @transform_22(%arg0: i32) -> (i32, i32) {
    %c0_i32 = arith.constant 0 : i32
    %c0_i32_0 = arith.constant 0 : i32
    %c0_i32_1 = arith.constant 0 : i32
    return %c0_i32, %c0_i32_0 : i32, i32
  }
  func.func @transform_23(%arg0: i32) -> (i32, i32) {
    %c0_i32 = arith.constant 0 : i32
    %c0_i32_0 = arith.constant 0 : i32
    return %arg0, %c0_i32 : i32, i32
  }
}

</mosaic_0001>

<bundles_post_ra>
// kernel: tpu_custom_call.1
= control target key start
LH: loop header
LB: loop body
LE: loop exit
PB: predicated region body
PF: predicated region fallthrough
CT: control target
= control target key end

     0   :  { %s3963_s0 = inlined_call_operand.vmem [shape: s32[16,1], index: 0, kind: input, shape index: {}]   ;;  %s3964_s1 = inlined_call_operand.vmem [shape: f32[128,32], index: 1, kind: input, shape index: {}]   ;;  %s3965_s2 = inlined_call_operand.vmem [shape: f32[16,32], index: 2, kind: input, shape index: {}]   ;;  %s3966_s3 = inlined_call_operand.vmem [shape: f32[1,32], index: 3, kind: input, shape index: {}]   ;;  %s3967_s4 = inlined_call_operand.vmem [shape: f32[1,32], index: 4, kind: input, shape index: {}]   ;;  %s3968_s5 = inlined_call_operand.vmem [shape: f32[2,2,32,16], index: 5, kind: input, shape index: {}]   ;;  %s3969_s6 = inlined_call_operand.vmem [shape: f32[2,2,1,16], index: 6, kind: input, shape index: {}]   ;;  %s3970_s7 = inlined_call_operand.vmem [shape: f32[2,2,32,16], index: 7, kind: input, shape index: {}]   ;;  %s3971_s8 = inlined_call_operand.vmem [shape: f32[2,2,1,16], index: 8, kind: input, shape index: {}]   ;;  %s3972_s9 = inlined_call_operand.vmem [shape: f32[2,2,32,16], index: 9, kind: input, shape index: {}]   ;;  %s3973_s10 = inlined_call_operand.vmem [shape: f32[2,2,1,16], index: 10, kind: input, shape index: {}]   ;;  %s3974_s11 = inlined_call_operand.vmem [shape: f32[2,2,16,32], index: 11, kind: input, shape index: {}]   ;;  %s3975_s12 = inlined_call_operand.vmem [shape: f32[2,1,32], index: 12, kind: input, shape index: {}]   ;;  %s3976_s13 = inlined_call_operand.vmem [shape: f32[2,1,32], index: 13, kind: input, shape index: {}]   ;;  %s3977_s14 = inlined_call_operand.vmem [shape: f32[2,1,32], index: 14, kind: input, shape index: {}]   ;;  %s3978_s15 = inlined_call_operand.vmem [shape: f32[2,32,64], index: 15, kind: input, shape index: {}]   ;;  %s3979_s16 = inlined_call_operand.vmem [shape: f32[2,1,64], index: 16, kind: input, shape index: {}]   ;;  %s3980_s17 = inlined_call_operand.vmem [shape: f32[2,64,32], index: 17, kind: input, shape index: {}]   ;;  %s3981_s18 = inlined_call_operand.vmem [shape: f32[2,1,32], index: 18, kind: input, shape index: {}]   ;;  %s3982_s19 = inlined_call_operand.vmem [shape: f32[2,1,32], index: 19, kind: input, shape index: {}]   ;;  %s3983_s20 = inlined_call_operand.vmem [shape: f32[2,1,32], index: 20, kind: input, shape index: {}]   ;;  %s3984_s21 = inlined_call_operand.vmem [shape: f32[32,128], index: 21, kind: input, shape index: {}]   ;;  %s3985_s22 = inlined_call_operand.vmem [shape: f32[1,128], index: 22, kind: input, shape index: {}]   ;;  %s3986_s23 = inlined_call_operand.hbm [shape: f32[16,128], index: 23, kind: output, shape index: {}]  }
   0x1   :  { %3994 = sst [smem:[#allocation5_spill]] %s3963_s0 }
   0x2   :  { %3995 = sst [smem:[#allocation6_spill]] %s3964_s1 }
   0x3   :  { %3996 = sst [smem:[#allocation7_spill]] %s3965_s2 }
   0x4   :  { %3997 = sst [smem:[#allocation8_spill]] %s3966_s3 }
   0x5   :  { %3998 = sst [smem:[#allocation9_spill]] %s3967_s4 }
   0x6   :  { %3999 = sst [smem:[#allocation10_spill]] %s3968_s5 }
   0x7   :  { %4000 = sst [smem:[#allocation11_spill]] %s3969_s6 }
   0x8   :  { %4001 = sst [smem:[#allocation12_spill]] %s3970_s7 }
   0x9   :  { %4002 = sst [smem:[#allocation13_spill]] %s3981_s18 }
   0xa   :  { %s4003_s24 = sld [smem:[#allocation5_spill]]  ;;  %v3157_v2 = vmov 0  }
   0xb   :  { %s4004_s18 = sld [smem:[#allocation6_spill]]  ;;  %3074 = vset.pattern.permute.xlu0 %v3157_v2 }
  0x10   :  { %v76_v0 = vld [vmem:[%s4003_s24] sm:$0xff]  ;;  %v77_v5 = vld [vmem:[%s4003_s24 + $0x8] sm:$0xff] }
  0x11   :  { %v107_v1 = vld [vmem:[%s4004_s18 + $0x78] sm:$0xff]  ;;  %v106_v3 = vld [vmem:[%s4004_s18 + $0x70] sm:$0xff]  ;;  %81 = vperm.xlu0 %3074, %v76_v0   ;;  %v105_v4 = vld [vmem:[%s4004_s18 + $0x68] sm:$0xff] }
  0x12   :  { %2768 = vmatprep.subr.mxu0 %v107_v1  ;;  %v104_v6 = vld [vmem:[%s4004_s18 + $0x60] sm:$0xff]  ;;  %v103_v7 = vld [vmem:[%s4004_s18 + $0x58] sm:$0xff] }
  0x13   :  { %2769 = vmatpush3.msra.mxu0 %v107_v1 }
  0x14   :  { %2770 = vmatprep.subr.mxu0 %v106_v3 }
  0x15   :  { %2771 = vmatpush3.msra.mxu0 %v106_v3  ;;  %84 = vperm.xlu0 %3074, %v77_v5  }
  0x16   :  { %2772 = vmatprep.subr.mxu0 %v105_v4 }
  0x17   :  { %2773 = vmatpush3.msra.mxu0 %v105_v4 }
  0x18   :  { %28 = vsyncpa [#allocation3], 0  ;;  %2774 = vmatprep.subr.mxu0 %v104_v6  ;;  %v102_v8 = vld [vmem:[%s4004_s18 + $0x50] sm:$0xff]  ;;  %v101_v9 = vld [vmem:[%s4004_s18 + $0x48] sm:$0xff]  ;;  %v78_v19 = vlaneseq  ;;  %v3158_v22 = vmov 1.0   ;;  %s4005_s27 = sld [smem:[#allocation7_spill]] }
  0x19   :  { %2775 = vmatpush3.msra.mxu0 %v104_v6  ;;  %v100_v10 = vld [vmem:[%s4004_s18 + $0x40] sm:$0xff]  ;;  %v99_v11 = vld [vmem:[%s4004_s18 + $0x38] sm:$0xff]  ;;  %v98_v12 = vld [vmem:[%s4004_s18 + $0x30] sm:$0xff]  ;;  %vm187_vm2 = vcmask 261120   ;;  %s4006_s3 = sld [smem:[#allocation10_spill]]  ;;  %v3159_v45 = vmov 0.0  }
  0x1a   :  { %2776 = vmatprep.subr.mxu0 %v103_v7  ;;  %v97_v13 = vld [vmem:[%s4004_s18 + $0x28] sm:$0xff]  ;;  %v96_v14 = vld [vmem:[%s4004_s18 + $0x20] sm:$0xff]  ;;  %v95_v15 = vld [vmem:[%s4004_s18 + $0x18] sm:$0xff]  ;;  %v79_v20 = vand.u32 127, %v78_v19  ;;  %2803 = vmatprep.subr.bf16.mxu1 %v3159_v45  ;;  %vm3160_vm3 = vmmov 0   ;;  %s4007_s2 = sld [smem:[#allocation8_spill]] }
  0x1b   :  { %2777 = vmatpush3.msra.mxu0 %v103_v7  ;;  %v94_v16 = vld [vmem:[%s4004_s18 + $0x10] sm:$0xff]  ;;  %v93_v17 = vld [vmem:[%s4004_s18 + $0x8] sm:$0xff]  ;;  %v92_v18 = vld [vmem:[%s4004_s18] sm:$0xff]  ;;  %2807 = vmatprep.mubr.msk.bf16.mxu1 %vm3160_vm3, %v3159_v45  ;;  %s4008_s7 = sld [smem:[#allocation9_spill]]  ;;  %vm401_vm4 = vcmask 130048   ;;  %vm464_vm5 = vcmask 1043456  }
  0x1c   :  { %2778 = vmatprep.subr.mxu0 %v102_v8  ;;  %s4009_s29 = sld [smem:[#allocation12_spill]]  ;;  %vm448_vm6 = vcmask 64512   ;;  %vm1238_vm7 = vcmask 523264  }
  0x1d   :  { %2779 = vmatpush3.msra.mxu0 %v102_v8  ;;  %v346_v8 = vld [vmem:[%s3972_s9 + $0x10] sm:$0xff]  ;;  %s4010_s25 = sld [smem:[#allocation11_spill]] }
  0x1e   :  { %2780 = vmatprep.subr.mxu0 %v101_v9  ;;  %v108_v25 = vld [vmem:[%s4005_s27] sm:$0xff]  ;;  %v109_v26 = vld [vmem:[%s4005_s27 + $0x8] sm:$0xff]  ;;  %s4011_s0 = sld [smem:[#allocation13_spill]] }
  0x1f   :  { %2781 = vmatpush3.msra.mxu0 %v101_v9  ;;  %v234_v42 = vld [vmem:[%s4006_s3 + $0x10] sm:$0xff]  ;;  %v235_v43 = vld [vmem:[%s4006_s3 + $0x18] sm:$0xff]  ;;  %v232_v46 = vld [vmem:[%s4006_s3] sm:$0xff] }
  0x20   :  { %2782 = vmatprep.subr.mxu0 %v100_v10  ;;  %v238_v44 = vpack.c.bf16 %v235_v43, %v234_v42  ;;  %v233_v47 = vld [vmem:[%s4006_s3 + $0x8] sm:$0xff]  ;;  %v2519_v57 = vld [vmem:[%s4007_s2] ss:$0 sm:$0xff]  ;;  %v347_v9 = vld [vmem:[%s3972_s9 + $0x18] sm:$0xff] }
  0x21   :  { %2783 = vmatpush3.msra.mxu0 %v100_v10  ;;  %v237_v48 = vpack.c.bf16 %v233_v47, %v232_v46  ;;  %v2520_v61 = vld [vmem:[%s4008_s7] ss:$0 sm:$0xff]  ;;  %v349_v10 = vpack.c.bf16 %v347_v9, %v346_v8 }
  0x22   :  { %2784 = vmatprep.subr.mxu0 %v99_v11  ;;  %2804 = vmatpush3.bf16.msra.mxu1 %v238_v44  ;;  %v292_v63 = vld [vmem:[%s4009_s29 + $0x10] sm:$0xff]  ;;  %v293_v0 = vld [vmem:[%s4009_s29 + $0x18] sm:$0xff]  ;;  %v290_v5 = vld [vmem:[%s4009_s29] sm:$0xff] }
  0x23   :  { %2785 = vmatpush3.msra.mxu0 %v99_v11  ;;  %2805 = vmatprep.subr.bf16.mxu1 %v3159_v45  ;;  %v295_v3 = vpack.c.bf16 %v293_v0, %v292_v63  ;;  %v291_v6 = vld [vmem:[%s4009_s29 + $0x8] sm:$0xff]  ;;  %v344_v11 = vld [vmem:[%s3972_s9] sm:$0xff] }
  0x24   :  { %2786 = vmatprep.subr.mxu0 %v98_v12  ;;  %v294_v7 = vpack.c.bf16 %v291_v6, %v290_v5 }
  0x25   :  { %2787 = vmatpush3.msra.mxu0 %v98_v12  ;;  %v345_v12 = vld [vmem:[%s3972_s9 + $0x8] sm:$0xff] }
  0x26   :  { %2788 = vmatprep.subr.mxu0 %v97_v13  ;;  %2806 = vmatpush3.bf16.msra.mxu1 %v237_v48 }
  0x27   :  { %2789 = vmatpush3.msra.mxu0 %v97_v13  ;;  %2811 = vmatprep.subr.bf16.mxu1 %v3159_v45  ;;  %v348_v13 = vpack.c.bf16 %v345_v12, %v344_v11  ;;  %v2536_v11 = vld [vmem:[%s4006_s3 + $0x38] sm:$0xff] }
  0x28   :  { %2790 = vmatprep.subr.mxu0 %v96_v14 }
  0x29   :  { %2791 = vmatpush3.msra.mxu0 %v96_v14 }
  0x2a   :  { %2792 = vmatprep.subr.mxu0 %v95_v15 }
  0x2b   :  { %2793 = vmatpush3.msra.mxu0 %v95_v15 }
  0x2c   :  { %2794 = vmatprep.subr.mxu0 %v94_v16 }
  0x2d   :  { %2795 = vmatpush3.msra.mxu0 %v94_v16 }
  0x2e   :  { %2796 = vmatprep.subr.mxu0 %v93_v17 }
  0x2f   :  { %2797 = vmatpush3.msra.mxu0 %v93_v17 }
  0x30   :  { %2798 = vmatprep.subr.mxu0 %v92_v18 }
  0x31   :  { %2799 = vmatpush3.msra.mxu0 %v92_v18  ;;  %v2523_v18 = vld [vmem:[%s3971_s8] ss:$0 sm:$0xff] }
  0x32   :  { %2833 = vmatprep.subr.bf16.mxu0 %v3159_v45 }
  0x8c   :  { %v82_v21 = vpop.permute.xlu0 %81 }
  0x8d   :  { %vm86_vm0 = vcmp.eq.s32.totalorder %v82_v21, %v79_v20 }
  0x8e   :  { %2800 = vmatprep.mubr.msk.f32.mxu0 %vm86_vm0, %v3158_v22 }
  0x90   :  { %v85_v23 = vpop.permute.xlu0 %84 }
  0x91   :  { %vm87_vm1 = vcmp.eq.s32.totalorder %v85_v23, %v79_v20  ;;  %v2521_v23 = vld [vmem:[%s4010_s25] ss:$0 sm:$0xff] }
  0x92   :  { %2801 = vmatmul.mubr.msk.f32.vlgmr.msra.gmra.mxu0 %vm87_vm1, %v3158_v22 }
  0x93   :  { %2835 = vmatprep.mubr.msk.bf16.mxu0 %vm3160_vm3, %v3159_v45 }
 0x152   :  { %v2802_v24 = vpop.f32.mrf.mxu0 }
 0x153   :  { %v182_v29 = vadd.f32 %v2802_v24, %v109_v26 }
 0x154   :  { %v176_v27 = vpop.f32.mrf.mxu0 }
 0x155   :  { %v177_v28 = vadd.f32 %v176_v27, %v108_v25  ;;  %v191_v31 = vsel %vm187_vm2, %v182_v29, 0.0 }
 0x157   :  { %v188_v30 = vsel %vm187_vm2, %v177_v28, 0.0 }
 0x158   :  { %189 = vadd.xlane.f32.xlu1 %v188_v30 }
 0x15c   :  { %192 = vadd.xlane.f32.xlu1 %v191_v31 }
 0x1e1   :  { %v190_v32 = vpop.xlane.xlu1 %189 }
 0x1e2   :  { %v195_v33 = vmul.f32 0.03125, %v190_v32 }
 0x1e4   :  { %v197_v34 = vsub.f32 %v177_v28, %v195_v33  ;;  %v2525_v28 = vld [vmem:[%s3973_s10] ss:$0 sm:$0xff] }
 0x1e5   :  { %v193_v35 = vpop.xlane.xlu1 %192 }
 0x1e6   :  { %v196_v36 = vmul.f32 0.03125, %v193_v35  ;;  %v199_v37 = vmul.f32 %v197_v34, %v197_v34 }
 0x1e8   :  { %v198_v38 = vsub.f32 %v182_v29, %v196_v36  ;;  %v201_v39 = vsel %vm187_vm2, %v199_v37, 0.0 }
 0x1e9   :  { %202 = vadd.xlane.f32.xlu0 %v201_v39 }
 0x1ea   :  { %v200_v40 = vmul.f32 %v198_v38, %v198_v38 }
 0x1ec   :  { %v204_v41 = vsel %vm187_vm2, %v200_v40, 0.0 }
 0x1ed   :  { %205 = vadd.xlane.f32.xlu1 %v204_v41 }
 0x272   :  { %v203_v49 = vpop.xlane.xlu0 %202 }
 0x273   :  { %v207_v50 = vmul.f32 0.03125, %v203_v49 }
 0x275   :  { %v209_v51 = vadd.f32 1e-12, %v207_v50 }
 0x276   :  { %v206_v52 = vpop.xlane.xlu1 %205 }
 0x277   :  { %3075 = vrsqrt.f32 %v209_v51  ;;  %v208_v53 = vmul.f32 0.03125, %v206_v52 }
 0x279   :  { %v210_v54 = vadd.f32 1e-12, %v208_v53 }
 0x27b   :  { %3077 = vrsqrt.f32 %v210_v54 }
 0x284   :  { %v3076_v55 = vpop.eup %3075 }
 0x285   :  { %v213_v56 = vmul.f32 %v3076_v55, %v197_v34 }
 0x287   :  { %v221_v59 = vmul.f32 %v2519_v57, %v213_v56 }
 0x288   :  { %v3078_v58 = vpop.eup %3077 }
 0x289   :  { %v214_v60 = vmul.f32 %v3078_v58, %v198_v38  ;;  %v3380_v1 = vadd.f32 %v2520_v61, %v221_v59 }
 0x28b   :  { %v222_v62 = vmul.f32 %v2519_v57, %v214_v60 }
 0x28d   :  { %v3382_v2 = vadd.f32 %v2520_v61, %v222_v62 }
 0x28f   :  { %v3386_v4 = vpack.c.bf16 %v3382_v2, %v3380_v1 }
 0x291   :  { %2808 = vmatmul.mubr.msk.bf16.vlgmr.msra.gmra.mxu1 %vm187_vm2, %v3386_v4 }
 0x292   :  { %2812 = vmatpush3.bf16.msra.mxu1 %v295_v3  ;;  %2815 = vmatprep.mubr.msk.bf16.mxu1 %vm3160_vm3, %v3159_v45 }
 0x293   :  { %2813 = vmatprep.subr.bf16.mxu1 %v3159_v45 }
 0x296   :  { %2814 = vmatpush3.bf16.msra.mxu1 %v294_v7 }
 0x297   :  { %2819 = vmatprep.subr.bf16.mxu1 %v3159_v45 }
 0x299   :  { %2816 = vmatmul.mubr.msk.bf16.vlgmr.msra.gmra.mxu1 %vm187_vm2, %v3386_v4 }
 0x29a   :  { %2820 = vmatpush3.bf16.msra.mxu1 %v349_v10  ;;  %2823 = vmatprep.mubr.msk.bf16.mxu1 %vm3160_vm3, %v3159_v45  ;;  %v2535_v10 = vld [vmem:[%s4006_s3 + $0x30] sm:$0xff] }
 0x29b   :  { %2821 = vmatprep.subr.bf16.mxu1 %v3159_v45 }
 0x29e   :  { %2822 = vmatpush3.bf16.msra.mxu1 %v348_v13 }
 0x29f   :  { %2827 = vmatprep.subr.bf16.mxu1 %v3159_v45 }
 0x2a1   :  { %2824 = vmatmul.mubr.msk.bf16.vlgmr.msra.gmra.mxu1 %vm187_vm2, %v3386_v4 }
 0x2a2   :  { %2829 = vmatprep.mubr.msk.bf16.mxu1 %vm3160_vm3, %v3159_v45 }
 0x351   :  { %v283_v14 = vpop.f32.mrf.mxu1 }
 0x352   :  { %v284_v29 = vadd.f32 %v2521_v23, %v283_v14  ;;  %v677_v14 = vpack.c.bf16 %v2536_v11, %v2535_v10 }
 0x353   :  { %v2809_v15 = vpop.f32.mrf.mxu1 }
 0x354   :  { %v398_v34 = vpack.c.bf16 %v284_v29, %v284_v29 }
 0x355   :  { %v286_v16 = vpop.f32.mrf.mxu1 }
 0x356   :  { %v287_v41 = vadd.f32 %v2521_v23, %v286_v16  ;;  %v2533_v16 = vld [vmem:[%s4006_s3 + $0x20] sm:$0xff]  ;;  %v2548_v23 = vld [vmem:[%s3972_s9 + $0x28] sm:$0xff] }
 0x357   :  { %v2810_v17 = vpop.f32.mrf.mxu1 }
 0x358   :  { %v508_v42 = vpack.c.bf16 %v287_v41, %v287_v41  ;;  %v2534_v17 = vld [vmem:[%s4006_s3 + $0x28] sm:$0xff] }
 0x359   :  { %v337_v19 = vpop.f32.mrf.mxu1 }
 0x35a   :  { %v338_v20 = vadd.f32 %v2523_v18, %v337_v19  ;;  %v2549_v19 = vld [vmem:[%s3972_s9 + $0x30] sm:$0xff] }
 0x35b   :  { %v2817_v21 = vpop.f32.mrf.mxu1 }
 0x35c   :  { %v399_v22 = vpack.c.bf16 %v338_v20, %v338_v20  ;;  %v2550_v20 = vld [vmem:[%s3972_s9 + $0x38] sm:$0xff] }
 0x35d   :  { %v340_v24 = vpop.f32.mrf.mxu1  ;;  %v789_v21 = vpack.c.bf16 %v2550_v20, %v2549_v19 }
 0x35e   :  { %v406_v25 = vsel %vm401_vm4, %v399_v22, 0  ;;  %v341_v26 = vadd.f32 %v2523_v18, %v340_v24  ;;  %v676_v18 = vpack.c.bf16 %v2534_v17, %v2533_v16  ;;  %v2547_v22 = vld [vmem:[%s3972_s9 + $0x20] sm:$0xff] }
 0x35f   :  { %v2818_v27 = vpop.f32.mrf.mxu1  ;;  %2828 = vmatpush3.bf16.xpose.msra.mxu1 %v406_v25  ;;  %v788_v24 = vpack.c.bf16 %v2548_v23, %v2547_v22  ;;  %v615_v25 = vld [vmem:[%s3974_s11] sm:$0xff] }
 0x360   :  { %2839 = vmatprep.subr.bf16.mxu1 %v3159_v45  ;;  %v509_v31 = vpack.c.bf16 %v341_v26, %v341_v26  ;;  %v616_v26 = vld [vmem:[%s3974_s11 + $0x8] sm:$0xff] }
 0x361   :  { %v391_v30 = vpop.f32.mrf.mxu1  ;;  %v618_v27 = vpack.c.bf16 %v616_v26, %v615_v25 }
 0x362   :  { %v392_v32 = vadd.f32 %v2525_v28, %v391_v30  ;;  %v515_v37 = vsel %vm401_vm4, %v509_v31, 0  ;;  %v2542_v31 = vld [vmem:[%s4009_s29 + $0x30] sm:$0xff] }
 0x363   :  { %v2825_v33 = vpop.f32.mrf.mxu1 }
 0x364   :  { %v400_v35 = vpack.c.bf16 %v392_v32, %v392_v32  ;;  %v2543_v32 = vld [vmem:[%s4009_s29 + $0x38] sm:$0xff] }
 0x365   :  { %v394_v36 = vpop.f32.mrf.mxu1 }
 0x366   :  { %v466_v38 = vsel %vm464_vm5, %v400_v35, 0  ;;  %v395_v39 = vadd.f32 %v2525_v28, %v394_v36  ;;  %2830 = vmatmul.mubr.msk.bf16.vlgmr.msra.gmra.mxu1 %vm401_vm4, %v398_v34  ;;  %v733_v35 = vpack.c.bf16 %v2543_v32, %v2542_v31 }
 0x367   :  { %v2826_v40 = vpop.f32.mrf.mxu1  ;;  %2834 = vmatpush3.bf16.msra.mxu0 %v466_v38  ;;  %2840 = vmatpush3.bf16.xpose.msra.mxu1 %v515_v37  ;;  %v2540_v37 = vld [vmem:[%s4009_s29 + $0x20] sm:$0xff]  ;;  %v2541_v38 = vld [vmem:[%s4009_s29 + $0x28] sm:$0xff] }
 0x368   :  { %2841 = vmatprep.mubr.msk.bf16.mxu1 %vm3160_vm3, %v3159_v45  ;;  %2845 = vmatprep.subr.bf16.mxu0 %v3159_v45  ;;  %v510_v6 = vpack.c.bf16 %v395_v39, %v395_v39  ;;  %v732_v41 = vpack.c.bf16 %v2541_v38, %v2540_v37 }
 0x369   :  { %2851 = vmatprep.subr.bf16.mxu1 %v3159_v45 }
 0x36a   :  { %v573_v9 = vsel %vm464_vm5, %v510_v6, 0 }
 0x36e   :  { %2842 = vmatmul.mubr.msk.bf16.vlgmr.msra.gmra.mxu1 %vm401_vm4, %v508_v42 }
 0x36f   :  { %2853 = vmatprep.mubr.msk.bf16.mxu1 %vm3160_vm3, %v3159_v45  ;;  %2852 = vmatpush3.bf16.msra.mxu1 %v618_v27 }
 0x370   :  { %2865 = vmatprep.subr.bf16.mxu1 %v3159_v45 }
 0x426   :  { %v442_v43 = vpop.f32.mrf.mxu1 }
 0x427   :  { %v449_v44 = vsel %vm448_vm6, %v442_v43, -inf }
 0x428   :  { %450 = vmax.xlane.f32.xlu1 %v449_v44  ;;  %v2831_v46 = vpop.f32.mrf.mxu1 }
 0x42a   :  { %v445_v47 = vpop.f32.mrf.mxu1 }
 0x42c   :  { %v2832_v48 = vpop.f32.mrf.mxu1 }
 0x42d   :  { %v2552_v48 = vld [vmem:[%s3973_s10 + $0x1] ss:$0 sm:$0xff] }
 0x42e   :  { %v551_v49 = vpop.f32.mrf.mxu1 }
 0x42f   :  { %v557_v50 = vsel %vm448_vm6, %v551_v49, -inf }
 0x430   :  { %558 = vmax.xlane.f32.xlu1 %v557_v50  ;;  %v2843_v51 = vpop.f32.mrf.mxu1 }
 0x432   :  { %v554_v52 = vpop.f32.mrf.mxu1 }
 0x434   :  { %v2844_v53 = vpop.f32.mrf.mxu1 }
 0x4b1   :  { %v451_v54 = vpop.xlane.xlu1 %450 }
 0x4b2   :  { %v452_v55 = vsub.f32 %v442_v43, %v451_v54 }
 0x4b4   :  { %v453_v56 = vmul.f32 1.442695, %v452_v55 }
 0x4b6   :  { %3079 = vpow2.f32 %v453_v56 }
 0x4b9   :  { %v559_v57 = vpop.xlane.xlu1 %558 }
 0x4ba   :  { %v560_v58 = vsub.f32 %v551_v49, %v559_v57 }
 0x4bc   :  { %v561_v59 = vmul.f32 1.442695, %v560_v58 }
 0x4be   :  { %3081 = vpow2.f32 %v561_v59 }
 0x4c3   :  { %v3080_v60 = vpop.eup %3079 }
 0x4c4   :  { %v455_v61 = vsel %vm448_vm6, %v3080_v60, 0.0 }
 0x4c5   :  { %456 = vadd.xlane.f32.xlu1 %v455_v61 }
 0x4cb   :  { %v3082_v62 = vpop.eup %3081 }
 0x4cc   :  { %v563_v63 = vsel %vm448_vm6, %v3082_v62, 0.0 }
 0x4cd   :  { %564 = vadd.xlane.f32.xlu1 %v563_v63 }
 0x54e   :  { %v457_v0 = vpop.xlane.xlu1 %456 }
 0x54f   :  { %3083 = vrcp.f32 %v457_v0 }
 0x556   :  { %v565_v3 = vpop.xlane.xlu1 %564 }
 0x557   :  { %3085 = vrcp.f32 %v565_v3  ;;  %v2538_v3 = vld [vmem:[%s4010_s25 + $0x1] ss:$0 sm:$0xff] }
 0x55c   :  { %v3084_v5 = vpop.eup %3083 }
 0x55d   :  { %v459_v7 = vmul.f32 %v3084_v5, %v3080_v60  ;;  %v2545_v60 = vld [vmem:[%s3971_s8 + $0x1] ss:$0 sm:$0xff] }
 0x55f   :  { %v460_v8 = vpack.c.bf16 %v459_v7, %v459_v7 }
 0x561   :  { %2836 = vmatmul.mubr.msk.bf16.vlgmr.msra.gmra.mxu0 %vm448_vm6, %v460_v8 }
 0x562   :  { %2846 = vmatpush3.bf16.msra.mxu0 %v573_v9  ;;  %2847 = vmatprep.mubr.msk.bf16.mxu0 %vm3160_vm3, %v3159_v45 }
 0x563   :  { %2857 = vmatprep.subr.bf16.mxu0 %v3159_v45 }
 0x564   :  { %v3086_v12 = vpop.eup %3085 }
 0x565   :  { %v567_v13 = vmul.f32 %v3086_v12, %v3082_v62 }
 0x567   :  { %v568_v15 = vpack.c.bf16 %v567_v13, %v567_v13 }
 0x569   :  { %2848 = vmatmul.mubr.msk.bf16.vlgmr.msra.gmra.mxu0 %vm448_vm6, %v568_v15 }
 0x56a   :  { %2858 = vmatpush3.bf16.msra.mxu0 %v677_v14  ;;  %2861 = vmatprep.mubr.msk.bf16.mxu0 %vm3160_vm3, %v3159_v45 }
 0x56b   :  { %2859 = vmatprep.subr.bf16.mxu0 %v3159_v45 }
 0x56e   :  { %2860 = vmatpush3.bf16.msra.mxu0 %v676_v18 }
 0x56f   :  { %2873 = vmatprep.subr.bf16.mxu0 %v3159_v45 }
 0x571   :  { %2862 = vmatmul.mubr.msk.bf16.vlgmr.msra.gmra.mxu0 %vm187_vm2, %v3386_v4 }
 0x572   :  { %2874 = vmatpush3.bf16.msra.mxu0 %v789_v21  ;;  %2877 = vmatprep.mubr.msk.bf16.mxu0 %vm3160_vm3, %v3159_v45 }
 0x573   :  { %2875 = vmatprep.subr.bf16.mxu0 %v3159_v45 }
 0x576   :  { %2876 = vmatpush3.bf16.msra.mxu0 %v788_v24 }
 0x577   :  { %2887 = vmatprep.subr.bf16.mxu0 %v3159_v45 }
 0x579   :  { %2878 = vmatmul.mubr.msk.bf16.vlgmr.msra.gmra.mxu0 %vm187_vm2, %v3386_v4 }
 0x57a   :  { %2889 = vmatprep.mubr.msk.bf16.mxu0 %vm3160_vm3, %v3159_v45 }
 0x621   :  { %v502_v28 = vpop.f32.mrf.mxu0 }
 0x623   :  { %v2837_v29 = vpop.f32.mrf.mxu0 }
 0x625   :  { %v505_v30 = vpop.f32.mrf.mxu0 }
 0x627   :  { %v2838_v33 = vpop.f32.mrf.mxu0 }
 0x629   :  { %v609_v34 = vpop.f32.mrf.mxu0 }
 0x62a   :  { %v617_v36 = vpack.c.bf16 %v609_v34, %v502_v28 }
 0x62b   :  { %v2849_v39 = vpop.f32.mrf.mxu0 }
 0x62c   :  { %2854 = vmatmul.mubr.msk.bf16.vlgmr.msra.gmra.mxu1 %vm401_vm4, %v617_v36 }
 0x62d   :  { %v612_v40 = vpop.f32.mrf.mxu0  ;;  %2866 = vmatpush3.bf16.msra.mxu1 %v733_v35  ;;  %2869 = vmatprep.mubr.msk.bf16.mxu1 %vm3160_vm3, %v3159_v45 }
 0x62e   :  { %2867 = vmatprep.subr.bf16.mxu1 %v3159_v45 }
 0x62f   :  { %v2850_v42 = vpop.f32.mrf.mxu0 }
 0x631   :  { %v720_v43 = vpop.f32.mrf.mxu0  ;;  %2868 = vmatpush3.bf16.msra.mxu1 %v732_v41 }
 0x632   :  { %2881 = vmatprep.subr.bf16.mxu1 %v3159_v45  ;;  %v721_v9 = vadd.f32 %v2538_v3, %v720_v43 }
 0x633   :  { %v2863_v44 = vpop.f32.mrf.mxu0 }
 0x634   :  { %2870 = vmatmul.mubr.msk.bf16.vlgmr.msra.gmra.mxu1 %vm187_vm2, %v3386_v4  ;;  %v839_v11 = vpack.c.bf16 %v721_v9, %v721_v9 }
 0x635   :  { %v723_v46 = vpop.f32.mrf.mxu0  ;;  %2883 = vmatprep.mubr.msk.bf16.mxu1 %vm3160_vm3, %v3159_v45 }
 0x636   :  { %v724_v13 = vadd.f32 %v2538_v3, %v723_v46  ;;  %v2558_v46 = vld [vmem:[%s3974_s11 + $0x10] sm:$0xff] }
 0x637   :  { %v2864_v47 = vpop.f32.mrf.mxu0 }
 0x638   :  { %v946_v14 = vpack.c.bf16 %v724_v13, %v724_v13  ;;  %v2559_v47 = vld [vmem:[%s3974_s11 + $0x18] sm:$0xff] }
 0x639   :  { %v832_v49 = vpop.f32.mrf.mxu0 }
 0x63a   :  { %v833_v50 = vadd.f32 %v2552_v48, %v832_v49 }
 0x63b   :  { %v2879_v51 = vpop.f32.mrf.mxu0 }
 0x63c   :  { %v841_v52 = vpack.c.bf16 %v833_v50, %v833_v50 }
 0x63d   :  { %v835_v53 = vpop.f32.mrf.mxu0 }
 0x63e   :  { %v904_v54 = vsel %vm464_vm5, %v841_v52, 0  ;;  %v3523_v55 = vadd.f32 %v2552_v48, %v835_v53  ;;  %v1057_v48 = vpack.c.bf16 %v2559_v47, %v2558_v46  ;;  %v1220_v47 = vld [vmem:[%s3980_s17 + $0x10] sm:$0xff] }
 0x63f   :  { %v2880_v56 = vpop.f32.mrf.mxu0  ;;  %2888 = vmatpush3.bf16.msra.mxu0 %v904_v54 }
 0x640   :  { %2899 = vmatprep.subr.bf16.mxu0 %v3159_v45  ;;  %v948_v38 = vpack.c.bf16 %v3523_v55, %v3523_v55 }
 0x642   :  { %v1011_v41 = vsel %vm464_vm5, %v948_v38, 0 }
 0x6ec   :  { %v3526_v4 = vpop.f32.mrf.mxu1 }
 0x6ee   :  { %v2855_v57 = vpop.f32.mrf.mxu1 }
 0x6f0   :  { %v3528_v58 = vpop.f32.mrf.mxu1 }
 0x6f2   :  { %v2856_v59 = vpop.f32.mrf.mxu1 }
 0x6f3   :  { %v2532_v59 = vld [vmem:[%s3975_s12] ss:$0 sm:$0xff] }
 0x6f4   :  { %v776_v61 = vpop.f32.mrf.mxu1 }
 0x6f5   :  { %v777_v62 = vadd.f32 %v2545_v60, %v776_v61 }
 0x6f6   :  { %v2871_v63 = vpop.f32.mrf.mxu1 }
 0x6f7   :  { %v840_v0 = vpack.c.bf16 %v777_v62, %v777_v62 }
 0x6f8   :  { %v779_v5 = vpop.f32.mrf.mxu1 }
 0x6f9   :  { %v846_v6 = vsel %vm401_vm4, %v840_v0, 0  ;;  %v780_v7 = vadd.f32 %v2545_v60, %v779_v5  ;;  %v669_v60 = vadd.f32 %v2532_v59, %v3526_v4  ;;  %v670_v0 = vadd.f32 %v2532_v59, %v3528_v58 }
 0x6fa   :  { %v2872_v8 = vpop.f32.mrf.mxu1  ;;  %2882 = vmatpush3.bf16.xpose.msra.mxu1 %v846_v6 }
 0x6fb   :  { %2893 = vmatprep.subr.bf16.mxu1 %v3159_v45  ;;  %v947_v10 = vpack.c.bf16 %v780_v7, %v780_v7 }
 0x6fd   :  { %v953_v12 = vsel %vm401_vm4, %v947_v10, 0 }
 0x701   :  { %2884 = vmatmul.mubr.msk.bf16.vlgmr.msra.gmra.mxu1 %vm401_vm4, %v839_v11 }
 0x702   :  { %2894 = vmatpush3.bf16.xpose.msra.mxu1 %v953_v12  ;;  %2895 = vmatprep.mubr.msk.bf16.mxu1 %vm3160_vm3, %v3159_v45 }
 0x703   :  { %2905 = vmatprep.subr.bf16.mxu1 %v3159_v45 }
 0x709   :  { %2896 = vmatmul.mubr.msk.bf16.vlgmr.msra.gmra.mxu1 %vm401_vm4, %v946_v14 }
 0x70a   :  { %2907 = vmatprep.mubr.msk.bf16.mxu1 %vm3160_vm3, %v3159_v45  ;;  %2906 = vmatpush3.bf16.msra.mxu1 %v1057_v48  ;;  %v1221_v48 = vld [vmem:[%s3980_s17 + $0x18] sm:$0xff] }
 0x70b   :  { %2919 = vmatprep.subr.bf16.mxu1 %v3159_v45 }
 0x7c1   :  { %v882_v15 = vpop.f32.mrf.mxu1 }
 0x7c2   :  { %v888_v16 = vsel %vm448_vm6, %v882_v15, -inf }
 0x7c3   :  { %889 = vmax.xlane.f32.xlu1 %v888_v16  ;;  %v2885_v17 = vpop.f32.mrf.mxu1 }
 0x7c5   :  { %v885_v18 = vpop.f32.mrf.mxu1 }
 0x7c6   :  { %v1153_v18 = vld [vmem:[%s3978_s15 + $0x18] sm:$0xff] }
 0x7c7   :  { %v2886_v19 = vpop.f32.mrf.mxu1 }
 0x7c9   :  { %v989_v20 = vpop.f32.mrf.mxu1 }
 0x7ca   :  { %v995_v21 = vsel %vm448_vm6, %v989_v20, -inf }
 0x7cb   :  { %996 = vmax.xlane.f32.xlu1 %v995_v21  ;;  %v2897_v22 = vpop.f32.mrf.mxu1  ;;  %v1151_v21 = vld [vmem:[%s3978_s15 + $0x8] sm:$0xff] }
 0x7cd   :  { %v992_v23 = vpop.f32.mrf.mxu1 }
 0x7cf   :  { %v2898_v24 = vpop.f32.mrf.mxu1 }
 0x84c   :  { %v890_v25 = vpop.xlane.xlu1 %889 }
 0x84d   :  { %v891_v26 = vsub.f32 %v882_v15, %v890_v25 }
 0x84f   :  { %v892_v27 = vmul.f32 1.442695, %v891_v26 }
 0x851   :  { %3087 = vpow2.f32 %v892_v27 }
 0x854   :  { %v997_v28 = vpop.xlane.xlu1 %996 }
 0x855   :  { %v998_v29 = vsub.f32 %v989_v20, %v997_v28  ;;  %v1150_v20 = vld [vmem:[%s3978_s15] sm:$0xff] }
 0x856   :  { %v1155_v22 = vpack.c.bf16 %v1151_v21, %v1150_v20 }
 0x857   :  { %v999_v30 = vmul.f32 1.442695, %v998_v29 }
 0x859   :  { %3089 = vpow2.f32 %v999_v30 }
 0x85e   :  { %v3088_v31 = vpop.eup %3087 }
 0x85f   :  { %v894_v32 = vsel %vm448_vm6, %v3088_v31, 0.0 }
 0x860   :  { %895 = vadd.xlane.f32.xlu1 %v894_v32 }
 0x866   :  { %v3090_v33 = vpop.eup %3089 }
 0x867   :  { %v1001_v34 = vsel %vm448_vm6, %v3090_v33, 0.0 }
 0x868   :  { %1002 = vadd.xlane.f32.xlu0 %v1001_v34 }
 0x8e9   :  { %v896_v35 = vpop.xlane.xlu1 %895 }
 0x8ea   :  { %3091 = vrcp.f32 %v896_v35  ;;  %v2562_v35 = vld [vmem:[%s3977_s14] ss:$0 sm:$0xff] }
 0x8f1   :  { %v1003_v36 = vpop.xlane.xlu0 %1002 }
 0x8f2   :  { %3093 = vrcp.f32 %v1003_v36 }
 0x8f7   :  { %v3092_v37 = vpop.eup %3091 }
 0x8f8   :  { %v898_v39 = vmul.f32 %v3092_v37, %v3088_v31  ;;  %v2561_v31 = vld [vmem:[%s3976_s13] ss:$0 sm:$0xff] }
 0x8fa   :  { %v899_v40 = vpack.c.bf16 %v898_v39, %v898_v39 }
 0x8fc   :  { %2890 = vmatmul.mubr.msk.bf16.vlgmr.msra.gmra.mxu0 %vm448_vm6, %v899_v40  ;;  %v1224_v40 = vld [vmem:[%s3980_s17 + $0x30] sm:$0xff] }
 0x8fd   :  { %2900 = vmatpush3.bf16.msra.mxu0 %v1011_v41  ;;  %2901 = vmatprep.mubr.msk.bf16.mxu0 %vm3160_vm3, %v3159_v45  ;;  %v1225_v41 = vld [vmem:[%s3980_s17 + $0x38] sm:$0xff] }
 0x8fe   :  { %2911 = vmatprep.subr.bf16.mxu0 %v3159_v45 }
 0x8ff   :  { %v3094_v42 = vpop.eup %3093 }
 0x900   :  { %v1005_v43 = vmul.f32 %v3094_v42, %v3090_v33  ;;  %v1230_v42 = vpack.c.bf16 %v1225_v41, %v1224_v40 }
 0x902   :  { %v1006_v44 = vpack.c.bf16 %v1005_v43, %v1005_v43  ;;  %v1222_v43 = vld [vmem:[%s3980_s17 + $0x20] sm:$0xff] }
 0x904   :  { %2902 = vmatmul.mubr.msk.bf16.vlgmr.msra.gmra.mxu0 %vm448_vm6, %v1006_v44  ;;  %v1223_v44 = vld [vmem:[%s3980_s17 + $0x28] sm:$0xff] }
 0x905   :  { %2915 = vmatprep.mubr.msk.bf16.mxu0 %vm3160_vm3, %v3159_v45  ;;  %v1229_v46 = vpack.c.bf16 %v1223_v44, %v1222_v43 }
 0x9bc   :  { %v940_v49 = vpop.f32.mrf.mxu0 }
 0x9be   :  { %v2891_v50 = vpop.f32.mrf.mxu0 }
 0x9bf   :  { %v1218_v50 = vld [vmem:[%s3980_s17] sm:$0xff] }
 0x9c0   :  { %v943_v51 = vpop.f32.mrf.mxu0 }
 0x9c1   :  { %v1219_v51 = vld [vmem:[%s3980_s17 + $0x8] sm:$0xff] }
 0x9c2   :  { %v2892_v52 = vpop.f32.mrf.mxu0 }
 0x9c3   :  { %v1227_v52 = vpack.c.bf16 %v1219_v51, %v1218_v50 }
 0x9c4   :  { %v1047_v53 = vpop.f32.mrf.mxu0 }
 0x9c5   :  { %v1056_v54 = vpack.c.bf16 %v1047_v53, %v940_v49  ;;  %v1228_v49 = vpack.c.bf16 %v1221_v48, %v1220_v47  ;;  %v2563_v53 = vld [vmem:[%s3979_s16] ss:$0 sm:$0xff] }
 0x9c6   :  { %v2903_v55 = vpop.f32.mrf.mxu0 }
 0x9c7   :  { %2908 = vmatmul.mubr.msk.bf16.vlgmr.msra.gmra.mxu1 %vm401_vm4, %v1056_v54 }
 0x9c8   :  { %v1050_v56 = vpop.f32.mrf.mxu0  ;;  %2927 = vmatprep.mubr.msk.bf16.mxu1 %vm3160_vm3, %v3159_v45  ;;  %2920 = vmatpush3.bf16.msra.mxu1 %v1230_v42 }
 0x9c9   :  { %2921 = vmatprep.subr.bf16.mxu1 %v3159_v45 }
 0x9ca   :  { %v2904_v57 = vpop.f32.mrf.mxu0 }
 0x9cc   :  { %2922 = vmatpush3.bf16.msra.mxu1 %v1229_v46 }
 0x9cd   :  { %2923 = vmatprep.subr.bf16.mxu1 %v3159_v45 }
 0x9d0   :  { %2924 = vmatpush3.bf16.msra.mxu1 %v1228_v49  ;;  %v2567_v49 = vld [vmem:[%s3982_s19] ss:$0 sm:$0xff] }
 0x9d1   :  { %2925 = vmatprep.subr.bf16.mxu1 %v3159_v45 }
 0x9d4   :  { %2926 = vmatpush3.bf16.msra.mxu1 %v1227_v52 }
 0x9d5   :  { %2947 = vmatprep.subr.bf16.mxu1 %v3159_v45 }
 0xa87   :  { %v1095_v61 = vpop.f32.mrf.mxu1 }
 0xa88   :  { %v1102_v62 = vadd.f32 %v1095_v61, %v669_v60 }
 0xa89   :  { %v2909_v63 = vpop.f32.mrf.mxu1 }
 0xa8a   :  { %v1104_v3 = vadd.f32 %v1102_v62, %v3380_v1 }
 0xa8b   :  { %v1098_v5 = vpop.f32.mrf.mxu1 }
 0xa8c   :  { %v1103_v6 = vadd.f32 %v1098_v5, %v670_v0  ;;  %v1108_v7 = vsel %vm187_vm2, %v1104_v3, 0.0 }
 0xa8d   :  { %1109 = vadd.xlane.f32.xlu1 %v1108_v7  ;;  %v2910_v8 = vpop.f32.mrf.mxu1 }
 0xa8e   :  { %v1105_v9 = vadd.f32 %v1103_v6, %v3382_v2  ;;  %v1152_v2 = vld [vmem:[%s3978_s15 + $0x10] sm:$0xff] }
 0xa8f   :  { %v1156_v19 = vpack.c.bf16 %v1153_v18, %v1152_v2 }
 0xa90   :  { %v1111_v10 = vsel %vm187_vm2, %v1105_v9, 0.0 }
 0xa91   :  { %1112 = vadd.xlane.f32.xlu0 %v1111_v10  ;;  %2912 = vmatpush3.bf16.msra.mxu0 %v1156_v19 }
 0xa92   :  { %2913 = vmatprep.subr.bf16.mxu0 %v3159_v45 }
 0xa95   :  { %2914 = vmatpush3.bf16.msra.mxu0 %v1155_v22 }
 0xa96   :  { %2931 = vmatprep.subr.bf16.mxu0 %v3159_v45 }
 0xb16   :  { %v1110_v11 = vpop.xlane.xlu1 %1109 }
 0xb17   :  { %v1114_v4 = vmul.f32 0.03125, %v1110_v11  ;;  %v2565_v11 = vld [vmem:[%s4011_s0] ss:$0 sm:$0xff] }
 0xb19   :  { %v1116_v12 = vsub.f32 %v1104_v3, %v1114_v4 }
 0xb1a   :  { %v1113_v13 = vpop.xlane.xlu0 %1112 }
 0xb1b   :  { %v1115_v14 = vmul.f32 0.03125, %v1113_v13  ;;  %v1118_v15 = vmul.f32 %v1116_v12, %v1116_v12 }
 0xb1d   :  { %v1117_v58 = vsub.f32 %v1105_v9, %v1115_v14  ;;  %v1120_v1 = vsel %vm187_vm2, %v1118_v15, 0.0 }
 0xb1e   :  { %1121 = vadd.xlane.f32.xlu1 %v1120_v1 }
 0xb1f   :  { %v1119_v16 = vmul.f32 %v1117_v58, %v1117_v58 }
 0xb21   :  { %v1123_v17 = vsel %vm187_vm2, %v1119_v16, 0.0 }
 0xb22   :  { %1124 = vadd.xlane.f32.xlu0 %v1123_v17 }
 0xba7   :  { %v1122_v23 = vpop.xlane.xlu1 %1121 }
 0xba8   :  { %v1126_v24 = vmul.f32 0.03125, %v1122_v23 }
 0xbaa   :  { %v1128_v25 = vadd.f32 1e-12, %v1126_v24 }
 0xbab   :  { %v1125_v26 = vpop.xlane.xlu0 %1124 }
 0xbac   :  { %3095 = vrsqrt.f32 %v1128_v25  ;;  %v1127_v27 = vmul.f32 0.03125, %v1125_v26 }
 0xbae   :  { %v1129_v28 = vadd.f32 1e-12, %v1127_v27 }
 0xbb0   :  { %3097 = vrsqrt.f32 %v1129_v28  ;;  %v2572_v28 = vld [vmem:[%s4006_s3 + $0x50] sm:$0xff] }
 0xbb9   :  { %v3096_v29 = vpop.eup %3095 }
 0xbba   :  { %v1132_v30 = vmul.f32 %v3096_v29, %v1116_v12  ;;  %v2573_v29 = vld [vmem:[%s4006_s3 + $0x58] sm:$0xff] }
 0xbbc   :  { %v1140_v34 = vmul.f32 %v2561_v31, %v1132_v30  ;;  %v2586_v30 = vld [vmem:[%s3972_s9 + $0x50] sm:$0xff] }
 0xbbd   :  { %v3098_v32 = vpop.eup %3097 }
 0xbbe   :  { %v1133_v33 = vmul.f32 %v3098_v32, %v1117_v58  ;;  %v1148_v37 = vadd.f32 %v2562_v35, %v1140_v34  ;;  %v2587_v32 = vld [vmem:[%s3972_s9 + $0x58] sm:$0xff]  ;;  %v2570_v34 = vld [vmem:[%s4006_s3 + $0x40] sm:$0xff] }
 0xbc0   :  { %v1141_v36 = vmul.f32 %v2561_v31, %v1133_v33  ;;  %v1338_v31 = vpack.c.bf16 %v2573_v29, %v2572_v28  ;;  %v1453_v33 = vpack.c.bf16 %v2587_v32, %v2586_v30 }
 0xbc2   :  { %v1149_v38 = vadd.f32 %v2562_v35, %v1141_v36  ;;  %v2571_v35 = vld [vmem:[%s4006_s3 + $0x48] sm:$0xff]  ;;  %v2584_v36 = vld [vmem:[%s3972_s9 + $0x40] sm:$0xff] }
 0xbc4   :  { %v1154_v39 = vpack.c.bf16 %v1149_v38, %v1148_v37 }
 0xbc6   :  { %2916 = vmatmul.mubr.msk.bf16.vlgmr.msra.gmra.mxu0 %vm187_vm2, %v1154_v39 }
 0xbc7   :  { %2935 = vmatprep.mubr.msk.bf16.mxu0 %vm3160_vm3, %v3159_v45  ;;  %2932 = vmatpush3.bf16.msra.mxu0 %v1338_v31 }
 0xbc8   :  { %2933 = vmatprep.subr.bf16.mxu0 %v3159_v45 }
 0xc86   :  { %v1201_v54 = vpop.f32.mrf.mxu0 }
 0xc87   :  { %v1202_v55 = vadd.f32 %v2563_v53, %v1201_v54 }
 0xc88   :  { %v2917_v56 = vpop.f32.mrf.mxu0 }
 0xc89   :  { %v1210_v57 = vmul.f32 0.70710677, %v1202_v55  ;;  %v1208_v5 = vmul.f32 0.5, %v1202_v55  ;;  %v2579_v55 = vld [vmem:[%s4009_s29 + $0x50] sm:$0xff]  ;;  %v2580_v56 = vld [vmem:[%s4009_s29 + $0x58] sm:$0xff] }
 0xc8a   :  { %v1204_v59 = vpop.f32.mrf.mxu0 }
 0xc8b   :  { %3099 = verf.f32 %v1210_v57  ;;  %v1205_v60 = vadd.f32 %v2563_v53, %v1204_v59  ;;  %v2568_v53 = vld [vmem:[%s3983_s20] ss:$0 sm:$0xff] }
 0xc8c   :  { %v2918_v61 = vpop.f32.mrf.mxu0 }
 0xc8d   :  { %v1211_v62 = vmul.f32 0.70710677, %v1205_v60  ;;  %v1209_v6 = vmul.f32 0.5, %v1205_v60  ;;  %v1397_v60 = vpack.c.bf16 %v2580_v56, %v2579_v55 }
 0xc8f   :  { %3101 = verf.f32 %v1211_v62  ;;  %v2577_v62 = vld [vmem:[%s4009_s29 + $0x40] sm:$0xff] }
 0xc98   :  { %v3100_v63 = vpop.eup %3099 }
 0xc99   :  { %v1214_v0 = vadd.f32 1.0, %v3100_v63  ;;  %v2578_v63 = vld [vmem:[%s4009_s29 + $0x48] sm:$0xff] }
 0xc9b   :  { %v1216_v8 = vmul.f32 %v1214_v0, %v1208_v5  ;;  %v1396_v0 = vpack.c.bf16 %v2578_v63, %v2577_v62  ;;  %v2602_v62 = vld [vmem:[%s4006_s3 + $0x78] sm:$0xff] }
 0xc9c   :  { %v3102_v3 = vpop.eup %3101 }
 0xc9d   :  { %v1215_v7 = vadd.f32 1.0, %v3102_v3  ;;  %v2589_v3 = vld [vmem:[%s3973_s10 + $0x2] ss:$0 sm:$0xff] }
 0xc9f   :  { %v1217_v9 = vmul.f32 %v1215_v7, %v1209_v6 }
 0xca1   :  { %v1226_v10 = vpack.c.bf16 %v1217_v9, %v1216_v8 }
 0xca3   :  { %2928 = vmatmul.mubr.msk.bf16.vlgmr.msra.gmra.mxu1 %vm1238_vm7, %v1226_v10 }
 0xca4   :  { %2951 = vmatprep.mubr.msk.bf16.mxu1 %vm3160_vm3, %v3159_v45  ;;  %2948 = vmatpush3.bf16.msra.mxu1 %v1453_v33 }
 0xca5   :  { %2949 = vmatprep.subr.bf16.mxu1 %v3159_v45 }
 0xd63   :  { %v1276_v4 = vpop.f32.mrf.mxu1 }
 0xd64   :  { %v1277_v12 = vadd.f32 %v2565_v11, %v1276_v4 }
 0xd65   :  { %v2929_v13 = vpop.f32.mrf.mxu1 }
 0xd66   :  { %v1283_v14 = vadd.f32 %v1277_v12, %v1148_v37  ;;  %v1337_v37 = vpack.c.bf16 %v2571_v35, %v2570_v34 }
 0xd67   :  { %v1279_v15 = vpop.f32.mrf.mxu1 }
 0xd68   :  { %v1280_v58 = vadd.f32 %v2565_v11, %v1279_v15  ;;  %v1287_v1 = vsel %vm187_vm2, %v1283_v14, 0.0  ;;  %2934 = vmatpush3.bf16.msra.mxu0 %v1337_v37 }
 0xd69   :  { %1288 = vadd.xlane.f32.xlu1 %v1287_v1  ;;  %v2930_v16 = vpop.f32.mrf.mxu1  ;;  %2939 = vmatprep.subr.bf16.mxu0 %v3159_v45 }
 0xd6a   :  { %v1284_v17 = vadd.f32 %v1280_v58, %v1149_v38  ;;  %v2585_v38 = vld [vmem:[%s3972_s9 + $0x48] sm:$0xff]  ;;  %v2582_v58 = vld [vmem:[%s3971_s8 + $0x2] ss:$0 sm:$0xff] }
 0xd6b   :  { %v1452_v39 = vpack.c.bf16 %v2585_v38, %v2584_v36 }
 0xd6c   :  { %v1290_v2 = vsel %vm187_vm2, %v1284_v17, 0.0 }
 0xd6d   :  { %1291 = vadd.xlane.f32.xlu0 %v1290_v2  ;;  %2950 = vmatpush3.bf16.msra.mxu1 %v1452_v39 }
 0xd6e   :  { %2961 = vmatprep.subr.bf16.mxu1 %v3159_v45 }
 0xdf2   :  { %v1289_v18 = vpop.xlane.xlu1 %1288 }
 0xdf3   :  { %v1293_v19 = vmul.f32 0.03125, %v1289_v18  ;;  %v2575_v18 = vld [vmem:[%s4010_s25 + $0x2] ss:$0 sm:$0xff] }
 0xdf5   :  { %v1295_v20 = vsub.f32 %v1283_v14, %v1293_v19 }
 0xdf6   :  { %v1292_v21 = vpop.xlane.xlu0 %1291 }
 0xdf7   :  { %v1294_v22 = vmul.f32 0.03125, %v1292_v21  ;;  %v1297_v23 = vmul.f32 %v1295_v20, %v1295_v20 }
 0xdf9   :  { %v1296_v24 = vsub.f32 %v1284_v17, %v1294_v22  ;;  %v1299_v25 = vsel %vm187_vm2, %v1297_v23, 0.0 }
 0xdfa   :  { %1300 = vadd.xlane.f32.xlu1 %v1299_v25 }
 0xdfb   :  { %v1298_v26 = vmul.f32 %v1296_v24, %v1296_v24 }
 0xdfd   :  { %v1302_v27 = vsel %vm187_vm2, %v1298_v26, 0.0 }
 0xdfe   :  { %1303 = vadd.xlane.f32.xlu0 %v1302_v27 }
 0xe83   :  { %v1301_v40 = vpop.xlane.xlu1 %1300 }
 0xe84   :  { %v1305_v41 = vmul.f32 0.03125, %v1301_v40 }
 0xe86   :  { %v1307_v42 = vadd.f32 1e-12, %v1305_v41 }
 0xe87   :  { %v1304_v43 = vpop.xlane.xlu0 %1303 }
 0xe88   :  { %3103 = vrsqrt.f32 %v1307_v42  ;;  %v1306_v44 = vmul.f32 0.03125, %v1304_v43 }
 0xe8a   :  { %v1308_v46 = vadd.f32 1e-12, %v1306_v44 }
 0xe8c   :  { %3105 = vrsqrt.f32 %v1308_v46 }
 0xe95   :  { %v3104_v47 = vpop.eup %3103 }
 0xe96   :  { %v1311_v48 = vmul.f32 %v3104_v47, %v1295_v20 }
 0xe98   :  { %v1319_v51 = vmul.f32 %v2567_v49, %v1311_v48 }
 0xe99   :  { %v3106_v50 = vpop.eup %3105 }
 0xe9a   :  { %v1312_v52 = vmul.f32 %v3106_v50, %v1296_v24  ;;  %v3685_v57 = vadd.f32 %v2568_v53, %v1319_v51 }
 0xe9c   :  { %v1320_v54 = vmul.f32 %v2567_v49, %v1312_v52 }
 0xe9e   :  { %v3687_v59 = vadd.f32 %v2568_v53, %v1320_v54 }
 0xea0   :  { %v3691_v61 = vpack.c.bf16 %v3687_v59, %v3685_v57 }
 0xea2   :  { %2936 = vmatmul.mubr.msk.bf16.vlgmr.msra.gmra.mxu0 %vm187_vm2, %v3691_v61  ;;  %2952 = vmatmul.mubr.msk.bf16.vlgmr.msra.gmra.mxu1 %vm187_vm2, %v3691_v61 }
 0xea3   :  { %2940 = vmatpush3.bf16.msra.mxu0 %v1397_v60  ;;  %2943 = vmatprep.mubr.msk.bf16.mxu0 %vm3160_vm3, %v3159_v45  ;;  %v2601_v60 = vld [vmem:[%s4006_s3 + $0x70] sm:$0xff] }
 0xea4   :  { %2941 = vmatprep.subr.bf16.mxu0 %v3159_v45  ;;  %2963 = vmatprep.mubr.msk.bf16.mxu1 %vm3160_vm3, %v3159_v45 }
 0xea7   :  { %2942 = vmatpush3.bf16.msra.mxu0 %v1396_v0 }
 0xea8   :  { %2955 = vmatprep.subr.bf16.mxu0 %v3159_v45 }
 0xeaa   :  { %2944 = vmatmul.mubr.msk.bf16.vlgmr.msra.gmra.mxu0 %vm187_vm2, %v3691_v61 }
 0xeab   :  { %2957 = vmatprep.mubr.msk.bf16.mxu0 %vm3160_vm3, %v3159_v45 }
 0xf62   :  { %v1384_v5 = vpop.f32.mrf.mxu0  ;;  %v1496_v6 = vpop.f32.mrf.mxu1 }
 0xf63   :  { %v1497_v7 = vadd.f32 %v2589_v3, %v1496_v6  ;;  %v1385_v23 = vadd.f32 %v2575_v18, %v1384_v5  ;;  %v2599_v6 = vld [vmem:[%s4006_s3 + $0x60] sm:$0xff] }
 0xf64   :  { %v2937_v8 = vpop.f32.mrf.mxu0  ;;  %v2953_v9 = vpop.f32.mrf.mxu1 }
 0xf65   :  { %v1505_v10 = vpack.c.bf16 %v1497_v7, %v1497_v7  ;;  %v1503_v25 = vpack.c.bf16 %v1385_v23, %v1385_v23  ;;  %v2600_v7 = vld [vmem:[%s4006_s3 + $0x68] sm:$0xff]  ;;  %v2615_v9 = vld [vmem:[%s3972_s9 + $0x70] sm:$0xff]  ;;  %v2606_v23 = vld [vmem:[%s4009_s29 + $0x60] sm:$0xff] }
 0xf66   :  { %v1387_v11 = vpop.f32.mrf.mxu0  ;;  %v1499_v4 = vpop.f32.mrf.mxu1  ;;  %v1779_v8 = vpack.c.bf16 %v2600_v7, %v2599_v6 }
 0xf67   :  { %v1568_v12 = vsel %vm464_vm5, %v1505_v10, 0  ;;  %v3717_v13 = vadd.f32 %v2589_v3, %v1499_v4  ;;  %v1388_v27 = vadd.f32 %v2575_v18, %v1387_v11  ;;  %v1780_v3 = vpack.c.bf16 %v2602_v62, %v2601_v60  ;;  %v2616_v10 = vld [vmem:[%s3972_s9 + $0x78] sm:$0xff]  ;;  %v2613_v4 = vld [vmem:[%s3972_s9 + $0x60] sm:$0xff] }
 0xf68   :  { %v2938_v14 = vpop.f32.mrf.mxu0  ;;  %v2954_v15 = vpop.f32.mrf.mxu1  ;;  %2962 = vmatpush3.bf16.msra.mxu1 %v1568_v12  ;;  %v1892_v11 = vpack.c.bf16 %v2616_v10, %v2615_v9  ;;  %v2614_v12 = vld [vmem:[%s3972_s9 + $0x68] sm:$0xff]  ;;  %v2609_v18 = vld [vmem:[%s4009_s29 + $0x78] sm:$0xff] }
 0xf69   :  { %2973 = vmatprep.subr.bf16.mxu1 %v3159_v45  ;;  %v1610_v28 = vpack.c.bf16 %v1388_v27, %v1388_v27  ;;  %v1612_v53 = vpack.c.bf16 %v3717_v13, %v3717_v13  ;;  %v1891_v13 = vpack.c.bf16 %v2614_v12, %v2613_v4  ;;  %v2595_v14 = vld [vmem:[%s3974_s11 + $0x20] sm:$0xff]  ;;  %v2596_v15 = vld [vmem:[%s3974_s11 + $0x28] sm:$0xff] }
 0xf6a   :  { %v1440_v1 = vpop.f32.mrf.mxu0 }
 0xf6b   :  { %v1441_v16 = vadd.f32 %v2582_v58, %v1440_v1  ;;  %v1675_v56 = vsel %vm464_vm5, %v1612_v53, 0 }
 0xf6c   :  { %v2945_v17 = vpop.f32.mrf.mxu0 }
 0xf6d   :  { %v1504_v2 = vpack.c.bf16 %v1441_v16, %v1441_v16 }
 0xf6e   :  { %v1443_v19 = vpop.f32.mrf.mxu0 }
 0xf6f   :  { %v1510_v20 = vsel %vm401_vm4, %v1504_v2, 0  ;;  %v1444_v21 = vadd.f32 %v2582_v58, %v1443_v19  ;;  %v1721_v58 = vpack.c.bf16 %v2596_v15, %v2595_v14  ;;  %v2608_v2 = vld [vmem:[%s4009_s29 + $0x70] sm:$0xff] }
 0xf70   :  { %v2946_v22 = vpop.f32.mrf.mxu0  ;;  %2956 = vmatpush3.bf16.xpose.msra.mxu0 %v1510_v20 }
 0xf71   :  { %2967 = vmatprep.subr.bf16.mxu0 %v3159_v45  ;;  %v1611_v24 = vpack.c.bf16 %v1444_v21, %v1444_v21  ;;  %v1836_v21 = vpack.c.bf16 %v2609_v18, %v2608_v2 }
 0xf73   :  { %v1617_v26 = vsel %vm401_vm4, %v1611_v24, 0  ;;  %v2607_v24 = vld [vmem:[%s4009_s29 + $0x68] sm:$0xff] }
 0xf74   :  { %v1835_v27 = vpack.c.bf16 %v2607_v24, %v2606_v23 }
 0xf77   :  { %2958 = vmatmul.mubr.msk.bf16.vlgmr.msra.gmra.mxu0 %vm401_vm4, %v1503_v25 }
 0xf78   :  { %2968 = vmatpush3.bf16.xpose.msra.mxu0 %v1617_v26  ;;  %2969 = vmatprep.mubr.msk.bf16.mxu0 %vm3160_vm3, %v3159_v45 }
 0xf79   :  { %2979 = vmatprep.subr.bf16.mxu0 %v3159_v45 }
 0xf7f   :  { %2970 = vmatmul.mubr.msk.bf16.vlgmr.msra.gmra.mxu0 %vm401_vm4, %v1610_v28 }
 0xf80   :  { %2981 = vmatprep.mubr.msk.bf16.mxu0 %vm3160_vm3, %v3159_v45  ;;  %2980 = vmatpush3.bf16.msra.mxu0 %v1721_v58 }
 0xf81   :  { %2993 = vmatprep.subr.bf16.mxu0 %v3159_v45 }
0x1037   :  { %v1546_v29 = vpop.f32.mrf.mxu0 }
0x1038   :  { %v1552_v30 = vsel %vm448_vm6, %v1546_v29, -inf }
0x1039   :  { %1553 = vmax.xlane.f32.xlu1 %v1552_v30  ;;  %v2959_v31 = vpop.f32.mrf.mxu0 }
0x103b   :  { %v1549_v32 = vpop.f32.mrf.mxu0 }
0x103d   :  { %v2960_v33 = vpop.f32.mrf.mxu0 }
0x103e   :  { %v2618_v33 = vld [vmem:[%s3973_s10 + $0x3] ss:$0 sm:$0xff] }
0x103f   :  { %v1653_v34 = vpop.f32.mrf.mxu0 }
0x1040   :  { %v1659_v35 = vsel %vm448_vm6, %v1653_v34, -inf }
0x1041   :  { %1660 = vmax.xlane.f32.xlu0 %v1659_v35  ;;  %v2971_v36 = vpop.f32.mrf.mxu0 }
0x1043   :  { %v1656_v37 = vpop.f32.mrf.mxu0 }
0x1045   :  { %v2972_v38 = vpop.f32.mrf.mxu0 }
0x10c2   :  { %v1554_v39 = vpop.xlane.xlu1 %1553 }
0x10c3   :  { %v1555_v40 = vsub.f32 %v1546_v29, %v1554_v39 }
0x10c5   :  { %v1556_v41 = vmul.f32 1.442695, %v1555_v40 }
0x10c7   :  { %3107 = vpow2.f32 %v1556_v41 }
0x10ca   :  { %v1661_v42 = vpop.xlane.xlu0 %1660 }
0x10cb   :  { %v1662_v43 = vsub.f32 %v1653_v34, %v1661_v42 }
0x10cd   :  { %v1663_v44 = vmul.f32 1.442695, %v1662_v43 }
0x10cf   :  { %3109 = vpow2.f32 %v1663_v44 }
0x10d4   :  { %v3108_v46 = vpop.eup %3107 }
0x10d5   :  { %v1558_v47 = vsel %vm448_vm6, %v3108_v46, 0.0 }
0x10d6   :  { %1559 = vadd.xlane.f32.xlu1 %v1558_v47 }
0x10dc   :  { %v3110_v48 = vpop.eup %3109 }
0x10dd   :  { %v1665_v49 = vsel %vm448_vm6, %v3110_v48, 0.0 }
0x10de   :  { %1666 = vadd.xlane.f32.xlu0 %v1665_v49 }
0x115f   :  { %v1560_v50 = vpop.xlane.xlu1 %1559 }
0x1160   :  { %3111 = vrcp.f32 %v1560_v50 }
0x1167   :  { %v1667_v51 = vpop.xlane.xlu0 %1666 }
0x1168   :  { %3113 = vrcp.f32 %v1667_v51  ;;  %v2604_v51 = vld [vmem:[%s4010_s25 + $0x3] ss:$0 sm:$0xff] }
0x116d   :  { %v3112_v52 = vpop.eup %3111 }
0x116e   :  { %v1562_v54 = vmul.f32 %v3112_v52, %v3108_v46  ;;  %v2611_v46 = vld [vmem:[%s3971_s8 + $0x3] ss:$0 sm:$0xff] }
0x1170   :  { %v1563_v55 = vpack.c.bf16 %v1562_v54, %v1562_v54 }
0x1172   :  { %2964 = vmatmul.mubr.msk.bf16.vlgmr.msra.gmra.mxu1 %vm448_vm6, %v1563_v55 }
0x1173   :  { %2974 = vmatpush3.bf16.msra.mxu1 %v1675_v56  ;;  %2975 = vmatprep.mubr.msk.bf16.mxu1 %vm3160_vm3, %v3159_v45 }
0x1174   :  { %2985 = vmatprep.subr.bf16.mxu1 %v3159_v45 }
0x1175   :  { %v3114_v63 = vpop.eup %3113 }
0x1176   :  { %v1669_v0 = vmul.f32 %v3114_v63, %v3110_v48 }
0x1178   :  { %v1670_v5 = vpack.c.bf16 %v1669_v0, %v1669_v0 }
0x117a   :  { %2976 = vmatmul.mubr.msk.bf16.vlgmr.msra.gmra.mxu1 %vm448_vm6, %v1670_v5 }
0x117b   :  { %2986 = vmatpush3.bf16.msra.mxu1 %v1780_v3  ;;  %2989 = vmatprep.mubr.msk.bf16.mxu1 %vm3160_vm3, %v3159_v45 }
0x117c   :  { %2987 = vmatprep.subr.bf16.mxu1 %v3159_v45 }
0x117f   :  { %2988 = vmatpush3.bf16.msra.mxu1 %v1779_v8 }
0x1180   :  { %3001 = vmatprep.subr.bf16.mxu1 %v3159_v45 }
0x1182   :  { %2990 = vmatmul.mubr.msk.bf16.vlgmr.msra.gmra.mxu1 %vm187_vm2, %v3691_v61 }
0x1183   :  { %3002 = vmatpush3.bf16.msra.mxu1 %v1892_v11  ;;  %3005 = vmatprep.mubr.msk.bf16.mxu1 %vm3160_vm3, %v3159_v45 }
0x1184   :  { %3003 = vmatprep.subr.bf16.mxu1 %v3159_v45 }
0x1187   :  { %3004 = vmatpush3.bf16.msra.mxu1 %v1891_v13 }
0x1188   :  { %3015 = vmatprep.subr.bf16.mxu1 %v3159_v45 }
0x118a   :  { %3006 = vmatmul.mubr.msk.bf16.vlgmr.msra.gmra.mxu1 %vm187_vm2, %v3691_v61 }
0x118b   :  { %3017 = vmatprep.mubr.msk.bf16.mxu1 %vm3160_vm3, %v3159_v45 }
0x1232   :  { %v1604_v1 = vpop.f32.mrf.mxu1 }
0x1234   :  { %v2965_v16 = vpop.f32.mrf.mxu1 }
0x1236   :  { %v1607_v17 = vpop.f32.mrf.mxu1 }
0x1238   :  { %v2966_v19 = vpop.f32.mrf.mxu1 }
0x123a   :  { %v1711_v20 = vpop.f32.mrf.mxu1 }
0x123b   :  { %v1720_v22 = vpack.c.bf16 %v1711_v20, %v1604_v1 }
0x123c   :  { %v2977_v25 = vpop.f32.mrf.mxu1 }
0x123d   :  { %2982 = vmatmul.mubr.msk.bf16.vlgmr.msra.gmra.mxu0 %vm401_vm4, %v1720_v22 }
0x123e   :  { %v1714_v26 = vpop.f32.mrf.mxu1  ;;  %2994 = vmatpush3.bf16.msra.mxu0 %v1836_v21  ;;  %2997 = vmatprep.mubr.msk.bf16.mxu0 %vm3160_vm3, %v3159_v45 }
0x123f   :  { %2995 = vmatprep.subr.bf16.mxu0 %v3159_v45 }
0x1240   :  { %v2978_v28 = vpop.f32.mrf.mxu1 }
0x1242   :  { %v1823_v29 = vpop.f32.mrf.mxu1  ;;  %2996 = vmatpush3.bf16.msra.mxu0 %v1835_v27 }
0x1243   :  { %3009 = vmatprep.subr.bf16.mxu0 %v3159_v45  ;;  %v1824_v56 = vadd.f32 %v2604_v51, %v1823_v29 }
0x1244   :  { %v2991_v30 = vpop.f32.mrf.mxu1 }
0x1245   :  { %2998 = vmatmul.mubr.msk.bf16.vlgmr.msra.gmra.mxu0 %vm187_vm2, %v3691_v61  ;;  %v1942_v62 = vpack.c.bf16 %v1824_v56, %v1824_v56 }
0x1246   :  { %v1826_v31 = vpop.f32.mrf.mxu1  ;;  %3011 = vmatprep.mubr.msk.bf16.mxu0 %vm3160_vm3, %v3159_v45 }
0x1247   :  { %v1827_v0 = vadd.f32 %v2604_v51, %v1826_v31  ;;  %v2624_v31 = vld [vmem:[%s3974_s11 + $0x30] sm:$0xff] }
0x1248   :  { %v2992_v32 = vpop.f32.mrf.mxu1 }
0x1249   :  { %v2049_v3 = vpack.c.bf16 %v1827_v0, %v1827_v0  ;;  %v2625_v32 = vld [vmem:[%s3974_s11 + $0x38] sm:$0xff] }
0x124a   :  { %v1935_v34 = vpop.f32.mrf.mxu1 }
0x124b   :  { %v1936_v35 = vadd.f32 %v2618_v33, %v1935_v34 }
0x124c   :  { %v3007_v36 = vpop.f32.mrf.mxu1 }
0x124d   :  { %v1944_v37 = vpack.c.bf16 %v1936_v35, %v1936_v35 }
0x124e   :  { %v1938_v38 = vpop.f32.mrf.mxu1 }
0x124f   :  { %v2007_v39 = vsel %vm464_vm5, %v1944_v37, 0  ;;  %v3818_v40 = vadd.f32 %v2618_v33, %v1938_v38  ;;  %v2160_v33 = vpack.c.bf16 %v2625_v32, %v2624_v31  ;;  %v2640_v32 = vld [vmem:[%s3980_s17 + $0x50] sm:$0xff] }
0x1250   :  { %v3008_v41 = vpop.f32.mrf.mxu1  ;;  %3016 = vmatpush3.bf16.msra.mxu1 %v2007_v39 }
0x1251   :  { %3027 = vmatprep.subr.bf16.mxu1 %v3159_v45  ;;  %v2051_v24 = vpack.c.bf16 %v3818_v40, %v3818_v40 }
0x1253   :  { %v2114_v27 = vsel %vm464_vm5, %v2051_v24, 0 }
0x12fd   :  { %v3821_v61 = vpop.f32.mrf.mxu0 }
0x12ff   :  { %v2983_v42 = vpop.f32.mrf.mxu0 }
0x1301   :  { %v3823_v43 = vpop.f32.mrf.mxu0 }
0x1303   :  { %v2984_v44 = vpop.f32.mrf.mxu0 }
0x1304   :  { %v2598_v44 = vld [vmem:[%s3975_s12 + $0x1] ss:$0 sm:$0xff] }
0x1305   :  { %v1879_v47 = vpop.f32.mrf.mxu0 }
0x1306   :  { %v1880_v48 = vadd.f32 %v2611_v46, %v1879_v47 }
0x1307   :  { %v2999_v49 = vpop.f32.mrf.mxu0 }
0x1308   :  { %v1943_v50 = vpack.c.bf16 %v1880_v48, %v1880_v48 }
0x1309   :  { %v1882_v52 = vpop.f32.mrf.mxu0 }
0x130a   :  { %v1949_v53 = vsel %vm401_vm4, %v1943_v50, 0  ;;  %v1883_v54 = vadd.f32 %v2611_v46, %v1882_v52  ;;  %v1772_v46 = vadd.f32 %v2598_v44, %v3821_v61  ;;  %v1773_v50 = vadd.f32 %v2598_v44, %v3823_v43 }
0x130b   :  { %v3000_v55 = vpop.f32.mrf.mxu0  ;;  %3010 = vmatpush3.bf16.xpose.msra.mxu0 %v1949_v53 }
0x130c   :  { %3021 = vmatprep.subr.bf16.mxu0 %v3159_v45  ;;  %v2050_v60 = vpack.c.bf16 %v1883_v54, %v1883_v54 }
0x130e   :  { %v2056_v63 = vsel %vm401_vm4, %v2050_v60, 0 }
0x1312   :  { %3012 = vmatmul.mubr.msk.bf16.vlgmr.msra.gmra.mxu0 %vm401_vm4, %v1942_v62 }
0x1313   :  { %3022 = vmatpush3.bf16.xpose.msra.mxu0 %v2056_v63  ;;  %3023 = vmatprep.mubr.msk.bf16.mxu0 %vm3160_vm3, %v3159_v45 }
0x1314   :  { %3033 = vmatprep.subr.bf16.mxu0 %v3159_v45 }
0x131a   :  { %3024 = vmatmul.mubr.msk.bf16.vlgmr.msra.gmra.mxu0 %vm401_vm4, %v2049_v3 }
0x131b   :  { %3035 = vmatprep.mubr.msk.bf16.mxu0 %vm3160_vm3, %v3159_v45  ;;  %3034 = vmatpush3.bf16.msra.mxu0 %v2160_v33  ;;  %v2641_v33 = vld [vmem:[%s3980_s17 + $0x58] sm:$0xff] }
0x131c   :  { %3047 = vmatprep.subr.bf16.mxu0 %v3159_v45 }
0x13d2   :  { %v1985_v5 = vpop.f32.mrf.mxu0 }
0x13d3   :  { %v1991_v6 = vsel %vm448_vm6, %v1985_v5, -inf }
0x13d4   :  { %1992 = vmax.xlane.f32.xlu1 %v1991_v6  ;;  %v3013_v7 = vpop.f32.mrf.mxu0 }
0x13d6   :  { %v1988_v8 = vpop.f32.mrf.mxu0 }
0x13d7   :  { %v2634_v8 = vld [vmem:[%s3978_s15 + $0x38] sm:$0xff] }
0x13d8   :  { %v3014_v9 = vpop.f32.mrf.mxu0 }
0x13da   :  { %v2092_v10 = vpop.f32.mrf.mxu0 }
0x13db   :  { %v2098_v11 = vsel %vm448_vm6, %v2092_v10, -inf }
0x13dc   :  { %2099 = vmax.xlane.f32.xlu0 %v2098_v11  ;;  %v3025_v4 = vpop.f32.mrf.mxu0  ;;  %v2632_v11 = vld [vmem:[%s3978_s15 + $0x28] sm:$0xff] }
0x13de   :  { %v2095_v12 = vpop.f32.mrf.mxu0 }
0x13e0   :  { %v3026_v13 = vpop.f32.mrf.mxu0 }
0x145d   :  { %v1993_v14 = vpop.xlane.xlu1 %1992 }
0x145e   :  { %v1994_v15 = vsub.f32 %v1985_v5, %v1993_v14 }
0x1460   :  { %v1995_v58 = vmul.f32 1.442695, %v1994_v15 }
0x1462   :  { %3115 = vpow2.f32 %v1995_v58 }
0x1465   :  { %v2100_v1 = vpop.xlane.xlu0 %2099 }
0x1466   :  { %v2101_v16 = vsub.f32 %v2092_v10, %v2100_v1  ;;  %v2631_v10 = vld [vmem:[%s3978_s15 + $0x20] sm:$0xff] }
0x1467   :  { %v2261_v4 = vpack.c.bf16 %v2632_v11, %v2631_v10 }
0x1468   :  { %v2102_v17 = vmul.f32 1.442695, %v2101_v16 }
0x146a   :  { %3117 = vpow2.f32 %v2102_v17 }
0x146f   :  { %v3116_v2 = vpop.eup %3115 }
0x1470   :  { %v1997_v18 = vsel %vm448_vm6, %v3116_v2, 0.0 }
0x1471   :  { %1998 = vadd.xlane.f32.xlu1 %v1997_v18 }
0x1477   :  { %v3118_v19 = vpop.eup %3117 }
0x1478   :  { %v2104_v20 = vsel %vm448_vm6, %v3118_v19, 0.0 }
0x1479   :  { %2105 = vadd.xlane.f32.xlu0 %v2104_v20 }
0x14fa   :  { %v1999_v21 = vpop.xlane.xlu1 %1998 }
0x14fb   :  { %3119 = vrcp.f32 %v1999_v21  ;;  %v2630_v21 = vld [vmem:[%s3977_s14 + $0x1] ss:$0 sm:$0xff] }
0x1502   :  { %v2106_v22 = vpop.xlane.xlu0 %2105 }
0x1503   :  { %3121 = vrcp.f32 %v2106_v22 }
0x1508   :  { %v3120_v23 = vpop.eup %3119 }
0x1509   :  { %v2001_v25 = vmul.f32 %v3120_v23, %v3116_v2  ;;  %v2629_v2 = vld [vmem:[%s3976_s13 + $0x1] ss:$0 sm:$0xff] }
0x150b   :  { %v2002_v26 = vpack.c.bf16 %v2001_v25, %v2001_v25 }
0x150d   :  { %3018 = vmatmul.mubr.msk.bf16.vlgmr.msra.gmra.mxu1 %vm448_vm6, %v2002_v26  ;;  %v2644_v26 = vld [vmem:[%s3980_s17 + $0x70] sm:$0xff] }
0x150e   :  { %3028 = vmatpush3.bf16.msra.mxu1 %v2114_v27  ;;  %3029 = vmatprep.mubr.msk.bf16.mxu1 %vm3160_vm3, %v3159_v45  ;;  %v2645_v27 = vld [vmem:[%s3980_s17 + $0x78] sm:$0xff] }
0x150f   :  { %3039 = vmatprep.subr.bf16.mxu1 %v3159_v45 }
0x1510   :  { %v3122_v28 = vpop.eup %3121 }
0x1511   :  { %v2108_v29 = vmul.f32 %v3122_v28, %v3118_v19  ;;  %v2338_v28 = vpack.c.bf16 %v2645_v27, %v2644_v26 }
0x1513   :  { %v2109_v30 = vpack.c.bf16 %v2108_v29, %v2108_v29  ;;  %v2642_v29 = vld [vmem:[%s3980_s17 + $0x60] sm:$0xff] }
0x1515   :  { %3030 = vmatmul.mubr.msk.bf16.vlgmr.msra.gmra.mxu1 %vm448_vm6, %v2109_v30  ;;  %v2643_v30 = vld [vmem:[%s3980_s17 + $0x68] sm:$0xff] }
0x1516   :  { %3043 = vmatprep.mubr.msk.bf16.mxu1 %vm3160_vm3, %v3159_v45  ;;  %v2337_v31 = vpack.c.bf16 %v2643_v30, %v2642_v29 }
0x15cd   :  { %v2043_v34 = vpop.f32.mrf.mxu1 }
0x15cf   :  { %v3019_v35 = vpop.f32.mrf.mxu1 }
0x15d0   :  { %v2638_v35 = vld [vmem:[%s3980_s17 + $0x40] sm:$0xff] }
0x15d1   :  { %v2046_v36 = vpop.f32.mrf.mxu1 }
0x15d2   :  { %v2639_v36 = vld [vmem:[%s3980_s17 + $0x48] sm:$0xff] }
0x15d3   :  { %v3020_v37 = vpop.f32.mrf.mxu1 }
0x15d4   :  { %v2335_v37 = vpack.c.bf16 %v2639_v36, %v2638_v35  ;;  %v2653_v36 = vld [vmem:[%s3985_s22] ss:$0 sm:$0xff] }
0x15d5   :  { %v2150_v38 = vpop.f32.mrf.mxu1 }
0x15d6   :  { %v2159_v39 = vpack.c.bf16 %v2150_v38, %v2043_v34  ;;  %v2336_v34 = vpack.c.bf16 %v2641_v33, %v2640_v32  ;;  %v2636_v38 = vld [vmem:[%s3979_s16 + $0x1] ss:$0 sm:$0xff] }
0x15d7   :  { %v3031_v40 = vpop.f32.mrf.mxu1 }
0x15d8   :  { %3036 = vmatmul.mubr.msk.bf16.vlgmr.msra.gmra.mxu0 %vm401_vm4, %v2159_v39 }
0x15d9   :  { %v2153_v41 = vpop.f32.mrf.mxu1  ;;  %3055 = vmatprep.mubr.msk.bf16.mxu0 %vm3160_vm3, %v3159_v45  ;;  %3048 = vmatpush3.bf16.msra.mxu0 %v2338_v28  ;;  %v2651_v28 = vld [vmem:[%s3982_s19 + $0x1] ss:$0 sm:$0xff]  ;;  %s3161_s19 = smov [#allocation2]  }
0x15da   :  { %3049 = vmatprep.subr.bf16.mxu0 %v3159_v45  ;;  %s2504_s24 = sshll.u32 %s3161_s19, 4  ;;  %s2505_s24 = int_to_ptr.vmem [resolvable:$true] %s2504_s24 }
0x15db   :  { %v3032_v42 = vpop.f32.mrf.mxu1  ;;  %p3140_p1 = scmp.lt.s32.totalorder %s2505_s24, %s2505_s24 }
0x15dd   :  { %3050 = vmatpush3.bf16.msra.mxu0 %v2337_v31 }
0x15de   :  { %3051 = vmatprep.subr.bf16.mxu0 %v3159_v45 }
0x15e1   :  { %3052 = vmatpush3.bf16.msra.mxu0 %v2336_v34 }
0x15e2   :  { %3053 = vmatprep.subr.bf16.mxu0 %v3159_v45 }
0x15e5   :  { %3054 = vmatpush3.bf16.msra.mxu0 %v2335_v37 }
0x1698   :  { %v2198_v47 = vpop.f32.mrf.mxu0 }
0x1699   :  { %v2205_v48 = vadd.f32 %v2198_v47, %v1772_v46 }
0x169a   :  { %v3037_v49 = vpop.f32.mrf.mxu0 }
0x169b   :  { %v2207_v51 = vadd.f32 %v2205_v48, %v3685_v57 }
0x169c   :  { %v2201_v52 = vpop.f32.mrf.mxu0 }
0x169d   :  { %v2206_v53 = vadd.f32 %v2201_v52, %v1773_v50  ;;  %v2213_v54 = vsel %vm187_vm2, %v2207_v51, 0.0 }
0x169e   :  { %2214 = vadd.xlane.f32.xlu1 %v2213_v54  ;;  %v3038_v55 = vpop.f32.mrf.mxu0 }
0x169f   :  { %v2208_v56 = vadd.f32 %v2206_v53, %v3687_v59  ;;  %v2633_v59 = vld [vmem:[%s3978_s15 + $0x30] sm:$0xff] }
0x16a0   :  { %v2262_v9 = vpack.c.bf16 %v2634_v8, %v2633_v59 }
0x16a1   :  { %v2216_v60 = vsel %vm187_vm2, %v2208_v56, 0.0 }
0x16a2   :  { %2217 = vadd.xlane.f32.xlu0 %v2216_v60  ;;  %3040 = vmatpush3.bf16.msra.mxu1 %v2262_v9 }
0x16a3   :  { %3041 = vmatprep.subr.bf16.mxu1 %v3159_v45 }
0x16a6   :  { %3042 = vmatpush3.bf16.msra.mxu1 %v2261_v4 }
0x16a7   :  { %3059 = vmatprep.subr.bf16.mxu1 %v3159_v45 }
0x1727   :  { %v2215_v62 = vpop.xlane.xlu1 %2214 }
0x1728   :  { %v2219_v61 = vmul.f32 0.03125, %v2215_v62  ;;  %v2647_v62 = vld [vmem:[%s4011_s0 + $0x1] ss:$0 sm:$0xff] }
0x172a   :  { %v2221_v63 = vsub.f32 %v2207_v51, %v2219_v61 }
0x172b   :  { %v2218_v0 = vpop.xlane.xlu0 %2217 }
0x172c   :  { %v2220_v3 = vmul.f32 0.03125, %v2218_v0  ;;  %v2223_v5 = vmul.f32 %v2221_v63, %v2221_v63 }
0x172e   :  { %v2222_v43 = vsub.f32 %v2208_v56, %v2220_v3  ;;  %v2225_v57 = vsel %vm187_vm2, %v2223_v5, 0.0 }
0x172f   :  { %2226 = vadd.xlane.f32.xlu1 %v2225_v57 }
0x1730   :  { %v2224_v6 = vmul.f32 %v2222_v43, %v2222_v43 }
0x1732   :  { %v2228_v7 = vsel %vm187_vm2, %v2224_v6, 0.0 }
0x1733   :  { %2229 = vadd.xlane.f32.xlu0 %v2228_v7 }
0x17b8   :  { %v2227_v12 = vpop.xlane.xlu1 %2226 }
0x17b9   :  { %v2231_v13 = vmul.f32 0.03125, %v2227_v12 }
0x17bb   :  { %v2233_v14 = vadd.f32 1e-12, %v2231_v13 }
0x17bc   :  { %v2230_v15 = vpop.xlane.xlu0 %2229 }
0x17bd   :  { %3123 = vrsqrt.f32 %v2233_v14  ;;  %v2232_v58 = vmul.f32 0.03125, %v2230_v15 }
0x17bf   :  { %v2234_v1 = vadd.f32 1e-12, %v2232_v58 }
0x17c1   :  { %3125 = vrsqrt.f32 %v2234_v1  ;;  %v2441_v1 = vld [vmem:[%s3984_s21 + $0x10] sm:$0xff] }
0x17ca   :  { %v3124_v16 = vpop.eup %3123 }
0x17cb   :  { %v2237_v17 = vmul.f32 %v3124_v16, %v2221_v63  ;;  %v2442_v16 = vld [vmem:[%s3984_s21 + $0x18] sm:$0xff] }
0x17cd   :  { %v2245_v20 = vmul.f32 %v2629_v2, %v2237_v17  ;;  %v2445_v17 = vpack.c.bf16 %v2442_v16, %v2441_v1 }
0x17ce   :  { %v3126_v18 = vpop.eup %3125 }
0x17cf   :  { %v2238_v19 = vmul.f32 %v3126_v18, %v2222_v43  ;;  %v2253_v23 = vadd.f32 %v2630_v21, %v2245_v20  ;;  %v2440_v18 = vld [vmem:[%s3984_s21 + $0x8] sm:$0xff] }
0x17d1   :  { %v2246_v22 = vmul.f32 %v2629_v2, %v2238_v19  ;;  %v2439_v2 = vld [vmem:[%s3984_s21] sm:$0xff] }
0x17d2   :  { %v2444_v19 = vpack.c.bf16 %v2440_v18, %v2439_v2 }
0x17d3   :  { %v2254_v24 = vadd.f32 %v2630_v21, %v2246_v22 }
0x17d5   :  { %v2260_v25 = vpack.c.bf16 %v2254_v24, %v2253_v23 }
0x17d7   :  { %3044 = vmatmul.mubr.msk.bf16.vlgmr.msra.gmra.mxu1 %vm187_vm2, %v2260_v25 }
0x17d8   :  { %3063 = vmatprep.mubr.msk.bf16.mxu1 %vm3160_vm3, %v3159_v45  ;;  %3060 = vmatpush3.bf16.msra.mxu1 %v2445_v17 }
0x17d9   :  { %3061 = vmatprep.subr.bf16.mxu1 %v3159_v45  ;;  %v2652_v45 = vld [vmem:[%s3983_s20 + $0x1] ss:$0 sm:$0xff]  ;;  %s3135_s20 = scalar_lea.vmem %s2505_s24, 256 }
0x17da   :  { %p3136_p0 = scmp.ne.s32.totalorder %s2505_s24, %s3135_s20  ;;  %p3141_p2 = scmp.lt.s32.totalorder %s3135_s20, %s3135_s20 }
0x17dc   :  { %3062 = vmatpush3.bf16.msra.mxu1 %v2444_v19  ;;  %p3142_p3 = por %p3141_p2, %p3140_p1 }
0x17de   :  { %p3143_p4 = pnand %p3142_p3, %p3136_p0 }
0x1897   :  { %v2308_v39 = vpop.f32.mrf.mxu1 }
0x1898   :  { %v2309_v40 = vadd.f32 %v2636_v38, %v2308_v39 }
0x1899   :  { %v3045_v41 = vpop.f32.mrf.mxu1 }
0x189a   :  { %v2317_v42 = vmul.f32 0.70710677, %v2309_v40  ;;  %v2315_v52 = vmul.f32 0.5, %v2309_v40 }
0x189b   :  { %v2311_v44 = vpop.f32.mrf.mxu1 }
0x189c   :  { %3127 = verf.f32 %v2317_v42  ;;  %v2312_v46 = vadd.f32 %v2636_v38, %v2311_v44 }
0x189d   :  { %v3046_v47 = vpop.f32.mrf.mxu1 }
0x189e   :  { %v2318_v48 = vmul.f32 0.70710677, %v2312_v46  ;;  %v2316_v53 = vmul.f32 0.5, %v2312_v46 }
0x18a0   :  { %3129 = verf.f32 %v2318_v48 }
0x18a9   :  { %v3128_v49 = vpop.eup %3127 }
0x18aa   :  { %v2321_v50 = vadd.f32 1.0, %v3128_v49 }
0x18ac   :  { %v2323_v55 = vmul.f32 %v2321_v50, %v2315_v52 }
0x18ad   :  { %v3130_v51 = vpop.eup %3129 }
0x18ae   :  { %v2322_v54 = vadd.f32 1.0, %v3130_v51 }
0x18b0   :  { %v2324_v56 = vmul.f32 %v2322_v54, %v2316_v53 }
0x18b2   :  { %v2334_v60 = vpack.c.bf16 %v2324_v56, %v2323_v55 }
0x18b4   :  { %3056 = vmatmul.mubr.msk.bf16.vlgmr.msra.gmra.mxu0 %vm1238_vm7, %v2334_v60 }
0x1974   :  { %v2384_v61 = vpop.f32.mrf.mxu0 }
0x1975   :  { %v2385_v63 = vadd.f32 %v2647_v62, %v2384_v61 }
0x1976   :  { %v3057_v0 = vpop.f32.mrf.mxu0 }
0x1977   :  { %v2391_v3 = vadd.f32 %v2385_v63, %v2253_v23 }
0x1978   :  { %v2387_v5 = vpop.f32.mrf.mxu0 }
0x1979   :  { %v2388_v43 = vadd.f32 %v2647_v62, %v2387_v5  ;;  %v2397_v57 = vsel %vm187_vm2, %v2391_v3, 0.0 }
0x197a   :  { %2398 = vadd.xlane.f32.xlu1 %v2397_v57  ;;  %v3058_v6 = vpop.f32.mrf.mxu0 }
0x197b   :  { %v2392_v7 = vadd.f32 %v2388_v43, %v2254_v24 }
0x197d   :  { %v2400_v59 = vsel %vm187_vm2, %v2392_v7, 0.0 }
0x197e   :  { %2401 = vadd.xlane.f32.xlu0 %v2400_v59 }
0x1a03   :  { %v2399_v8 = vpop.xlane.xlu1 %2398 }
0x1a04   :  { %v2403_v9 = vmul.f32 0.03125, %v2399_v8 }
0x1a06   :  { %v2405_v10 = vsub.f32 %v2391_v3, %v2403_v9 }
0x1a07   :  { %v2402_v11 = vpop.xlane.xlu0 %2401 }
0x1a08   :  { %v2404_v4 = vmul.f32 0.03125, %v2402_v11  ;;  %v2407_v12 = vmul.f32 %v2405_v10, %v2405_v10 }
0x1a0a   :  { %v2406_v13 = vsub.f32 %v2392_v7, %v2404_v4  ;;  %v2409_v14 = vsel %vm187_vm2, %v2407_v12, 0.0 }
0x1a0b   :  { %2410 = vadd.xlane.f32.xlu1 %v2409_v14 }
0x1a0c   :  { %v2408_v15 = vmul.f32 %v2406_v13, %v2406_v13 }
0x1a0e   :  { %v2412_v58 = vsel %vm187_vm2, %v2408_v15, 0.0 }
0x1a0f   :  { %2413 = vadd.xlane.f32.xlu0 %v2412_v58 }
0x1a94   :  { %v2411_v20 = vpop.xlane.xlu1 %2410 }
0x1a95   :  { %v2415_v21 = vmul.f32 0.03125, %v2411_v20 }
0x1a97   :  { %v2417_v22 = vadd.f32 1e-12, %v2415_v21 }
0x1a98   :  { %v2414_v23 = vpop.xlane.xlu0 %2413 }
0x1a99   :  { %3131 = vrsqrt.f32 %v2417_v22  ;;  %v2416_v24 = vmul.f32 0.03125, %v2414_v23 }
0x1a9b   :  { %v2418_v25 = vadd.f32 1e-12, %v2416_v24 }
0x1a9d   :  { %3133 = vrsqrt.f32 %v2418_v25 }
0x1aa6   :  { %v3132_v26 = vpop.eup %3131 }
0x1aa7   :  { %v2421_v27 = vmul.f32 %v3132_v26, %v2405_v10 }
0x1aa9   :  { %v2429_v31 = vmul.f32 %v2651_v28, %v2421_v27 }
0x1aaa   :  { %v3134_v29 = vpop.eup %3133 }
0x1aab   :  { %v2422_v30 = vmul.f32 %v3134_v29, %v2406_v13  ;;  %v2437_v33 = vadd.f32 %v2652_v45, %v2429_v31 }
0x1aad   :  { %v2430_v32 = vmul.f32 %v2651_v28, %v2422_v30 }
0x1aaf   :  { %v2438_v34 = vadd.f32 %v2652_v45, %v2430_v32 }
0x1ab1   :  { %v2443_v35 = vpack.c.bf16 %v2438_v34, %v2437_v33 }
0x1ab3   :  { %3064 = vmatmul.mubr.msk.bf16.vlgmr.msra.gmra.mxu1 %vm187_vm2, %v2443_v35 }
0x1b73   :  { %v2490_v37 = vpop.f32.mrf.mxu1 }
0x1b74   :  { %v2491_v38 = vadd.f32 %v2653_v36, %v2490_v37 }
0x1b75   :  { %v3065_v39 = vpop.f32.mrf.mxu1 }
0x1b76   :  { %2497 = vst [vmem:[#allocation2] sm:$0xff] %v2491_v38 }
0x1b77   :  { %v2493_v40 = vpop.f32.mrf.mxu1 }
0x1b78   :  { %v2494_v41 = vadd.f32 %v2653_v36, %v2493_v40 }
0x1b79   :  { %v3066_v42 = vpop.f32.mrf.mxu1 }
0x1b7a   :  { %2498 = vst [vmem:[#allocation2 + $0x8] sm:$0xff] %v2494_v41 }
0x1b7b   :  { %3146 = shalt.err (!%p3143_p4)
}
0x1b7c   :  { %s3162_s5 = smov 128   ;;  %s3163_s22 = smov 8  }
0x1b7d   :  { %2510 = dma.vmem_to_hbm [thread:$0]  %s2505_s24, 256, %s3986_s23, [#allocation3], %s3162_s5, %s3162_s5, %s3163_s22  }
0x1b7e   :  { %3155 = dma.done.wait [#allocation3], 256  }
0x1b7f   :  { %3156 = vsyncadd [#allocation3], 4294967040 }
0x1b80   :  { %2514 = vsyncpa [#allocation3], 1 }

</bundles_post_ra>
